<compile_context>
chip_gen: v5e
topology: v5e:2x2
jax: 0.10.0
libtpu: 0.0.40
codegen_flags: <defaults>
</compile_context>

<pallas_src>
import jax
import jax.numpy as jnp
import numpy as np
from jax.experimental import pallas as pl
from jax.experimental.pallas import tpu as pltpu


def _silu(x):
    return x * jax.nn.sigmoid(x)


# --------------------------------------------------------------------------
# Pallas kernel: whole ConvEGNN4_obs forward for one tile of TM node-rows.
# --------------------------------------------------------------------------
def egnn4_kernel(ped_ref, h_ref, relx_ref, rely_ref, vel_ref, mask_ref,
                 wh3_ref, wsq_ref, vrows_ref, scal_ref,
                 out1_ref, out2_ref):
    TM, H = h_ref.shape
    K = mask_ref.shape[-1]

    ped = ped_ref[...]          # [TM, 6]
    h = h_ref[...]              # [TM, H]
    relx = relx_ref[...]        # [TM, K]
    rely = rely_ref[...]        # [TM, K]
    vels = vel_ref[...]         # [TM, K]  |rela_features[..., 2:4]|
    mask = mask_ref[...]        # [TM, K]  float 0/1

    dists = jnp.sqrt(relx * relx + rely * rely)          # [TM, K]

    vrows = vrows_ref[...]                               # [10, H] f32
    we1_d = vrows[0:1, :]
    we1_v = vrows[1:2, :]
    be1 = vrows[2:3, :]
    be2 = vrows[3:4, :]
    bx1 = vrows[4:5, :]
    ba1 = vrows[5:6, :]
    bh1 = vrows[6:7, :]
    bh2 = vrows[7:8, :]
    wx2_r = vrows[8:9, :]
    wa2_r = vrows[9:10, :]
    scal = scal_ref[...]                                 # [1, 2]
    bx2 = scal[0:1, 0:1]
    ba2 = scal[0:1, 1:2]

    # Fused [TM,H] @ [H,3H] = { f_e L1 (h part) | f_a L1 | f_h L1 (h part) }
    fused = jnp.dot(h.astype(jnp.bfloat16), wh3_ref[...],
                    preferred_element_type=jnp.float32)  # [TM, 3H] f32
    hW_e = fused[:, 0:H] + be1
    a_hid = _silu(fused[:, H:2 * H] + ba1)
    fh_hpart = fused[:, 2 * H:3 * H]

    # ---- edge path: fold K into rows; edge row e = k*TM + m (k-major) ----
    pre_parts = []
    for k in range(K):
        pre_parts.append(hW_e + dists[:, k:k + 1] * we1_d
                         + vels[:, k:k + 1] * we1_v)
    z1 = _silu(jnp.concatenate(pre_parts, axis=0))       # [K*TM, H]

    we2 = wsq_ref[0]     # bf16 [H, H]
    wx1 = wsq_ref[1]
    wh1_m = wsq_ref[2]
    wh2 = wsq_ref[3]

    z2 = _silu(jnp.dot(z1.astype(jnp.bfloat16), we2,
                       preferred_element_type=jnp.float32) + be2)   # [K*TM, H]
    mask_col = jnp.concatenate([mask[:, k:k + 1] for k in range(K)], axis=0)
    m = z2 * mask_col          # masked m_ij                         # [K*TM, H]

    # f_x: layer 1 on MXU, layer 2 (width 1) as VPU mul + lane reduce
    t = _silu(jnp.dot(m.astype(jnp.bfloat16), wx1,
                      preferred_element_type=jnp.float32) + bx1)     # [K*TM, H]
    u = jnp.sum(t * wx2_r, axis=-1, keepdims=True) + bx2             # [K*TM, 1]

    # per-node reductions over the K row-blocks
    m_i = jnp.zeros((TM, H), jnp.float32)
    agg_x = jnp.zeros((TM, 1), jnp.float32)
    agg_y = jnp.zeros((TM, 1), jnp.float32)
    for k in range(K):
        m_i = m_i + m[k * TM:(k + 1) * TM, :]
        u_k = u[k * TM:(k + 1) * TM, :]
        agg_x = agg_x + relx[:, k:k + 1] * u_k
        agg_y = agg_y + rely[:, k:k + 1] * u_k

    neigh_num = jnp.sum(mask, axis=-1, keepdims=True)                # [TM, 1]
    inv = pl.reciprocal(neigh_num + 1e-6, approx=True)
    agg_x = agg_x * inv
    agg_y = agg_y * inv

    # f_a gate (width-1 head as VPU mul + lane reduce)
    a_gate = jnp.sum(a_hid * wa2_r, axis=-1, keepdims=True) + ba2    # [TM, 1]

    a_new = a_gate * ped[:, 4:6] + jnp.concatenate([agg_x, agg_y], axis=-1)
    v_new = ped[:, 2:4] + a_new
    x_new = ped[:, 0:2] + v_new
    out1_ref[...] = jnp.concatenate(
        [x_new, v_new, a_new, jnp.zeros((TM, 2), jnp.float32)], axis=-1)  # [TM, 8]

    # f_h (first layer split: h-part came from the fused matmul)
    pre_h = fh_hpart + jnp.dot(m_i.astype(jnp.bfloat16), wh1_m,
                               preferred_element_type=jnp.float32) + bh1
    hh = jnp.dot(_silu(pre_h).astype(jnp.bfloat16), wh2,
                 preferred_element_type=jnp.float32) + bh2
    out2_ref[...] = h + hh                                           # [TM, H]


# --------------------------------------------------------------------------
# Wrapper: flatten axes, pack weights, pad rows, build BlockSpecs, call.
# --------------------------------------------------------------------------
def _pad_rows(x, rows):
    if x.shape[0] == rows:
        return x
    pad = jnp.zeros((rows - x.shape[0],) + x.shape[1:], x.dtype)
    return jnp.concatenate([x, pad], axis=0)


def conv_egnn4_obs_pallas(ped_features, h_st_ped, rela_features, neigh_mask,
                          params, *, tm=128):
    bs, N, _ = ped_features.shape
    K = rela_features.shape[2]
    H = h_st_ped.shape[-1]
    M = bs * N
    p = params
    assert p['we1'].shape[0] == H + 2 and p['wh1'].shape[0] == 2 * H, \
        "kernel assumes in_dim == hid_dim (required by the residual h update)"

    # Row tile: multiple of 8, as large as requested; keep >= 2 grid steps
    # when possible so both v7x TensorCores get work.
    tm = min(tm, M)
    tm = max(8, (tm // 8) * 8)
    if (M + tm - 1) // tm < 2 and M >= 16:
        tm = max(8, ((M // 2) // 8) * 8)
    M_pad = ((M + tm - 1) // tm) * tm
    grid = (M_pad // tm,)

    f32 = jnp.float32
    ped = _pad_rows(ped_features.reshape(M, 6).astype(f32), M_pad)
    h = _pad_rows(h_st_ped.reshape(M, H).astype(f32), M_pad)
    relx = _pad_rows(rela_features[..., 0].reshape(M, K).astype(f32), M_pad)
    rely = _pad_rows(rela_features[..., 1].reshape(M, K).astype(f32), M_pad)
    vels = _pad_rows(jnp.sqrt(rela_features[..., 2] ** 2
                              + rela_features[..., 3] ** 2)
                     .reshape(M, K).astype(f32), M_pad)
    mask = _pad_rows(neigh_mask.reshape(M, K).astype(f32), M_pad)

    # ---- pack weights (bf16 for MXU operands, f32 for VPU rows/biases) ----
    we1 = p['we1'].astype(f32)   # [H+2, H]: rows = h part | dist | vel
    wh1 = p['wh1'].astype(f32)   # [2H,  H]: rows = h part | m_i part
    w_h3 = jnp.concatenate([we1[:H], p['wa1'].astype(f32), wh1[:H]],
                           axis=1).astype(jnp.bfloat16)               # [H, 3H]
    w_sq = jnp.stack([p['we2'], p['wx1'], wh1[H:], p['wh2']]
                     ).astype(jnp.bfloat16)                           # [4, H, H]
    vrows = jnp.stack([we1[H], we1[H + 1], p['be1'], p['be2'], p['bx1'],
                       p['ba1'], p['bh1'], p['bh2'],
                       p['wx2'][:, 0], p['wa2'][:, 0]]).astype(f32)   # [10, H]
    scal = jnp.array([[p['bx2'][0], p['ba2'][0]]], f32)               # [1, 2]

    data_specs = [
        pl.BlockSpec((tm, 6), lambda i: (i, 0)),
        pl.BlockSpec((tm, H), lambda i: (i, 0)),
        pl.BlockSpec((tm, K), lambda i: (i, 0)),
        pl.BlockSpec((tm, K), lambda i: (i, 0)),
        pl.BlockSpec((tm, K), lambda i: (i, 0)),
        pl.BlockSpec((tm, K), lambda i: (i, 0)),
    ]
    weight_specs = [
        pl.BlockSpec((H, 3 * H), lambda i: (0, 0)),
        pl.BlockSpec((4, H, H), lambda i: (0, 0, 0)),
        pl.BlockSpec((10, H), lambda i: (0, 0)),
        pl.BlockSpec((1, 2), lambda i: (0, 0)),
    ]
    out_specs = [pl.BlockSpec((tm, 8), lambda i: (i, 0)),
                 pl.BlockSpec((tm, H), lambda i: (i, 0))]

    out1, out2 = pl.pallas_call(
        egnn4_kernel,
        out_shape=(jax.ShapeDtypeStruct((M_pad, 8), f32),
                   jax.ShapeDtypeStruct((M_pad, H), f32)),
        grid_spec=pltpu.PrefetchScalarGridSpec(
            num_scalar_prefetch=0,
            grid=grid,
            in_specs=data_specs + weight_specs,
            out_specs=out_specs,
        ),
        compiler_params=pltpu.CompilerParams(
            dimension_semantics=("parallel",)),
    )(ped, h, relx, rely, vels, mask, w_h3, w_sq, vrows, scal)

    return (out1[:M, :6].reshape(bs, N, 6),
            out2[:M].reshape(bs, N, H))


# --------------------------------------------------------------------------
# Pure-JAX reference (mirrors the PyTorch ConvEGNN4_obs forward exactly)
# --------------------------------------------------------------------------
def reference(ped, h, rela, mask, p):
    def fe(x): return _silu(_silu(x @ p['we1'] + p['be1']) @ p['we2'] + p['be2'])
    def fx(x): return _silu(x @ p['wx1'] + p['bx1']) @ p['wx2'] + p['bx2']
    def fa(x): return _silu(x @ p['wa1'] + p['ba1']) @ p['wa2'] + p['ba2']
    def fh(x): return _silu(x @ p['wh1'] + p['bh1']) @ p['wh2'] + p['bh2']

    rela_vel = jnp.sqrt(jnp.sum(rela[..., 2:4] ** 2, axis=-1))         # [bs,N,k]
    dists = jnp.sqrt(jnp.sum(rela[..., :2] ** 2, axis=-1))             # [bs,N,k]
    neigh_num = mask.astype(jnp.float32).sum(-1)                       # [bs,N]
    K = dists.shape[-1]
    h_rep = jnp.broadcast_to(h[:, :, None, :], h.shape[:2] + (K, h.shape[-1]))
    tmp = jnp.concatenate([h_rep, dists[..., None], rela_vel[..., None]], axis=-1)
    m_ij = fe(tmp)
    m_ij = jnp.where(mask[..., None] > 0, m_ij, 0.0)
    agg = rela[..., :2] * fx(m_ij)
    agg = (1.0 / (neigh_num[..., None] + 1e-6)) * agg.sum(-2)
    a_new = fa(h) * ped[..., 4:] + agg
    v_new = ped[..., 2:4] + a_new
    x_new = ped[..., :2] + v_new
    m_i = m_ij.sum(-2)
    h_new = h + fh(jnp.concatenate([h, m_i], axis=-1))
    return jnp.concatenate([x_new, v_new, a_new], -1), h_new


# --------------------------------------------------------------------------
def make_params(key, in_dim, hid_dim):
    # Synthetic init; weights stored [in, out] so y = x @ W + b.
    ks = jax.random.split(key, 16)

    def u(k, shape, fan_in):
        lim = 1.0 / np.sqrt(fan_in)
        return jax.random.uniform(k, shape, jnp.float32, -lim, lim)

    H = hid_dim
    return dict(
        we1=u(ks[0], (in_dim + 2, H), in_dim + 2), be1=u(ks[1], (H,), in_dim + 2),
        we2=u(ks[2], (H, H), H),                   be2=u(ks[3], (H,), H),
        wx1=u(ks[4], (H, H), H),                   bx1=u(ks[5], (H,), H),
        wx2=u(ks[6], (H, 1), H),                   bx2=u(ks[7], (1,), H),
        wa1=u(ks[8], (H, H), H),                   ba1=u(ks[9], (H,), H),
        wa2=u(ks[10], (H, 1), H),                  ba2=u(ks[11], (1,), H),
        wh1=u(ks[12], (in_dim + H, H), in_dim + H), bh1=u(ks[13], (H,), in_dim + H),
        wh2=u(ks[14], (H, H), H),                  bh2=u(ks[15], (H,), H),
    )


if __name__ == "__main__":
    bs, N, K = 2, 16, 8
    in_dim = hid_dim = 32   # residual h + f_h(...) requires in_dim == hid_dim

    key = jax.random.PRNGKey(0)
    k_ped, k_h, k_rel, k_mask, k_par = jax.random.split(key, 5)

    ped_features = jax.random.normal(k_ped, (bs, N, 6), jnp.float32)
    h_st_ped = jax.random.normal(k_h, (bs, N, hid_dim), jnp.float32)
    rela_features = jax.random.normal(k_rel, (bs, N, K, 4), jnp.float32)
    neigh_mask = (jax.random.uniform(k_mask, (bs, N, K)) > 0.4).astype(jnp.float32)

    params = make_params(k_par, in_dim, hid_dim)

    out1, out2 = conv_egnn4_obs_pallas(ped_features, h_st_ped, rela_features,
                                       neigh_mask, params, tm=128)
    out1, out2 = jax.block_until_ready((out1, out2))

    ref1, ref2 = reference(ped_features, h_st_ped, rela_features, neigh_mask, params)
    # bf16 MXU operands (f32 accumulate) vs the f32 reference -> looser check.
    np.testing.assert_allclose(np.asarray(out1), np.asarray(ref1), rtol=5e-2, atol=5e-2)
    np.testing.assert_allclose(np.asarray(out2), np.asarray(ref2), rtol=5e-2, atol=5e-2)

    print("KERNEL_OK")
</pallas_src>

<mosaic_0001>
module attributes {stable_mosaic.version = 11 : i64} {
  func.func @egnn4_kernel(%arg0: i32, %arg1: memref<16x6xf32, #tpu.memory_space<vmem>>, %arg2: memref<16x32xf32, #tpu.memory_space<vmem>>, %arg3: memref<16x8xf32, #tpu.memory_space<vmem>>, %arg4: memref<16x8xf32, #tpu.memory_space<vmem>>, %arg5: memref<16x8xf32, #tpu.memory_space<vmem>>, %arg6: memref<16x8xf32, #tpu.memory_space<vmem>>, %arg7: memref<32x96xbf16, #tpu.memory_space<vmem>>, %arg8: memref<4x32x32xbf16, #tpu.memory_space<vmem>>, %arg9: memref<10x32xf32, #tpu.memory_space<vmem>>, %arg10: memref<1x2xf32, #tpu.memory_space<vmem>>, %arg11: memref<16x8xf32, #tpu.memory_space<vmem>>, %arg12: memref<16x32xf32, #tpu.memory_space<vmem>>) attributes {dimension_semantics = [#tpu.dimension_semantics<parallel>], iteration_bounds = array<i64: 2>, scalar_prefetch = 0 : i64, scratch_operands = 0 : i64, tpu.core_type = #tpu.core_type<tc>, window_params = [{transform_indices = @transform_0, window_bounds = array<i64: 16, 6>}, {transform_indices = @transform_1, window_bounds = array<i64: 16, 32>}, {transform_indices = @transform_2, window_bounds = array<i64: 16, 8>}, {transform_indices = @transform_3, window_bounds = array<i64: 16, 8>}, {transform_indices = @transform_4, window_bounds = array<i64: 16, 8>}, {transform_indices = @transform_5, window_bounds = array<i64: 16, 8>}, {pipeline_mode = #tpu.pipeline_mode<synchronous>, transform_indices = @transform_6, window_bounds = array<i64: 32, 96>}, {pipeline_mode = #tpu.pipeline_mode<synchronous>, transform_indices = @transform_7, window_bounds = array<i64: 4, 32, 32>}, {pipeline_mode = #tpu.pipeline_mode<synchronous>, transform_indices = @transform_8, window_bounds = array<i64: 10, 32>}, {pipeline_mode = #tpu.pipeline_mode<synchronous>, transform_indices = @transform_9, window_bounds = array<i64: 1, 2>}, {transform_indices = @transform_10, window_bounds = array<i64: 16, 8>}, {transform_indices = @transform_11, window_bounds = array<i64: 16, 32>}]} {
    %c0 = arith.constant 0 : index
    %c0_0 = arith.constant 0 : index
    %0 = vector.load %arg1[%c0, %c0_0] : memref<16x6xf32, #tpu.memory_space<vmem>>, vector<16x6xf32>
    %c0_1 = arith.constant 0 : index
    %c0_2 = arith.constant 0 : index
    %1 = vector.load %arg2[%c0_1, %c0_2] : memref<16x32xf32, #tpu.memory_space<vmem>>, vector<16x32xf32>
    %c0_3 = arith.constant 0 : index
    %c0_4 = arith.constant 0 : index
    %2 = vector.load %arg3[%c0_3, %c0_4] : memref<16x8xf32, #tpu.memory_space<vmem>>, vector<16x8xf32>
    %c0_5 = arith.constant 0 : index
    %c0_6 = arith.constant 0 : index
    %3 = vector.load %arg4[%c0_5, %c0_6] : memref<16x8xf32, #tpu.memory_space<vmem>>, vector<16x8xf32>
    %c0_7 = arith.constant 0 : index
    %c0_8 = arith.constant 0 : index
    %4 = vector.load %arg5[%c0_7, %c0_8] : memref<16x8xf32, #tpu.memory_space<vmem>>, vector<16x8xf32>
    %c0_9 = arith.constant 0 : index
    %c0_10 = arith.constant 0 : index
    %5 = vector.load %arg6[%c0_9, %c0_10] : memref<16x8xf32, #tpu.memory_space<vmem>>, vector<16x8xf32>
    %6 = arith.mulf %2, %2 : vector<16x8xf32>
    %7 = arith.mulf %3, %3 : vector<16x8xf32>
    %8 = arith.addf %6, %7 : vector<16x8xf32>
    %9 = math.sqrt %8 : vector<16x8xf32>
    %c0_11 = arith.constant 0 : index
    %c0_12 = arith.constant 0 : index
    %10 = vector.load %arg9[%c0_11, %c0_12] : memref<10x32xf32, #tpu.memory_space<vmem>>, vector<10x32xf32>
    %11 = vector.extract_strided_slice %10 {offsets = [0, 0], sizes = [1, 32], strides = [1, 1]} : vector<10x32xf32> to vector<1x32xf32>
    %12 = vector.extract_strided_slice %10 {offsets = [1, 0], sizes = [1, 32], strides = [1, 1]} : vector<10x32xf32> to vector<1x32xf32>
    %13 = vector.extract_strided_slice %10 {offsets = [2, 0], sizes = [1, 32], strides = [1, 1]} : vector<10x32xf32> to vector<1x32xf32>
    %14 = vector.extract_strided_slice %10 {offsets = [3, 0], sizes = [1, 32], strides = [1, 1]} : vector<10x32xf32> to vector<1x32xf32>
    %15 = vector.extract_strided_slice %10 {offsets = [4, 0], sizes = [1, 32], strides = [1, 1]} : vector<10x32xf32> to vector<1x32xf32>
    %16 = vector.extract_strided_slice %10 {offsets = [5, 0], sizes = [1, 32], strides = [1, 1]} : vector<10x32xf32> to vector<1x32xf32>
    %17 = vector.extract_strided_slice %10 {offsets = [6, 0], sizes = [1, 32], strides = [1, 1]} : vector<10x32xf32> to vector<1x32xf32>
    %18 = vector.extract_strided_slice %10 {offsets = [7, 0], sizes = [1, 32], strides = [1, 1]} : vector<10x32xf32> to vector<1x32xf32>
    %19 = vector.extract_strided_slice %10 {offsets = [8, 0], sizes = [1, 32], strides = [1, 1]} : vector<10x32xf32> to vector<1x32xf32>
    %20 = vector.extract_strided_slice %10 {offsets = [9, 0], sizes = [1, 32], strides = [1, 1]} : vector<10x32xf32> to vector<1x32xf32>
    %c0_13 = arith.constant 0 : index
    %c0_14 = arith.constant 0 : index
    %21 = vector.load %arg10[%c0_13, %c0_14] : memref<1x2xf32, #tpu.memory_space<vmem>>, vector<1x2xf32>
    %22 = vector.extract_strided_slice %21 {offsets = [0, 0], sizes = [1, 1], strides = [1, 1]} : vector<1x2xf32> to vector<1x1xf32>
    %23 = vector.extract_strided_slice %21 {offsets = [0, 1], sizes = [1, 1], strides = [1, 1]} : vector<1x2xf32> to vector<1x1xf32>
    %24 = arith.truncf %1 : vector<16x32xf32> to vector<16x32xbf16>
    %c0_15 = arith.constant 0 : index
    %c0_16 = arith.constant 0 : index
    %25 = vector.load %arg7[%c0_15, %c0_16] : memref<32x96xbf16, #tpu.memory_space<vmem>>, vector<32x96xbf16>
    %cst = arith.constant dense<0.000000e+00> : vector<16x96xf32>
    %26 = tpu.matmul %24, %25, %cst {dimension_numbers = #tpu.dot_dimension_numbers<[1], [0], [0], [1], [0, 0, 1, 1], [], []>} : vector<16x32xbf16>, vector<32x96xbf16>, vector<16x96xf32> -> vector<16x96xf32>
    %27 = vector.extract_strided_slice %26 {offsets = [0, 0], sizes = [16, 32], strides = [1, 1]} : vector<16x96xf32> to vector<16x32xf32>
    %28 = vector.broadcast %13 : vector<1x32xf32> to vector<16x32xf32>
    %29 = arith.addf %27, %28 : vector<16x32xf32>
    %30 = vector.extract_strided_slice %26 {offsets = [0, 32], sizes = [16, 32], strides = [1, 1]} : vector<16x96xf32> to vector<16x32xf32>
    %31 = vector.broadcast %16 : vector<1x32xf32> to vector<16x32xf32>
    %32 = arith.addf %30, %31 : vector<16x32xf32>
    %33 = arith.negf %32 : vector<16x32xf32>
    %34 = math.exp %33 : vector<16x32xf32>
    %cst_17 = arith.constant 1.000000e+00 : f32
    %35 = vector.broadcast %cst_17 : f32 to vector<16x32xf32>
    %36 = arith.addf %35, %34 : vector<16x32xf32>
    %37 = arith.divf %35, %36 : vector<16x32xf32>
    %38 = arith.mulf %32, %37 : vector<16x32xf32>
    %39 = vector.extract_strided_slice %26 {offsets = [0, 64], sizes = [16, 32], strides = [1, 1]} : vector<16x96xf32> to vector<16x32xf32>
    %40 = vector.extract_strided_slice %9 {offsets = [0, 0], sizes = [16, 1], strides = [1, 1]} : vector<16x8xf32> to vector<16x1xf32>
    %41 = vector.broadcast %40 : vector<16x1xf32> to vector<16x32xf32>
    %42 = vector.broadcast %11 : vector<1x32xf32> to vector<16x32xf32>
    %43 = arith.mulf %41, %42 : vector<16x32xf32>
    %44 = arith.addf %29, %43 : vector<16x32xf32>
    %45 = vector.extract_strided_slice %4 {offsets = [0, 0], sizes = [16, 1], strides = [1, 1]} : vector<16x8xf32> to vector<16x1xf32>
    %46 = vector.broadcast %45 : vector<16x1xf32> to vector<16x32xf32>
    %47 = vector.broadcast %12 : vector<1x32xf32> to vector<16x32xf32>
    %48 = arith.mulf %46, %47 : vector<16x32xf32>
    %49 = arith.addf %44, %48 : vector<16x32xf32>
    %50 = vector.extract_strided_slice %9 {offsets = [0, 1], sizes = [16, 1], strides = [1, 1]} : vector<16x8xf32> to vector<16x1xf32>
    %51 = vector.broadcast %50 : vector<16x1xf32> to vector<16x32xf32>
    %52 = vector.broadcast %11 : vector<1x32xf32> to vector<16x32xf32>
    %53 = arith.mulf %51, %52 : vector<16x32xf32>
    %54 = arith.addf %29, %53 : vector<16x32xf32>
    %55 = vector.extract_strided_slice %4 {offsets = [0, 1], sizes = [16, 1], strides = [1, 1]} : vector<16x8xf32> to vector<16x1xf32>
    %56 = vector.broadcast %55 : vector<16x1xf32> to vector<16x32xf32>
    %57 = vector.broadcast %12 : vector<1x32xf32> to vector<16x32xf32>
    %58 = arith.mulf %56, %57 : vector<16x32xf32>
    %59 = arith.addf %54, %58 : vector<16x32xf32>
    %60 = vector.extract_strided_slice %9 {offsets = [0, 2], sizes = [16, 1], strides = [1, 1]} : vector<16x8xf32> to vector<16x1xf32>
    %61 = vector.broadcast %60 : vector<16x1xf32> to vector<16x32xf32>
    %62 = vector.broadcast %11 : vector<1x32xf32> to vector<16x32xf32>
    %63 = arith.mulf %61, %62 : vector<16x32xf32>
    %64 = arith.addf %29, %63 : vector<16x32xf32>
    %65 = vector.extract_strided_slice %4 {offsets = [0, 2], sizes = [16, 1], strides = [1, 1]} : vector<16x8xf32> to vector<16x1xf32>
    %66 = vector.broadcast %65 : vector<16x1xf32> to vector<16x32xf32>
    %67 = vector.broadcast %12 : vector<1x32xf32> to vector<16x32xf32>
    %68 = arith.mulf %66, %67 : vector<16x32xf32>
    %69 = arith.addf %64, %68 : vector<16x32xf32>
    %70 = vector.extract_strided_slice %9 {offsets = [0, 3], sizes = [16, 1], strides = [1, 1]} : vector<16x8xf32> to vector<16x1xf32>
    %71 = vector.broadcast %70 : vector<16x1xf32> to vector<16x32xf32>
    %72 = vector.broadcast %11 : vector<1x32xf32> to vector<16x32xf32>
    %73 = arith.mulf %71, %72 : vector<16x32xf32>
    %74 = arith.addf %29, %73 : vector<16x32xf32>
    %75 = vector.extract_strided_slice %4 {offsets = [0, 3], sizes = [16, 1], strides = [1, 1]} : vector<16x8xf32> to vector<16x1xf32>
    %76 = vector.broadcast %75 : vector<16x1xf32> to vector<16x32xf32>
    %77 = vector.broadcast %12 : vector<1x32xf32> to vector<16x32xf32>
    %78 = arith.mulf %76, %77 : vector<16x32xf32>
    %79 = arith.addf %74, %78 : vector<16x32xf32>
    %80 = vector.extract_strided_slice %9 {offsets = [0, 4], sizes = [16, 1], strides = [1, 1]} : vector<16x8xf32> to vector<16x1xf32>
    %81 = vector.broadcast %80 : vector<16x1xf32> to vector<16x32xf32>
    %82 = vector.broadcast %11 : vector<1x32xf32> to vector<16x32xf32>
    %83 = arith.mulf %81, %82 : vector<16x32xf32>
    %84 = arith.addf %29, %83 : vector<16x32xf32>
    %85 = vector.extract_strided_slice %4 {offsets = [0, 4], sizes = [16, 1], strides = [1, 1]} : vector<16x8xf32> to vector<16x1xf32>
    %86 = vector.broadcast %85 : vector<16x1xf32> to vector<16x32xf32>
    %87 = vector.broadcast %12 : vector<1x32xf32> to vector<16x32xf32>
    %88 = arith.mulf %86, %87 : vector<16x32xf32>
    %89 = arith.addf %84, %88 : vector<16x32xf32>
    %90 = vector.extract_strided_slice %9 {offsets = [0, 5], sizes = [16, 1], strides = [1, 1]} : vector<16x8xf32> to vector<16x1xf32>
    %91 = vector.broadcast %90 : vector<16x1xf32> to vector<16x32xf32>
    %92 = vector.broadcast %11 : vector<1x32xf32> to vector<16x32xf32>
    %93 = arith.mulf %91, %92 : vector<16x32xf32>
    %94 = arith.addf %29, %93 : vector<16x32xf32>
    %95 = vector.extract_strided_slice %4 {offsets = [0, 5], sizes = [16, 1], strides = [1, 1]} : vector<16x8xf32> to vector<16x1xf32>
    %96 = vector.broadcast %95 : vector<16x1xf32> to vector<16x32xf32>
    %97 = vector.broadcast %12 : vector<1x32xf32> to vector<16x32xf32>
    %98 = arith.mulf %96, %97 : vector<16x32xf32>
    %99 = arith.addf %94, %98 : vector<16x32xf32>
    %100 = vector.extract_strided_slice %9 {offsets = [0, 6], sizes = [16, 1], strides = [1, 1]} : vector<16x8xf32> to vector<16x1xf32>
    %101 = vector.broadcast %100 : vector<16x1xf32> to vector<16x32xf32>
    %102 = vector.broadcast %11 : vector<1x32xf32> to vector<16x32xf32>
    %103 = arith.mulf %101, %102 : vector<16x32xf32>
    %104 = arith.addf %29, %103 : vector<16x32xf32>
    %105 = vector.extract_strided_slice %4 {offsets = [0, 6], sizes = [16, 1], strides = [1, 1]} : vector<16x8xf32> to vector<16x1xf32>
    %106 = vector.broadcast %105 : vector<16x1xf32> to vector<16x32xf32>
    %107 = vector.broadcast %12 : vector<1x32xf32> to vector<16x32xf32>
    %108 = arith.mulf %106, %107 : vector<16x32xf32>
    %109 = arith.addf %104, %108 : vector<16x32xf32>
    %110 = vector.extract_strided_slice %9 {offsets = [0, 7], sizes = [16, 1], strides = [1, 1]} : vector<16x8xf32> to vector<16x1xf32>
    %111 = vector.broadcast %110 : vector<16x1xf32> to vector<16x32xf32>
    %112 = vector.broadcast %11 : vector<1x32xf32> to vector<16x32xf32>
    %113 = arith.mulf %111, %112 : vector<16x32xf32>
    %114 = arith.addf %29, %113 : vector<16x32xf32>
    %115 = vector.extract_strided_slice %4 {offsets = [0, 7], sizes = [16, 1], strides = [1, 1]} : vector<16x8xf32> to vector<16x1xf32>
    %116 = vector.broadcast %115 : vector<16x1xf32> to vector<16x32xf32>
    %117 = vector.broadcast %12 : vector<1x32xf32> to vector<16x32xf32>
    %118 = arith.mulf %116, %117 : vector<16x32xf32>
    %119 = arith.addf %114, %118 : vector<16x32xf32>
    %120 = tpu.concatenate %49, %59, %69, %79, %89, %99, %109, %119 in 0 : vector<16x32xf32>, vector<16x32xf32>, vector<16x32xf32>, vector<16x32xf32>, vector<16x32xf32>, vector<16x32xf32>, vector<16x32xf32>, vector<16x32xf32> -> vector<128x32xf32>
    %121 = arith.negf %120 : vector<128x32xf32>
    %122 = math.exp %121 : vector<128x32xf32>
    %cst_18 = arith.constant 1.000000e+00 : f32
    %123 = vector.broadcast %cst_18 : f32 to vector<128x32xf32>
    %124 = arith.addf %123, %122 : vector<128x32xf32>
    %125 = arith.divf %123, %124 : vector<128x32xf32>
    %126 = arith.mulf %120, %125 : vector<128x32xf32>
    %c0_19 = arith.constant 0 : index
    %c0_20 = arith.constant 0 : index
    %c0_21 = arith.constant 0 : index
    %127 = vector.load %arg8[%c0_19, %c0_20, %c0_21] : memref<4x32x32xbf16, #tpu.memory_space<vmem>>, vector<1x32x32xbf16>
    %128 = vector.shape_cast %127 : vector<1x32x32xbf16> to vector<32x32xbf16>
    %c1 = arith.constant 1 : index
    %c0_22 = arith.constant 0 : index
    %c0_23 = arith.constant 0 : index
    %129 = vector.load %arg8[%c1, %c0_22, %c0_23] : memref<4x32x32xbf16, #tpu.memory_space<vmem>>, vector<1x32x32xbf16>
    %130 = vector.shape_cast %129 : vector<1x32x32xbf16> to vector<32x32xbf16>
    %c2 = arith.constant 2 : index
    %c0_24 = arith.constant 0 : index
    %c0_25 = arith.constant 0 : index
    %131 = vector.load %arg8[%c2, %c0_24, %c0_25] : memref<4x32x32xbf16, #tpu.memory_space<vmem>>, vector<1x32x32xbf16>
    %132 = vector.shape_cast %131 : vector<1x32x32xbf16> to vector<32x32xbf16>
    %c3 = arith.constant 3 : index
    %c0_26 = arith.constant 0 : index
    %c0_27 = arith.constant 0 : index
    %133 = vector.load %arg8[%c3, %c0_26, %c0_27] : memref<4x32x32xbf16, #tpu.memory_space<vmem>>, vector<1x32x32xbf16>
    %134 = vector.shape_cast %133 : vector<1x32x32xbf16> to vector<32x32xbf16>
    %135 = arith.truncf %126 : vector<128x32xf32> to vector<128x32xbf16>
    %cst_28 = arith.constant dense<0.000000e+00> : vector<128x32xf32>
    %136 = tpu.matmul %135, %128, %cst_28 {dimension_numbers = #tpu.dot_dimension_numbers<[1], [0], [0], [1], [0, 0, 1, 1], [], []>} : vector<128x32xbf16>, vector<32x32xbf16>, vector<128x32xf32> -> vector<128x32xf32>
    %137 = vector.broadcast %14 : vector<1x32xf32> to vector<128x32xf32>
    %138 = arith.addf %136, %137 : vector<128x32xf32>
    %139 = arith.negf %138 : vector<128x32xf32>
    %140 = math.exp %139 : vector<128x32xf32>
    %cst_29 = arith.constant 1.000000e+00 : f32
    %141 = vector.broadcast %cst_29 : f32 to vector<128x32xf32>
    %142 = arith.addf %141, %140 : vector<128x32xf32>
    %143 = arith.divf %141, %142 : vector<128x32xf32>
    %144 = arith.mulf %138, %143 : vector<128x32xf32>
    %145 = vector.extract_strided_slice %5 {offsets = [0, 0], sizes = [16, 1], strides = [1, 1]} : vector<16x8xf32> to vector<16x1xf32>
    %146 = vector.extract_strided_slice %5 {offsets = [0, 1], sizes = [16, 1], strides = [1, 1]} : vector<16x8xf32> to vector<16x1xf32>
    %147 = vector.extract_strided_slice %5 {offsets = [0, 2], sizes = [16, 1], strides = [1, 1]} : vector<16x8xf32> to vector<16x1xf32>
    %148 = vector.extract_strided_slice %5 {offsets = [0, 3], sizes = [16, 1], strides = [1, 1]} : vector<16x8xf32> to vector<16x1xf32>
    %149 = vector.extract_strided_slice %5 {offsets = [0, 4], sizes = [16, 1], strides = [1, 1]} : vector<16x8xf32> to vector<16x1xf32>
    %150 = vector.extract_strided_slice %5 {offsets = [0, 5], sizes = [16, 1], strides = [1, 1]} : vector<16x8xf32> to vector<16x1xf32>
    %151 = vector.extract_strided_slice %5 {offsets = [0, 6], sizes = [16, 1], strides = [1, 1]} : vector<16x8xf32> to vector<16x1xf32>
    %152 = vector.extract_strided_slice %5 {offsets = [0, 7], sizes = [16, 1], strides = [1, 1]} : vector<16x8xf32> to vector<16x1xf32>
    %153 = tpu.concatenate %145, %146, %147, %148, %149, %150, %151, %152 in 0 : vector<16x1xf32>, vector<16x1xf32>, vector<16x1xf32>, vector<16x1xf32>, vector<16x1xf32>, vector<16x1xf32>, vector<16x1xf32>, vector<16x1xf32> -> vector<128x1xf32>
    %154 = vector.broadcast %153 : vector<128x1xf32> to vector<128x32xf32>
    %155 = arith.mulf %144, %154 : vector<128x32xf32>
    %156 = arith.truncf %155 : vector<128x32xf32> to vector<128x32xbf16>
    %cst_30 = arith.constant dense<0.000000e+00> : vector<128x32xf32>
    %157 = tpu.matmul %156, %130, %cst_30 {dimension_numbers = #tpu.dot_dimension_numbers<[1], [0], [0], [1], [0, 0, 1, 1], [], []>} : vector<128x32xbf16>, vector<32x32xbf16>, vector<128x32xf32> -> vector<128x32xf32>
    %158 = vector.broadcast %15 : vector<1x32xf32> to vector<128x32xf32>
    %159 = arith.addf %157, %158 : vector<128x32xf32>
    %160 = arith.negf %159 : vector<128x32xf32>
    %161 = math.exp %160 : vector<128x32xf32>
    %cst_31 = arith.constant 1.000000e+00 : f32
    %162 = vector.broadcast %cst_31 : f32 to vector<128x32xf32>
    %163 = arith.addf %162, %161 : vector<128x32xf32>
    %164 = arith.divf %162, %163 : vector<128x32xf32>
    %165 = arith.mulf %159, %164 : vector<128x32xf32>
    %166 = vector.broadcast %19 : vector<1x32xf32> to vector<128x32xf32>
    %167 = arith.mulf %165, %166 : vector<128x32xf32>
    %cst_32 = arith.constant dense<0.000000e+00> : vector<128xf32>
    %168 = vector.multi_reduction <add>, %167, %cst_32 [1] : vector<128x32xf32> to vector<128xf32>
    %169 = vector.shape_cast %168 : vector<128xf32> to vector<128x1xf32>
    %170 = vector.broadcast %22 : vector<1x1xf32> to vector<128x1xf32>
    %171 = arith.addf %169, %170 : vector<128x1xf32>
    %cst_33 = arith.constant 0.000000e+00 : f32
    %172 = vector.broadcast %cst_33 : f32 to vector<16x32xf32>
    %cst_34 = arith.constant 0.000000e+00 : f32
    %173 = vector.broadcast %cst_34 : f32 to vector<16x1xf32>
    %cst_35 = arith.constant 0.000000e+00 : f32
    %174 = vector.broadcast %cst_35 : f32 to vector<16x1xf32>
    %175 = vector.extract_strided_slice %155 {offsets = [0, 0], sizes = [16, 32], strides = [1, 1]} : vector<128x32xf32> to vector<16x32xf32>
    %176 = arith.addf %172, %175 : vector<16x32xf32>
    %177 = vector.extract_strided_slice %171 {offsets = [0, 0], sizes = [16, 1], strides = [1, 1]} : vector<128x1xf32> to vector<16x1xf32>
    %178 = vector.extract_strided_slice %2 {offsets = [0, 0], sizes = [16, 1], strides = [1, 1]} : vector<16x8xf32> to vector<16x1xf32>
    %179 = arith.mulf %178, %177 : vector<16x1xf32>
    %180 = arith.addf %173, %179 : vector<16x1xf32>
    %181 = vector.extract_strided_slice %3 {offsets = [0, 0], sizes = [16, 1], strides = [1, 1]} : vector<16x8xf32> to vector<16x1xf32>
    %182 = arith.mulf %181, %177 : vector<16x1xf32>
    %183 = arith.addf %174, %182 : vector<16x1xf32>
    %184 = vector.extract_strided_slice %155 {offsets = [16, 0], sizes = [16, 32], strides = [1, 1]} : vector<128x32xf32> to vector<16x32xf32>
    %185 = arith.addf %176, %184 : vector<16x32xf32>
    %186 = vector.extract_strided_slice %171 {offsets = [16, 0], sizes = [16, 1], strides = [1, 1]} : vector<128x1xf32> to vector<16x1xf32>
    %187 = vector.extract_strided_slice %2 {offsets = [0, 1], sizes = [16, 1], strides = [1, 1]} : vector<16x8xf32> to vector<16x1xf32>
    %188 = arith.mulf %187, %186 : vector<16x1xf32>
    %189 = arith.addf %180, %188 : vector<16x1xf32>
    %190 = vector.extract_strided_slice %3 {offsets = [0, 1], sizes = [16, 1], strides = [1, 1]} : vector<16x8xf32> to vector<16x1xf32>
    %191 = arith.mulf %190, %186 : vector<16x1xf32>
    %192 = arith.addf %183, %191 : vector<16x1xf32>
    %193 = vector.extract_strided_slice %155 {offsets = [32, 0], sizes = [16, 32], strides = [1, 1]} : vector<128x32xf32> to vector<16x32xf32>
    %194 = arith.addf %185, %193 : vector<16x32xf32>
    %195 = vector.extract_strided_slice %171 {offsets = [32, 0], sizes = [16, 1], strides = [1, 1]} : vector<128x1xf32> to vector<16x1xf32>
    %196 = vector.extract_strided_slice %2 {offsets = [0, 2], sizes = [16, 1], strides = [1, 1]} : vector<16x8xf32> to vector<16x1xf32>
    %197 = arith.mulf %196, %195 : vector<16x1xf32>
    %198 = arith.addf %189, %197 : vector<16x1xf32>
    %199 = vector.extract_strided_slice %3 {offsets = [0, 2], sizes = [16, 1], strides = [1, 1]} : vector<16x8xf32> to vector<16x1xf32>
    %200 = arith.mulf %199, %195 : vector<16x1xf32>
    %201 = arith.addf %192, %200 : vector<16x1xf32>
    %202 = vector.extract_strided_slice %155 {offsets = [48, 0], sizes = [16, 32], strides = [1, 1]} : vector<128x32xf32> to vector<16x32xf32>
    %203 = arith.addf %194, %202 : vector<16x32xf32>
    %204 = vector.extract_strided_slice %171 {offsets = [48, 0], sizes = [16, 1], strides = [1, 1]} : vector<128x1xf32> to vector<16x1xf32>
    %205 = vector.extract_strided_slice %2 {offsets = [0, 3], sizes = [16, 1], strides = [1, 1]} : vector<16x8xf32> to vector<16x1xf32>
    %206 = arith.mulf %205, %204 : vector<16x1xf32>
    %207 = arith.addf %198, %206 : vector<16x1xf32>
    %208 = vector.extract_strided_slice %3 {offsets = [0, 3], sizes = [16, 1], strides = [1, 1]} : vector<16x8xf32> to vector<16x1xf32>
    %209 = arith.mulf %208, %204 : vector<16x1xf32>
    %210 = arith.addf %201, %209 : vector<16x1xf32>
    %211 = vector.extract_strided_slice %155 {offsets = [64, 0], sizes = [16, 32], strides = [1, 1]} : vector<128x32xf32> to vector<16x32xf32>
    %212 = arith.addf %203, %211 : vector<16x32xf32>
    %213 = vector.extract_strided_slice %171 {offsets = [64, 0], sizes = [16, 1], strides = [1, 1]} : vector<128x1xf32> to vector<16x1xf32>
    %214 = vector.extract_strided_slice %2 {offsets = [0, 4], sizes = [16, 1], strides = [1, 1]} : vector<16x8xf32> to vector<16x1xf32>
    %215 = arith.mulf %214, %213 : vector<16x1xf32>
    %216 = arith.addf %207, %215 : vector<16x1xf32>
    %217 = vector.extract_strided_slice %3 {offsets = [0, 4], sizes = [16, 1], strides = [1, 1]} : vector<16x8xf32> to vector<16x1xf32>
    %218 = arith.mulf %217, %213 : vector<16x1xf32>
    %219 = arith.addf %210, %218 : vector<16x1xf32>
    %220 = vector.extract_strided_slice %155 {offsets = [80, 0], sizes = [16, 32], strides = [1, 1]} : vector<128x32xf32> to vector<16x32xf32>
    %221 = arith.addf %212, %220 : vector<16x32xf32>
    %222 = vector.extract_strided_slice %171 {offsets = [80, 0], sizes = [16, 1], strides = [1, 1]} : vector<128x1xf32> to vector<16x1xf32>
    %223 = vector.extract_strided_slice %2 {offsets = [0, 5], sizes = [16, 1], strides = [1, 1]} : vector<16x8xf32> to vector<16x1xf32>
    %224 = arith.mulf %223, %222 : vector<16x1xf32>
    %225 = arith.addf %216, %224 : vector<16x1xf32>
    %226 = vector.extract_strided_slice %3 {offsets = [0, 5], sizes = [16, 1], strides = [1, 1]} : vector<16x8xf32> to vector<16x1xf32>
    %227 = arith.mulf %226, %222 : vector<16x1xf32>
    %228 = arith.addf %219, %227 : vector<16x1xf32>
    %229 = vector.extract_strided_slice %155 {offsets = [96, 0], sizes = [16, 32], strides = [1, 1]} : vector<128x32xf32> to vector<16x32xf32>
    %230 = arith.addf %221, %229 : vector<16x32xf32>
    %231 = vector.extract_strided_slice %171 {offsets = [96, 0], sizes = [16, 1], strides = [1, 1]} : vector<128x1xf32> to vector<16x1xf32>
    %232 = vector.extract_strided_slice %2 {offsets = [0, 6], sizes = [16, 1], strides = [1, 1]} : vector<16x8xf32> to vector<16x1xf32>
    %233 = arith.mulf %232, %231 : vector<16x1xf32>
    %234 = arith.addf %225, %233 : vector<16x1xf32>
    %235 = vector.extract_strided_slice %3 {offsets = [0, 6], sizes = [16, 1], strides = [1, 1]} : vector<16x8xf32> to vector<16x1xf32>
    %236 = arith.mulf %235, %231 : vector<16x1xf32>
    %237 = arith.addf %228, %236 : vector<16x1xf32>
    %238 = vector.extract_strided_slice %155 {offsets = [112, 0], sizes = [16, 32], strides = [1, 1]} : vector<128x32xf32> to vector<16x32xf32>
    %239 = arith.addf %230, %238 : vector<16x32xf32>
    %240 = vector.extract_strided_slice %171 {offsets = [112, 0], sizes = [16, 1], strides = [1, 1]} : vector<128x1xf32> to vector<16x1xf32>
    %241 = vector.extract_strided_slice %2 {offsets = [0, 7], sizes = [16, 1], strides = [1, 1]} : vector<16x8xf32> to vector<16x1xf32>
    %242 = arith.mulf %241, %240 : vector<16x1xf32>
    %243 = arith.addf %234, %242 : vector<16x1xf32>
    %244 = vector.extract_strided_slice %3 {offsets = [0, 7], sizes = [16, 1], strides = [1, 1]} : vector<16x8xf32> to vector<16x1xf32>
    %245 = arith.mulf %244, %240 : vector<16x1xf32>
    %246 = arith.addf %237, %245 : vector<16x1xf32>
    %cst_36 = arith.constant dense<0.000000e+00> : vector<16xf32>
    %247 = vector.multi_reduction <add>, %5, %cst_36 [1] : vector<16x8xf32> to vector<16xf32>
    %248 = vector.shape_cast %247 : vector<16xf32> to vector<16x1xf32>
    %cst_37 = arith.constant 9.99999997E-7 : f32
    %249 = vector.broadcast %cst_37 : f32 to vector<16x1xf32>
    %250 = arith.addf %248, %249 : vector<16x1xf32>
    %251 = tpu.reciprocal %250 {approx = true} : vector<16x1xf32> -> vector<16x1xf32>
    %252 = arith.mulf %243, %251 : vector<16x1xf32>
    %253 = arith.mulf %246, %251 : vector<16x1xf32>
    %254 = vector.broadcast %20 : vector<1x32xf32> to vector<16x32xf32>
    %255 = arith.mulf %38, %254 : vector<16x32xf32>
    %cst_38 = arith.constant dense<0.000000e+00> : vector<16xf32>
    %256 = vector.multi_reduction <add>, %255, %cst_38 [1] : vector<16x32xf32> to vector<16xf32>
    %257 = vector.shape_cast %256 : vector<16xf32> to vector<16x1xf32>
    %258 = vector.broadcast %23 : vector<1x1xf32> to vector<16x1xf32>
    %259 = arith.addf %257, %258 : vector<16x1xf32>
    %260 = vector.extract_strided_slice %0 {offsets = [0, 4], sizes = [16, 2], strides = [1, 1]} : vector<16x6xf32> to vector<16x2xf32>
    %261 = vector.broadcast %259 : vector<16x1xf32> to vector<16x2xf32>
    %262 = arith.mulf %261, %260 : vector<16x2xf32>
    %263 = tpu.concatenate %252, %253 in 1 : vector<16x1xf32>, vector<16x1xf32> -> vector<16x2xf32>
    %264 = arith.addf %262, %263 : vector<16x2xf32>
    %265 = vector.extract_strided_slice %0 {offsets = [0, 2], sizes = [16, 2], strides = [1, 1]} : vector<16x6xf32> to vector<16x2xf32>
    %266 = arith.addf %265, %264 : vector<16x2xf32>
    %267 = vector.extract_strided_slice %0 {offsets = [0, 0], sizes = [16, 2], strides = [1, 1]} : vector<16x6xf32> to vector<16x2xf32>
    %268 = arith.addf %267, %266 : vector<16x2xf32>
    %cst_39 = arith.constant 0.000000e+00 : f32
    %269 = vector.broadcast %cst_39 : f32 to vector<16x2xf32>
    %270 = tpu.concatenate %268, %266, %264, %269 in 1 : vector<16x2xf32>, vector<16x2xf32>, vector<16x2xf32>, vector<16x2xf32> -> vector<16x8xf32>
    %c0_40 = arith.constant 0 : index
    %c0_41 = arith.constant 0 : index
    %271 = vector.load %arg11[%c0_40, %c0_41] : memref<16x8xf32, #tpu.memory_space<vmem>>, vector<16x8xf32>
    tpu.vector_store %arg11[%c0_40, %c0_41], %270 {strides = array<i32>} : memref<16x8xf32, #tpu.memory_space<vmem>>, vector<16x8xf32>,
    %272 = arith.truncf %239 : vector<16x32xf32> to vector<16x32xbf16>
    %cst_42 = arith.constant dense<0.000000e+00> : vector<16x32xf32>
    %273 = tpu.matmul %272, %132, %cst_42 {dimension_numbers = #tpu.dot_dimension_numbers<[1], [0], [0], [1], [0, 0, 1, 1], [], []>} : vector<16x32xbf16>, vector<32x32xbf16>, vector<16x32xf32> -> vector<16x32xf32>
    %274 = arith.addf %39, %273 : vector<16x32xf32>
    %275 = vector.broadcast %17 : vector<1x32xf32> to vector<16x32xf32>
    %276 = arith.addf %274, %275 : vector<16x32xf32>
    %277 = arith.negf %276 : vector<16x32xf32>
    %278 = math.exp %277 : vector<16x32xf32>
    %cst_43 = arith.constant 1.000000e+00 : f32
    %279 = vector.broadcast %cst_43 : f32 to vector<16x32xf32>
    %280 = arith.addf %279, %278 : vector<16x32xf32>
    %281 = arith.divf %279, %280 : vector<16x32xf32>
    %282 = arith.mulf %276, %281 : vector<16x32xf32>
    %283 = arith.truncf %282 : vector<16x32xf32> to vector<16x32xbf16>
    %cst_44 = arith.constant dense<0.000000e+00> : vector<16x32xf32>
    %284 = tpu.matmul %283, %134, %cst_44 {dimension_numbers = #tpu.dot_dimension_numbers<[1], [0], [0], [1], [0, 0, 1, 1], [], []>} : vector<16x32xbf16>, vector<32x32xbf16>, vector<16x32xf32> -> vector<16x32xf32>
    %285 = vector.broadcast %18 : vector<1x32xf32> to vector<16x32xf32>
    %286 = arith.addf %284, %285 : vector<16x32xf32>
    %287 = arith.addf %1, %286 : vector<16x32xf32>
    %c0_45 = arith.constant 0 : index
    %c0_46 = arith.constant 0 : index
    %288 = vector.load %arg12[%c0_45, %c0_46] : memref<16x32xf32, #tpu.memory_space<vmem>>, vector<16x32xf32>
    tpu.vector_store %arg12[%c0_45, %c0_46], %287 {strides = array<i32>} : memref<16x32xf32, #tpu.memory_space<vmem>>, vector<16x32xf32>,
    return
  }
  func.func @transform_0(%arg0: i32) -> (i32, i32) {
    %c0_i32 = arith.constant 0 : i32
    %c0_i32_0 = arith.constant 0 : i32
    return %arg0, %c0_i32 : i32, i32
  }
  func.func @transform_1(%arg0: i32) -> (i32, i32) {
    %c0_i32 = arith.constant 0 : i32
    %c0_i32_0 = arith.constant 0 : i32
    return %arg0, %c0_i32 : i32, i32
  }
  func.func @transform_2(%arg0: i32) -> (i32, i32) {
    %c0_i32 = arith.constant 0 : i32
    %c0_i32_0 = arith.constant 0 : i32
    return %arg0, %c0_i32 : i32, i32
  }
  func.func @transform_3(%arg0: i32) -> (i32, i32) {
    %c0_i32 = arith.constant 0 : i32
    %c0_i32_0 = arith.constant 0 : i32
    return %arg0, %c0_i32 : i32, i32
  }
  func.func @transform_4(%arg0: i32) -> (i32, i32) {
    %c0_i32 = arith.constant 0 : i32
    %c0_i32_0 = arith.constant 0 : i32
    return %arg0, %c0_i32 : i32, i32
  }
  func.func @transform_5(%arg0: i32) -> (i32, i32) {
    %c0_i32 = arith.constant 0 : i32
    %c0_i32_0 = arith.constant 0 : i32
    return %arg0, %c0_i32 : i32, i32
  }
  func.func @transform_6(%arg0: i32) -> (i32, i32) {
    %c0_i32 = arith.constant 0 : i32
    %c0_i32_0 = arith.constant 0 : i32
    %c0_i32_1 = arith.constant 0 : i32
    return %c0_i32, %c0_i32_0 : i32, i32
  }
  func.func @transform_7(%arg0: i32) -> (i32, i32, i32) {
    %c0_i32 = arith.constant 0 : i32
    %c0_i32_0 = arith.constant 0 : i32
    %c0_i32_1 = arith.constant 0 : i32
    %c0_i32_2 = arith.constant 0 : i32
    return %c0_i32, %c0_i32_0, %c0_i32_1 : i32, i32, i32
  }
  func.func @transform_8(%arg0: i32) -> (i32, i32) {
    %c0_i32 = arith.constant 0 : i32
    %c0_i32_0 = arith.constant 0 : i32
    %c0_i32_1 = arith.constant 0 : i32
    return %c0_i32, %c0_i32_0 : i32, i32
  }
  func.func @transform_9(%arg0: i32) -> (i32, i32) {
    %c0_i32 = arith.constant 0 : i32
    %c0_i32_0 = arith.constant 0 : i32
    %c0_i32_1 = arith.constant 0 : i32
    return %c0_i32, %c0_i32_0 : i32, i32
  }
  func.func @transform_10(%arg0: i32) -> (i32, i32) {
    %c0_i32 = arith.constant 0 : i32
    %c0_i32_0 = arith.constant 0 : i32
    return %arg0, %c0_i32 : i32, i32
  }
  func.func @transform_11(%arg0: i32) -> (i32, i32) {
    %c0_i32 = arith.constant 0 : i32
    %c0_i32_0 = arith.constant 0 : i32
    return %arg0, %c0_i32 : i32, i32
  }
}

</mosaic_0001>

<bundles_post_ra>
// kernel: tpu_custom_call.1
= control target key start
LH: loop header
LB: loop body
LE: loop exit
PB: predicated region body
PF: predicated region fallthrough
CT: control target
= control target key end

     0   :  { %s5151_s0 = inlined_call_operand.vmem [shape: f32[32,6], index: 0, kind: input, shape index: {}]   ;;  %s5152_s1 = inlined_call_operand.vmem [shape: f32[32,32], index: 1, kind: input, shape index: {}]   ;;  %s5153_s2 = inlined_call_operand.vmem [shape: f32[32,8], index: 2, kind: input, shape index: {}]   ;;  %s5154_s3 = inlined_call_operand.vmem [shape: f32[32,8], index: 3, kind: input, shape index: {}]   ;;  %s5155_s4 = inlined_call_operand.vmem [shape: f32[32,8], index: 4, kind: input, shape index: {}]   ;;  %s5156_s5 = inlined_call_operand.vmem [shape: f32[32,8], index: 5, kind: input, shape index: {}]   ;;  %s5157_s6 = inlined_call_operand.vmem [shape: bf16[32,96], index: 6, kind: input, shape index: {}]   ;;  %s5158_s7 = inlined_call_operand.vmem [shape: bf16[4,32,32], index: 7, kind: input, shape index: {}]   ;;  %s5159_s8 = inlined_call_operand.vmem [shape: f32[10,32], index: 8, kind: input, shape index: {}]   ;;  %s5160_s9 = inlined_call_operand.vmem [shape: f32[1,2], index: 9, kind: input, shape index: {}]   ;;  %s5161_s10 = inlined_call_operand.vmem [shape: f32[32,8], index: 10, kind: output, shape index: {0}]   ;;  %s5162_s11 = inlined_call_operand.hbm [shape: f32[32,32], index: 11, kind: output, shape index: {1}]  }
   0x1   :  { %5177 = sst [smem:[#allocation5_spill]] %s5151_s0 }
   0x2   :  { %5178 = sst [smem:[#allocation6_spill]] %s5152_s1 }
   0x3   :  { %5179 = sst [smem:[#allocation7_spill]] %s5153_s2 }
   0x4   :  { %5180 = sst [smem:[#allocation8_spill]] %s5154_s3 }
   0x5   :  { %5181 = sst [smem:[#allocation9_spill]] %s5155_s4 }
   0x6   :  { %17 = vsyncpa [#allocation3], 0 }
   0x7   :  { %19 = vsyncpa [#allocation3 + $0x1], 0  ;;  %s3482_s17 = smov 0   ;;  %s3484_s18 = smov 0  }
   0x8   :  { %s3486_s19 = smov 0   ;;  %s3488_s20 = smov 0  }
   0x9 LB: > { %s3503_s21 = sadd.s32 4294967295, %s3393_s20   ;;  %s2849_s22 = sadd.s32 4294967294, %s3393_s20   ;;  %s3393_s20 = sphi %s3488_s20, %s5272_s20   ;;  %s3389_s19 = sphi %s3486_s19, %s5271_s19   ;;  %s3385_s18 = sphi %s3484_s18, %s5270_s18   ;;  %s3381_s17 = sphi %s3482_s17, %s5269_s17  }
   0xa   : > { %s3507_s23 = sadd.s32 1, %s3393_s20   ;;  %s298_s24 = sadd.s32 1, %s3389_s19 }
   0xb   : > { %s295_s25 = ssub.s32 %s3393_s20, %s3507_s23  ;;  %p308_p0 = scmp.ne.s32.totalorder %s3389_s19, %s3385_s18 }
   0xc   : > { %p296_p1 = scmp.eq.s32.totalorder %s295_s25, 0  ;;  %p309_p2 = scmp.eq.s32.totalorder %s3503_s21, 1 }
   0xd   : > { %p314_p3 = scmp.ne.s32.totalorder %s3385_s18, %s3381_s17  ;;  %p315_p4 = scmp.eq.s32.totalorder %s2849_s22, 1 }
   0xe   : > { %s3518_s26 = scalar_select %p296_p1, %s3389_s19, %s298_s24  }
   0xf   : > { %p3520_p5 = por %p309_p2, %p308_p0  ;;  %p3524_p6 = por %p315_p4, %p314_p3 }
  0x10   : > { %p2852_p7 = scmp.ge.s32.totalorder %s3393_s20, 1  ;;  %p399_p8 = scmp.lt.s32.totalorder %s3393_s20, 3 }
  0x12   : > { %p400_p9 = pnand %p2852_p7, %p399_p8 }
  0x13   : > { %s2854_s12 = sshll.u32 (!%p400_p9), %s3503_s21, 1  ;;  %s5184_s4 = sld [smem:[#allocation9_spill]] (!%p400_p9) }
  0x14   : > { %403 = sbr.rel (%p400_p9) target bundleno = 1543 (0x607), region = 60  ;;  %p470_p10 = scmp.lt.s32.totalorder (!%p400_p9), %s2854_s12, 3 }
  0x15   : > { %s5185_s2 = sld [smem:[#allocation7_spill]] (!%p400_p9)  ;;  %s5167_s13 = smov (!%p400_p9), 125  }
  0x16   : > { %s5186_s3 = sld [smem:[#allocation8_spill]] (!%p400_p9)  ;;  %s5165_s16 = smov (!%p400_p9), 124  }
  0x17   : > { %s5187_s1 = sld [smem:[#allocation6_spill]] (!%p400_p9)  ;;  %s3406_s22 = smov (!%p400_p9), 127  }
  0x18   : > { %s5175_s25 = smov (!%p400_p9), 64   ;;  %s5267_s0 = sld [smem:[#allocation5_spill]] (!%p400_p9) }
  0x19   : > { %v2997_v0 = vld [vmem:[%s5157_s6 + $0x8] sm:$0xff]  ;;  %v3395_v1 = vmov 0   ;;  %v3396_v2 = vmov 1   ;;  %v2996_v3 = vld [vmem:[%s5157_s6] sm:$0xff]  ;;  %s5274_s12 = smov (!%p470_p10, %s2854_s12), 3  ;;  %vm575_vm0 = vcmask 261120  }
  0x1a   : > { %3078 = vset.pattern.permute.xlu1 %v3395_v1  ;;  %3079 = vset.pattern.permute.xlu2 %v3396_v2  ;;  %s3540_s15 = sshll.u32 %s5274_s12, 3  ;;  %v3397_v36 = vmov 2   ;;  %v3398_v40 = vmov 3   ;;  %v3399_v41 = vmov 4   ;;  %v3400_v42 = vmov 5   ;;  %s5163_s12 = smov 123  }
  0x1b   : > { %585 = vmatpush.bf16.msra.mxu0 %v2997_v0  ;;  %3077 = vset.pattern.permute.xlu0 %v3395_v1  ;;  %s497_s24 = scalar_lea.vmem %s5184_s4, %s3540_s15  ;;  %s3550_s30 = scalar_lea.vmem %s5185_s2, %s3540_s15  ;;  %v3401_v43 = vmov 6   ;;  %v3402_v44 = vmov 7   ;;  %v3625_v54 = vld [vmem:[%s5159_s8] sm:$0xff] }
  0x1c   : > { %v3552_v4 = vld [vmem:[%s497_s24] sm:$0xff]  ;;  %s3558_s14 = scalar_lea.vmem %s5186_s3, %s3540_s15  ;;  %v518_v6 = vld [vmem:[%s3550_s30 + $0x8] sm:$0xff]  ;;  %s3595_s29 = scalar_lea.vmem %s5156_s5, %s3540_s15  ;;  %v593_v55 = vperm.slane %v3625_v54, 2  ;;  %v3633_v56 = vperm.slane %v3625_v54, 1  ;;  %v3636_v57 = vperm.slane %v3625_v54, 0 }
  0x1d   : > { %v517_v5 = vld [vmem:[%s3550_s30] sm:$0xff]  ;;  %s3566_s4 = scalar_lea.vmem %s5187_s1, %s3540_s15  ;;  %660 = vperm.xlu1 %3078, %v3552_v4   ;;  %v520_v8 = vld [vmem:[%s3558_s14 + $0x8] sm:$0xff]  ;;  %v526_v11 = vmul.f32 %v518_v6, %v518_v6 }
  0x1e   : > { %v519_v7 = vld [vmem:[%s3558_s14] sm:$0xff]  ;;  %v525_v10 = vmul.f32 %v517_v5, %v517_v5  ;;  %v516_v12 = vld [vmem:[%s3566_s4 + $0x8] sm:$0xff]  ;;  %v528_v14 = vmul.f32 %v520_v8, %v520_v8 }
  0x1f   : > { %586 = vmatpush.bf16.msra.mxu0 %v2996_v3  ;;  %v515_v9 = vld [vmem:[%s3566_s4] sm:$0xff]  ;;  %v527_v13 = vmul.f32 %v519_v7, %v519_v7  ;;  %v3574_v18 = vld [vmem:[%s497_s24 + $0x8] sm:$0xff]  ;;  %s5173_s24 = smov 1  }
  0x20   : > { %v558_v15 = vpack.c.bf16 %v516_v12, %v515_v9  ;;  %v530_v17 = vadd.f32 %v528_v14, %v526_v11  ;;  %v3599_v45 = vld [vmem:[%s3595_s29] sm:$0xff]  ;;  %v3610_v48 = vld [vmem:[%s3595_s29 + $0x8] sm:$0xff] }
  0x21   : > { %v529_v16 = vadd.f32 %v527_v13, %v525_v10  ;;  %v2999_v11 = vld [vmem:[%s5158_s7 + $0x8] sm:$0xff] }
  0x22   : > { %2876 = vmatmul.msk.bf16.vlgmr.msra.gmra.mxu0 %vm575_vm0, %v558_v15  ;;  %vm550_vm3 = vcmp.eq.f32.partialorder %v530_v17, inf  ;;  %v553_v33 = vand.u32 2147483648, %v530_v17  ;;  %vm552_vm4 = vcmp.eq.f32.partialorder %v530_v17, 0.0  ;;  %1231 = vmatpush.bf16.msra.mxu1 %v2999_v11 }
  0x23   : > { %3105 = vrsqrt.f32 %v529_v16  ;;  %vm538_vm1 = vcmp.eq.f32.partialorder %v529_v16, inf  ;;  %v541_v30 = vand.u32 2147483648, %v529_v16  ;;  %vm540_vm2 = vcmp.eq.f32.partialorder %v529_v16, 0.0  ;;  %3007 = vmatpush.bf16.msra.mxu3 %v2999_v11 }
  0x24   : > { %3107 = vrsqrt.f32 %v530_v17 }
  0x25   : > { %665 = vperm.xlu1 %3078, %v3574_v18  }
  0x29   : > { %v3106_v19 = vpop.eup %3105 }
  0x2a   : > { %v3108_v20 = vpop.eup %3107  ;;  %v532_v21 = vmul.f32 %v3106_v19, %v529_v16 }
  0x2b   : > { %v544_v22 = vmul.f32 %v3108_v20, %v530_v17 }
  0x2c   : > { %v533_v23 = vmul.f32 %v3106_v19, %v532_v21 }
  0x2d   : > { %v545_v24 = vmul.f32 %v3108_v20, %v544_v22  ;;  %3081 = vset.pattern.permute.xlu1 %v3396_v2 }
  0x2e   : > { %v534_v25 = vmul.f32 0.5, %v533_v23  ;;  %690 = vperm.xlu1 %3081, %v3574_v18  }
  0x2f   : > { %v546_v26 = vmul.f32 0.5, %v545_v24 }
  0x30   : > { %v535_v27 = vsub.f32 1.5, %v534_v25 }
  0x31   : > { %v547_v28 = vsub.f32 1.5, %v546_v26 }
  0x32   : > { %v536_v29 = vmul.f32 %v3106_v19, %v535_v27 }
  0x33   : > { %v548_v31 = vmul.f32 %v3108_v20, %v547_v28 }
  0x34   : > { %v537_v32 = vmul.f32 %v536_v29, %v529_v16 }
  0x35   : > { %v549_v34 = vmul.f32 %v548_v31, %v530_v17 }
  0x36   : > { %v539_v35 = vsel %vm538_vm1, %v529_v16, %v537_v32  ;;  %3083 = vset.pattern.permute.xlu1 %v3397_v36 }
  0x37   : > { %v542_v37 = vsel %vm540_vm2, %v541_v30, %v539_v35  ;;  %v551_v38 = vsel %vm550_vm3, %v530_v17, %v549_v34 }
  0x38   : > { %674 = vperm.xlu2 %3079, %v542_v37   ;;  %645 = vperm.xlu0 %3077, %v542_v37   ;;  %v554_v39 = vsel %vm552_vm4, %v553_v33, %v551_v38 }
  0x39   : > { %702 = vperm.xlu1 %3083, %v554_v39  }
  0x40   : > { %678 = vperm.xlu2 %3079, %v554_v39   ;;  %650 = vperm.xlu0 %3077, %v554_v39  }
  0x41   : > { %3085 = vset.pattern.permute.xlu1 %v3398_v40 }
  0x42   : > { %722 = vperm.xlu1 %3085, %v542_v37  }
  0x48   : > { %3082 = vset.pattern.permute.xlu2 %v3397_v36  ;;  %3080 = vset.pattern.permute.xlu0 %v3396_v2 }
  0x49   : > { %698 = vperm.xlu2 %3082, %v542_v37   ;;  %686 = vperm.xlu0 %3080, %v3552_v4  }
  0x4a   : > { %734 = vperm.xlu1 %3085, %v3552_v4  }
  0x51   : > { %710 = vperm.xlu2 %3082, %v3552_v4   ;;  %3084 = vset.pattern.permute.xlu0 %v3397_v36 }
  0x52   : > { %3088 = vset.pattern.permute.xlu1 %v3399_v41  ;;  %714 = vperm.xlu0 %3084, %v3574_v18  }
  0x53   : > { %750 = vperm.xlu1 %3088, %v554_v39  }
  0x59   : > { %3086 = vset.pattern.permute.xlu2 %v3398_v40 }
  0x5a   : > { %726 = vperm.xlu2 %3086, %v554_v39   ;;  %3087 = vset.pattern.permute.xlu0 %v3399_v41 }
  0x5b   : > { %762 = vperm.xlu1 %3088, %v3574_v18   ;;  %746 = vperm.xlu0 %3087, %v542_v37  }
  0x62   : > { %738 = vperm.xlu2 %3086, %v3574_v18  }
  0x63   : > { %3092 = vset.pattern.permute.xlu1 %v3400_v42  ;;  %3091 = vset.pattern.permute.xlu0 %v3400_v42 }
  0x64   : > { %782 = vperm.xlu1 %3092, %v3552_v4   ;;  %774 = vperm.xlu0 %3091, %v554_v39  }
  0x6a   : > { %3089 = vset.pattern.permute.xlu2 %v3399_v41 }
  0x6b   : > { %758 = vperm.xlu2 %3089, %v3552_v4  }
  0x6c   : > { %3093 = vset.pattern.permute.xlu1 %v3401_v43  ;;  %3095 = vset.pattern.permute.xlu0 %v3401_v43 }
  0x6d   : > { %794 = vperm.xlu1 %3093, %v542_v37   ;;  %806 = vperm.xlu0 %3095, %v3552_v4  }
  0x73   : > { %3090 = vset.pattern.permute.xlu2 %v3400_v42 }
  0x74   : > { %770 = vperm.xlu2 %3090, %v542_v37  }
  0x75   : > { %810 = vperm.xlu1 %3093, %v3574_v18   ;;  %3098 = vset.pattern.permute.xlu0 %v3402_v44 }
  0x76   : > { %834 = vperm.xlu0 %3098, %v3574_v18  }
  0x7c   : > { %786 = vperm.xlu2 %3090, %v3574_v18   ;;  %v2998_v18 = vld [vmem:[%s5158_s7] sm:$0xff] }
  0x7d   : > { %3097 = vset.pattern.permute.xlu1 %v3402_v44  ;;  %1232 = vmatpush.bf16.msra.mxu1 %v2998_v18 }
  0x7e   : > { %822 = vperm.xlu1 %3097, %v554_v39   ;;  %1612 = vrot.lane.b32.xlu0 %v3599_v45, %s5163_s12 }
  0x7f   : > { %3100 = vset.pattern.permute.xlu0 %v3395_v1  ;;  %3008 = vmatpush.bf16.msra.mxu3 %v2998_v18 }
  0x84   : > { %3094 = vset.pattern.permute.xlu2 %v3401_v43 }
  0x85   : > { %798 = vperm.xlu2 %3094, %v554_v39  }
  0x86   : > { %1604 = vrot.lane.b32.xlu1 %v3599_v45, %s5167_s13 }
  0x87   : > { %3101 = vset.pattern.permute.xlu1 %v3395_v1 }
  0x8d   : > { %3096 = vset.pattern.permute.xlu2 %v3402_v44 }
  0x8e   : > { %1608 = vrot.lane.b32.xlu1 %v3599_v45, %s5165_s16  ;;  %818 = vperm.xlu2 %3096, %v542_v37  }
  0x8f   : > { %v661_v46 = vpop.permute.xlu1 %660 }
  0x90   : > { %v669_v63 = vmul.f32 %v3633_v56, %v661_v46 }
  0x92   : > { %v675_v47 = vpop.permute.xlu2 %674 }
  0x93   : > { %v681_v20 = vmul.f32 %v675_v47, %v3636_v57 }
  0x96   : > { %830 = vperm.xlu2 %3096, %v3552_v4   ;;  %1614 = vrot.lane.b32.xlu1 %v3610_v48, %s5163_s12  ;;  %s5169_s12 = smov 122  }
  0x97   : > { %v666_v49 = vpop.permute.xlu1 %665 }
  0x98   : > { %v670_v12 = vmul.f32 %v3633_v56, %v666_v49 }
  0x9a   : > { %v679_v50 = vpop.permute.xlu2 %678 }
  0x9b   : > { %v682_v8 = vmul.f32 %v679_v50, %v3636_v57 }
  0x9e   : > { %1606 = vrot.lane.b32.xlu2 %v3610_v48, %s5167_s13  ;;  %1596 = vrot.lane.b32.xlu1 %v3599_v45, %s3406_s22  ;;  %s5171_s13 = smov 121  }
  0x9f   : > { %3099 = vset.pattern.permute.xlu2 %v3395_v1  ;;  %v3620_v53 = vpop.f32.mrf.mxu0 }
  0xa0   : > { %v691_v51 = vpop.permute.xlu1 %690  ;;  %v3639_v59 = vadd.f32 %v593_v55, %v3620_v53 }
  0xa1   : > { %v694_v16 = vmul.f32 %v691_v51, %v3633_v56 }
  0xa2   : > { %v683_v26 = vadd.f32 %v681_v20, %v3639_v59 }
  0xa3   : > { %v699_v52 = vpop.permute.xlu2 %698 }
  0xa4   : > { %v705_v17 = vmul.f32 %v699_v52, %v3636_v57 }
  0xa6   : > { %1610 = vrot.lane.b32.xlu2 %v3610_v48, %s5165_s16  ;;  %1616 = vrot.lane.b32.xlu1 %v3599_v45, %s5169_s12  ;;  %v707_v25 = vadd.f32 %v705_v17, %v3639_v59  ;;  %s5176_s16 = smov 126  }
  0xa7   : > { %v3644_v1 = vpop.f32.mrf.mxu0 }
  0xa8   : > { %v3649_v4 = vadd.f32 %v593_v55, %v3644_v1 }
  0xaa   : > { %v646_v58 = vpop.permute.xlu0 %645  ;;  %v684_v14 = vadd.f32 %v682_v8, %v3649_v4 }
  0xab   : > { %v654_v60 = vmul.f32 %v3636_v57, %v646_v58  ;;  %v703_v61 = vpop.permute.xlu1 %702  ;;  %v711_v62 = vpop.permute.xlu2 %710 }
  0xac   : > { %v717_v21 = vmul.f32 %v711_v62, %v3633_v56  ;;  %v3672_v22 = vadd.f32 %v694_v16, %v684_v14  ;;  %v706_v41 = vmul.f32 %v703_v61, %v3636_v57 }
  0xad   : > { %v656_v0 = vadd.f32 %v654_v60, %v3639_v59 }
  0xae   : > { %v3677_v30 = vadd.f32 %v717_v21, %v707_v25  ;;  %v2882_v32 = vmul.f32 -1.442695, %v3672_v22  ;;  %v708_v47 = vadd.f32 %v706_v41, %v3649_v4 }
  0xaf   : > { %v3646_v3 = vadd.f32 %v669_v63, %v656_v0 }
  0xb0   : > { %v2883_v35 = vmul.f32 -1.442695, %v3677_v30 }
  0xb1   : > { %v2879_v5 = vmul.f32 -1.442695, %v3646_v3 }
  0xb2   : > { %v651_v6 = vpop.permute.xlu0 %650 }
  0xb3   : > { %v655_v7 = vmul.f32 %v3636_v57, %v651_v6  ;;  %3109 = vpow2.f32 %v2879_v5 }
  0xb4   : > { %v723_v9 = vpop.permute.xlu1 %722  ;;  %v3654_v10 = vpop.permute.xlu2 %726 }
  0xb5   : > { %v657_v13 = vadd.f32 %v655_v7, %v3649_v4  ;;  %v729_v50 = vmul.f32 %v723_v9, %v3636_v57  ;;  %v730_v9 = vmul.f32 %v3654_v10, %v3636_v57 }
  0xb7   : > { %v3662_v15 = vadd.f32 %v670_v12, %v657_v13  ;;  %v731_v6 = vadd.f32 %v729_v50, %v3639_v59  ;;  %v732_v18 = vadd.f32 %v730_v9, %v3649_v4 }
  0xb9   : > { %v2880_v19 = vmul.f32 -1.442695, %v3662_v15  ;;  %v3110_v24 = vpop.eup %3109 }
  0xba   : > { %v3682_v33 = vadd.f32 1.0, %v3110_v24 }
  0xbb   : > { %v687_v23 = vpop.permute.xlu0 %686  ;;  %3111 = vpow2.f32 %v2880_v19 }
  0xbc   : > { %v693_v27 = vmul.f32 %v687_v23, %v3633_v56  ;;  %v735_v28 = vpop.permute.xlu1 %734  ;;  %v739_v29 = vpop.permute.xlu2 %738  ;;  %3113 = vpow2.f32 %v2882_v32  ;;  %v914_v16 = vand.u32 2147483647, %v3682_v33  ;;  %vm910_vm5 = vweird.f32 %v3682_v33 }
  0xbd   : > { %3115 = vrcp.f32 %v3682_v33  ;;  %v741_v63 = vmul.f32 %v735_v28, %v3633_v56  ;;  %v742_v13 = vmul.f32 %v739_v29, %v3633_v56 }
  0xbe   : > { %v3679_v31 = vadd.f32 %v693_v27, %v683_v26  ;;  %vm3747_vm7 = vcmp.eq.f32.partialorder %v914_v16, 8.507059e+37 }
  0xbf   : > { %v3725_v12 = vadd.f32 %v741_v63, %v731_v6  ;;  %v3740_v27 = vadd.f32 %v742_v13, %v732_v18 }
  0xc0   : > { %v2881_v34 = vmul.f32 -1.442695, %v3679_v31 }
  0xc1   : > { %v3112_v36 = vpop.eup %3111  ;;  %v2885_v20 = vmul.f32 -1.442695, %v3725_v12  ;;  %v2886_v50 = vmul.f32 -1.442695, %v3740_v27 }
  0xc2   : > { %v3687_v37 = vadd.f32 1.0, %v3112_v36  ;;  %3117 = vpow2.f32 %v2881_v34  ;;  %v3114_v42 = vpop.eup %3113 }
  0xc3   : > { %3119 = vpow2.f32 %v2883_v35  ;;  %v3696_v44 = vpop.eup %3115  ;;  %v3704_v55 = vadd.f32 1.0, %v3114_v42  ;;  %v916_v42 = vand.u32 2147483648, %v3682_v33 }
  0xc4   : > { %v715_v38 = vpop.permute.xlu0 %714  ;;  %3121 = vrcp.f32 %v3687_v37  ;;  %v906_v52 = vmul.f32 %v3696_v44, %v3682_v33  ;;  %vm911_vm6 = vweird.f32 %v3696_v44  ;;  %v931_v6 = vand.u32 2147483648, %v3687_v37 }
  0xc5   : > { %v3689_v39 = vpop.permute.xlu1 %750  ;;  %v3691_v40 = vpop.permute.xlu2 %758  ;;  %v718_v43 = vmul.f32 %v715_v38, %v3633_v56  ;;  %3123 = vrcp.f32 %v3704_v55  ;;  %v959_v24 = vand.u32 2147483647, %v3704_v55  ;;  %v961_v32 = vand.u32 2147483648, %v3704_v55  ;;  %vm3767_vm9 = vmor %vm910_vm5, %vm911_vm6 }
  0xc6   : > { %v907_v8 = vsub.f32 1.0, %v906_v52  ;;  %vm925_vm10 = vweird.f32 %v3687_v37  ;;  %v929_v9 = vand.u32 2147483647, %v3687_v37  ;;  %vm955_vm14 = vweird.f32 %v3704_v55 }
  0xc7   : > { %v3700_v51 = vadd.f32 %v718_v43, %v708_v47 }
  0xc8   : > { %v3118_v46 = vpop.eup %3117  ;;  %v908_v14 = vmul.f32 %v3696_v44, %v907_v8  ;;  %vm930_vm12 = vcmp.eq.f32.partialorder %v929_v9, 8.507059e+37 }
  0xc9   : > { %v3120_v49 = vpop.eup %3119  ;;  %v3706_v58 = vadd.f32 1.0, %v3118_v46  ;;  %v2884_v7 = vmul.f32 -1.442695, %v3700_v51 }
  0xca   : > { %v3712_v62 = vpop.eup %3121  ;;  %v3715_v5 = vadd.f32 1.0, %v3120_v49  ;;  %v909_v34 = vadd.f32 %v3696_v44, %v908_v14  ;;  %v917_v14 = vor.u32 1.1754944e-38, %v916_v42 }
  0xcb   : > { %3125 = vrcp.f32 %v3706_v58  ;;  %v921_v11 = vmul.f32 %v3712_v62, %v3687_v37  ;;  %v3733_v19 = vpop.eup %3123  ;;  %vm926_vm8 = vweird.f32 %v3712_v62  ;;  %vm940_vm3 = vweird.f32 %v3706_v58 }
  0xcc   : > { %3127 = vrcp.f32 %v3715_v5  ;;  %v974_v26 = vand.u32 2147483647, %v3715_v5  ;;  %v951_v43 = vmul.f32 %v3733_v19, %v3704_v55  ;;  %v913_v8 = vsel %vm3767_vm9, %v3696_v44, %v909_v34  ;;  %vm3784_vm11 = vmor %vm925_vm10, %vm926_vm8 }
  0xcd   : > { %v3708_v60 = vpop.permute.xlu1 %762  ;;  %v3710_v61 = vpop.permute.xlu0 %746  ;;  %3129 = vpow2.f32 %v2884_v7  ;;  %v922_v17 = vsub.f32 1.0, %v921_v11  ;;  %vm956_vm13 = vweird.f32 %v3733_v19  ;;  %vm970_vm1 = vweird.f32 %v3715_v5 }
  0xce   : > { %v771_v0 = vpop.permute.xlu2 %770  ;;  %3131 = vpow2.f32 %v2885_v20  ;;  %v952_v18 = vsub.f32 1.0, %v951_v43  ;;  %v918_v20 = vsel %vm3747_vm7, %v917_v14, %v913_v8  ;;  %vm3864_vm5 = vmor %vm955_vm14, %vm956_vm13  ;;  %vm960_vm8 = vcmp.eq.f32.partialorder %v959_v24, 8.507059e+37 }
  0xcf   : > { %v777_v10 = vmul.f32 %v771_v0, %v3636_v57  ;;  %v923_v29 = vmul.f32 %v3712_v62, %v922_v17  ;;  %3133 = vpow2.f32 %v2886_v50  ;;  %v1145_v42 = vmul.f32 %v918_v20, %v3646_v3 }
  0xd0   : > { %vm3901_vm9 = vcmp.eq.f32.partialorder %v974_v26, 8.507059e+37 }
  0xd1   : > { %v3737_v25 = vpop.eup %3125  ;;  %v779_v38 = vadd.f32 %v777_v10, %v3639_v59  ;;  %v924_v0 = vadd.f32 %v3712_v62, %v923_v29  ;;  %v3791_v10 = vor.u32 1.1754944e-38, %v961_v32 }
  0xd2   : > { %v3751_v36 = vpop.eup %3127  ;;  %v936_v47 = vmul.f32 %v3737_v25, %v3706_v58  ;;  %vm941_vm2 = vweird.f32 %v3737_v25 }
  0xd3   : > { %v3130_v46 = vpop.eup %3129  ;;  %v966_v7 = vmul.f32 %v3751_v36, %v3715_v5  ;;  %v928_v44 = vsel %vm3784_vm11, %v3712_v62, %v924_v0  ;;  %v753_v62 = vmul.f32 %v3710_v61, %v3636_v57  ;;  %vm971_vm15 = vweird.f32 %v3751_v36  ;;  %vm3842_vm4 = vmor %vm940_vm3, %vm941_vm2 }
  0xd4   : > { %v3780_v33 = vadd.f32 1.0, %v3130_v46  ;;  %v937_v17 = vsub.f32 1.0, %v936_v47  ;;  %v3132_v34 = vpop.eup %3131  ;;  %v953_v46 = vmul.f32 %v3733_v19, %v952_v18  ;;  %v754_v0 = vmul.f32 %v3689_v39, %v3636_v57  ;;  %vm3886_vm7 = vmor %vm970_vm1, %vm971_vm15 }
  0xd5   : > { %v3808_v47 = vadd.f32 1.0, %v3132_v34  ;;  %v755_v8 = vadd.f32 %v753_v62, %v3639_v59  ;;  %v944_v39 = vand.u32 2147483647, %v3706_v58 }
  0xd6   : > { %v783_v21 = vpop.permute.xlu1 %782  ;;  %v787_v23 = vpop.permute.xlu2 %786  ;;  %v938_v35 = vmul.f32 %v3737_v25, %v937_v17  ;;  %v954_v14 = vadd.f32 %v3733_v19, %v953_v46  ;;  %vm985_vm11 = vweird.f32 %v3780_v33 }
  0xd7   : > { %v775_v28 = vpop.permute.xlu0 %774  ;;  %v789_v41 = vmul.f32 %v783_v21, %v3633_v56  ;;  %v790_v37 = vmul.f32 %v787_v23, %v3633_v56  ;;  %v932_v21 = vor.u32 1.1754944e-38, %v931_v6  ;;  %v3134_v6 = vpop.eup %3133  ;;  %vm945_vm6 = vcmp.eq.f32.partialorder %v944_v39, 8.507059e+37 }
  0xd8   : > { %v778_v49 = vmul.f32 %v775_v28, %v3636_v57  ;;  %v3846_v34 = vadd.f32 1.0, %v3134_v6  ;;  %v958_v46 = vsel %vm3864_vm5, %v3733_v19, %v954_v14  ;;  %v976_v6 = vand.u32 2147483648, %v3715_v5 }
  0xd9   : > { %v3763_v52 = vadd.f32 %v789_v41, %v779_v38  ;;  %v967_v38 = vsub.f32 1.0, %v966_v7  ;;  %v933_v23 = vsel %vm930_vm12, %v932_v21, %v928_v44  ;;  %v765_v7 = vmul.f32 %v3691_v40, %v3633_v56 }
  0xda   : > { %v780_v13 = vadd.f32 %v778_v49, %v3649_v4  ;;  %v1146_v43 = vmul.f32 %v933_v23, %v3662_v15  ;;  %v946_v40 = vand.u32 2147483648, %v3706_v58 }
  0xdb   : > { %v2889_v11 = vmul.f32 -1.442695, %v3763_v52  ;;  %v968_v63 = vmul.f32 %v3751_v36, %v967_v38  ;;  %v756_v38 = vadd.f32 %v754_v0, %v3649_v4 }
  0xdc   : > { %v3800_v32 = vadd.f32 %v790_v37, %v780_v13  ;;  %v1180_v3 = vpack.c.bf16 %v1146_v43, %v1145_v42  ;;  %v939_v13 = vadd.f32 %v3737_v25, %v938_v35  ;;  %v766_v37 = vmul.f32 %v3708_v60, %v3633_v56 }
  0xdd   : > { %3135 = vpow2.f32 %v2889_v11  ;;  %v969_v43 = vadd.f32 %v3751_v36, %v968_v63 }
  0xde   : > { %3137 = vrcp.f32 %v3780_v33  ;;  %v2890_v49 = vmul.f32 -1.442695, %v3800_v32  ;;  %2915 = vmatmul.msk.bf16.vlgmr.msra.gmra.mxu1 %vm575_vm0, %v1180_v3  ;;  %v943_v58 = vsel %vm3842_vm4, %v3737_v25, %v939_v13  ;;  %v947_v25 = vor.u32 1.1754944e-38, %v946_v40 }
  0xdf   : > { %v795_v28 = vpop.permute.xlu1 %794  ;;  %v799_v29 = vpop.permute.xlu2 %798  ;;  %v963_v13 = vsel %vm960_vm8, %v3791_v10, %v958_v46 }
  0xe0   : > { %v807_v41 = vpop.permute.xlu0 %806  ;;  %v801_v61 = vmul.f32 %v795_v28, %v3636_v57  ;;  %v802_v15 = vmul.f32 %v799_v29, %v3636_v57  ;;  %3139 = vpow2.f32 %v2890_v49  ;;  %v3872_v49 = vadd.f32 %v766_v37, %v756_v38 }
  0xe1   : > { %v813_v50 = vmul.f32 %v807_v41, %v3633_v56  ;;  %3141 = vrcp.f32 %v3808_v47  ;;  %v3849_v41 = vadd.f32 %v765_v7, %v755_v8  ;;  %v948_v3 = vsel %vm945_vm6, %v947_v25, %v943_v58 }
  0xe2   : > { %v803_v9 = vadd.f32 %v801_v61, %v3639_v59  ;;  %v804_v20 = vadd.f32 %v802_v15, %v3649_v4  ;;  %v1147_v14 = vmul.f32 %v948_v3, %v3679_v31  ;;  %v2888_v24 = vmul.f32 -1.442695, %v3872_v49 }
  0xe3   : > { %v3136_v11 = vpop.eup %3135  ;;  %v2887_v63 = vmul.f32 -1.442695, %v3849_v41 }
  0xe4   : > { %v3827_v16 = vpop.eup %3137  ;;  %v3831_v17 = vadd.f32 1.0, %v3136_v11  ;;  %v3833_v44 = vadd.f32 %v813_v50, %v803_v9  ;;  %v973_v9 = vsel %vm3886_vm7, %v3751_v36, %v969_v43  ;;  %v991_v43 = vand.u32 2147483648, %v3780_v33 }
  0xe5   : > { %v981_v60 = vmul.f32 %v3827_v16, %v3780_v33  ;;  %vm986_vm10 = vweird.f32 %v3827_v16  ;;  %vm1000_vm7 = vweird.f32 %v3808_v47 }
  0xe6   : > { %3143 = vrcp.f32 %v3831_v17  ;;  %v2891_v62 = vmul.f32 -1.442695, %v3833_v44  ;;  %v3140_v42 = vpop.eup %3139  ;;  %vm3953_vm12 = vmor %vm985_vm11, %vm986_vm10  ;;  %vm1060_vm1 = vweird.f32 %v3831_v17 }
  0xe7   : > { %v811_v18 = vpop.permute.xlu1 %810  ;;  %v3874_v61 = vadd.f32 1.0, %v3140_v42  ;;  %v3877_v0 = vpop.eup %3141  ;;  %v982_v7 = vsub.f32 1.0, %v981_v60 }
  0xe8   : > { %v814_v21 = vmul.f32 %v811_v18, %v3633_v56  ;;  %v819_v28 = vpop.permute.xlu2 %818  ;;  %3145 = vpow2.f32 %v2891_v62  ;;  %v835_v39 = vpop.permute.xlu0 %834  ;;  %v996_v55 = vmul.f32 %v3877_v0, %v3808_v47  ;;  %vm1001_vm8 = vweird.f32 %v3877_v0 }
  0xe9   : > { %3147 = vrcp.f32 %v3846_v34  ;;  %v825_v15 = vmul.f32 %v819_v28, %v3636_v57  ;;  %v983_v31 = vmul.f32 %v3827_v16, %v982_v7  ;;  %v838_v28 = vmul.f32 %v835_v39, %v3633_v56  ;;  %vm4031_vm11 = vmor %vm1000_vm7, %vm1001_vm8 }
  0xea   : > { %v3858_v23 = vadd.f32 %v814_v21, %v804_v20  ;;  %3149 = vrcp.f32 %v3874_v61  ;;  %v977_v20 = vor.u32 1.1754944e-38, %v976_v6  ;;  %v1148_v21 = vmul.f32 %v963_v13, %v3672_v22 }
  0xeb   : > { %v827_v26 = vadd.f32 %v825_v15, %v3639_v59  ;;  %v997_v35 = vsub.f32 1.0, %v996_v55  ;;  %v992_v55 = vor.u32 1.1754944e-38, %v991_v43  ;;  %vm1075_vm3 = vweird.f32 %v3874_v61 }
  0xec   : > { %v2892_v50 = vmul.f32 -1.442695, %v3858_v23  ;;  %v3894_v8 = vpop.eup %3143  ;;  %v978_v62 = vsel %vm3901_vm9, %v977_v20, %v973_v9  ;;  %v1181_v42 = vpack.c.bf16 %v1148_v21, %v1147_v14  ;;  %v1064_v20 = vand.u32 2147483647, %v3831_v17 }
  0xed   : > { %v1056_v36 = vmul.f32 %v3894_v8, %v3831_v17  ;;  %v3944_v19 = vmul.f32 %v978_v62, %v3677_v30  ;;  %v998_v11 = vmul.f32 %v3877_v0, %v997_v35  ;;  %vm1061_vm14 = vweird.f32 %v3894_v8 }
  0xee   : > { %3151 = vpow2.f32 %v2892_v50  ;;  %v3146_v37 = vpop.eup %3145  ;;  %2916 = vmatmul.msk.bf16.gmra.mxu1 %vm575_vm0, %v1181_v42  ;;  %vm3986_vm2 = vmor %vm1060_vm1, %vm1061_vm14  ;;  %vm1065_vm6 = vcmp.eq.f32.partialorder %v1064_v20, 8.507059e+37  ;;  %v4200_v20 = vld [vmem:[%s5159_s8] sm:$0xff] }
  0xef   : > { %3153 = vpow2.f32 %v2887_v63  ;;  %v3918_v29 = vpop.eup %3147  ;;  %v1057_v38 = vsub.f32 1.0, %v1056_v36  ;;  %v3920_v58 = vadd.f32 1.0, %v3146_v37 }
  0xf0   : > { %v823_v40 = vpop.permute.xlu1 %822  ;;  %v831_v5 = vpop.permute.xlu2 %830  ;;  %3155 = vpow2.f32 %v2888_v24  ;;  %v1011_v6 = vmul.f32 %v3918_v29, %v3846_v34  ;;  %vm1016_vm10 = vweird.f32 %v3918_v29 }
  0xf1   : > { %v826_v18 = vmul.f32 %v823_v40, %v3636_v57  ;;  %v837_v10 = vmul.f32 %v831_v5, %v3633_v56  ;;  %v3925_v57 = vpop.eup %3149  ;;  %v989_v56 = vand.u32 2147483647, %v3780_v33  ;;  %3157 = vrcp.f32 %v3920_v58 }
  0xf2   : > { %v1058_v63 = vmul.f32 %v3894_v8, %v1057_v38  ;;  %v1071_v15 = vmul.f32 %v3925_v57, %v3874_v61  ;;  %vm1076_vm15 = vweird.f32 %v3925_v57 }
  0xf3   : > { %v828_v60 = vadd.f32 %v826_v18, %v3649_v4  ;;  %v3923_v59 = vadd.f32 %v837_v10, %v827_v26  ;;  %v984_v4 = vadd.f32 %v3827_v16, %v983_v31  ;;  %vm3957_vm13 = vcmp.eq.f32.partialorder %v989_v56, 8.507059e+37  ;;  %vm1077_vm4 = vmor %vm1075_vm3, %vm1076_vm15 }
  0xf4   : > { %v3152_v22 = vpop.eup %3151  ;;  %v1072_v36 = vsub.f32 1.0, %v1071_v15  ;;  %v1059_v5 = vadd.f32 %v3894_v8, %v1058_v63  ;;  %v1081_v26 = vand.u32 2147483648, %v3874_v61  ;;  %v1066_v18 = vand.u32 2147483648, %v3831_v17 }
  0xf5   : > { %v3934_v25 = vadd.f32 1.0, %v3152_v22  ;;  %v2893_v46 = vmul.f32 -1.442695, %v3923_v59  ;;  %v3938_v50 = vadd.f32 %v838_v28, %v828_v60  ;;  %v3154_v3 = vpop.eup %3153  ;;  %v988_v14 = vsel %vm3953_vm12, %v3827_v16, %v984_v4 }
  0xf6   : > { %v3156_v33 = vpop.eup %3155  ;;  %v3965_v24 = vadd.f32 1.0, %v3154_v3  ;;  %v1073_v10 = vmul.f32 %v3925_v57, %v1072_v36  ;;  %v1079_v16 = vand.u32 2147483647, %v3874_v61  ;;  %v993_v37 = vsel %vm3957_vm13, %v992_v55, %v988_v14 }
  0xf7   : > { %3159 = vrcp.f32 %v3934_v25  ;;  %v2894_v39 = vmul.f32 -1.442695, %v3938_v50  ;;  %v3967_v40 = vpop.eup %3157  ;;  %v1012_v28 = vsub.f32 1.0, %v1011_v6  ;;  %v3984_v38 = vadd.f32 1.0, %v3156_v33 }
  0xf8   : > { %v1605_v7 = vpop.permute.xlu1 %1604  ;;  %v1607_v9 = vpop.permute.xlu2 %1606  ;;  %3161 = vpow2.f32 %v2893_v46  ;;  %v1086_v31 = vmul.f32 %v3967_v40, %v3920_v58  ;;  %v1074_v62 = vadd.f32 %v3925_v57, %v1073_v10  ;;  %v1063_v17 = vsel %vm3986_vm2, %v3894_v8, %v1059_v5 }
  0xf9   : > { %1649 = vperm.xlu2 %3099, %v1605_v7   ;;  %1653 = vperm.xlu0 %3100, %v1607_v9   ;;  %3163 = vpow2.f32 %v2894_v39  ;;  %v1082_v22 = vor.u32 1.1754944e-38, %v1081_v26  ;;  %v1150_v56 = vmul.f32 %v993_v37, %v3700_v51  ;;  %v1067_v43 = vor.u32 1.1754944e-38, %v1066_v18 }
  0xfa   : > { %3165 = vrcp.f32 %v3965_v24  ;;  %v1078_v4 = vsel %vm1077_vm4, %v3925_v57, %v1074_v62  ;;  %vm1080_vm5 = vcmp.eq.f32.partialorder %v1079_v16, 8.507059e+37  ;;  %v1087_v63 = vsub.f32 1.0, %v1086_v31  ;;  %v1613_v62 = vpop.permute.xlu0 %1612 }
  0xfb   : > { %v1083_v8 = vsel %vm1080_vm5, %v1082_v22, %v1078_v4  ;;  %v1004_v6 = vand.u32 2147483647, %v3808_v47  ;;  %v1013_v7 = vmul.f32 %v3918_v29, %v1012_v28  ;;  %v1068_v51 = vsel %vm1065_vm6, %v1067_v43, %v1063_v17 }
  0xfc   : > { %3167 = vrcp.f32 %v3984_v38  ;;  %v1156_v30 = vmul.f32 %v1083_v8, %v3800_v32  ;;  %v999_v39 = vadd.f32 %v3877_v0, %v998_v11  ;;  %v1182_v33 = vpack.c.bf16 %v1150_v56, %v3944_v19 }
  0xfd   : > { %v3982_v21 = vpop.eup %3159  ;;  %v1006_v55 = vand.u32 2147483648, %v3808_v47  ;;  %v1155_v36 = vmul.f32 %v1068_v51, %v3763_v52  ;;  %v1088_v5 = vmul.f32 %v3967_v40, %v1087_v63  ;;  %vm4023_vm9 = vcmp.eq.f32.partialorder %v1004_v6, 8.507059e+37 }
  0xfe   : > { %v3162_v35 = vpop.eup %3161  ;;  %v1101_v42 = vmul.f32 %v3982_v21, %v3934_v25  ;;  %v1014_v11 = vadd.f32 %v3918_v29, %v1013_v7  ;;  %2917 = vmatmul.msk.bf16.gmra.mxu1 %vm575_vm0, %v1182_v33  ;;  %v1021_v52 = vand.u32 2147483648, %v3846_v34  ;;  %vm1106_vm12 = vweird.f32 %v3982_v21 }
  0xff   : > { %v3164_v3 = vpop.eup %3163  ;;  %v4006_v9 = vadd.f32 1.0, %v3162_v35  ;;  %v1185_v26 = vpack.c.bf16 %v1156_v30, %v1155_v36  ;;  %v1003_v18 = vsel %vm4031_vm11, %v3877_v0, %v999_v39  ;;  %vm1015_vm13 = vweird.f32 %v3846_v34 }
 0x100   : > { %v1609_v61 = vpop.permute.xlu1 %1608  ;;  %v1611_v46 = vpop.permute.xlu2 %1610  ;;  %v1102_v15 = vsub.f32 1.0, %v1101_v42  ;;  %v4010_v13 = vadd.f32 1.0, %v3164_v3  ;;  %v1019_v10 = vand.u32 2147483647, %v3846_v34  ;;  %v1111_v16 = vand.u32 2147483648, %v3934_v25  ;;  %vm4046_vm14 = vmor %vm1015_vm13, %vm1016_vm10 }
 0x101   : > { %1598 = vrot.lane.b32.xlu2 %v3610_v48, %s3406_s22  ;;  %1661 = vperm.xlu1 %3101, %v1611_v46   ;;  %v4017_v14 = vpop.eup %3165  ;;  %v1089_v31 = vadd.f32 %v3967_v40, %v1088_v5  ;;  %vm1091_vm15 = vweird.f32 %v3967_v40  ;;  %vm1105_vm1 = vweird.f32 %v3934_v25  ;;  %v1109_v0 = vand.u32 2147483647, %v3934_v25 }
 0x102   : > { %1657 = vperm.xlu0 %3100, %v1609_v61   ;;  %v1103_v57 = vmul.f32 %v3982_v21, %v1102_v15  ;;  %3169 = vrcp.f32 %v4010_v13  ;;  %v4044_v37 = vpop.eup %3167  ;;  %2920 = vmatmul.msk.bf16.vlgmr.msra.gmra.mxu3 %vm575_vm0, %v1185_v26  ;;  %v1007_v34 = vor.u32 1.1754944e-38, %v1006_v55  ;;  %v1018_v28 = vsel %vm4046_vm14, %v3918_v29, %v1014_v11  ;;  %vm4063_vm2 = vmor %vm1105_vm1, %vm1106_vm12 }
 0x103   : > { %3171 = vrcp.f32 %v4006_v9  ;;  %v1096_v60 = vand.u32 2147483648, %v3920_v58  ;;  %v1026_v25 = vmul.f32 %v4017_v14, %v3965_v24  ;;  %v1022_v35 = vor.u32 1.1754944e-38, %v1021_v52 }
 0x104   : > { %v1104_v19 = vadd.f32 %v3982_v21, %v1103_v57  ;;  %vm1090_vm3 = vweird.f32 %v3920_v58  ;;  %v1094_v17 = vand.u32 2147483647, %v3920_v58  ;;  %v1008_v43 = vsel %vm4023_vm9, %v1007_v34, %v1003_v18 }
 0x105   : > { %vm1020_vm4 = vcmp.eq.f32.partialorder %v1019_v10, 8.507059e+37  ;;  %v1041_v4 = vmul.f32 %v4044_v37, %v3984_v38  ;;  %vm1092_vm5 = vmor %vm1090_vm3, %vm1091_vm15  ;;  %v1112_v61 = vor.u32 1.1754944e-38, %v1111_v16  ;;  %vm1110_vm6 = vcmp.eq.f32.partialorder %v1109_v0, 8.507059e+37 }
 0x106   : > { %v1108_v42 = vsel %vm4063_vm2, %v3982_v21, %v1104_v19  ;;  %v1023_v46 = vsel %vm1020_vm4, %v1022_v35, %v1018_v28  ;;  %v1093_v58 = vsel %vm1092_vm5, %v3967_v40, %v1089_v31  ;;  %v1097_v3 = vor.u32 1.1754944e-38, %v1096_v60 }
 0x107   : > { %v1113_v63 = vsel %vm1110_vm6, %v1112_v61, %v1108_v42  ;;  %v1027_v15 = vsub.f32 1.0, %v1026_v25  ;;  %vm1095_vm7 = vcmp.eq.f32.partialorder %v1094_v17, 8.507059e+37  ;;  %v1151_v6 = vmul.f32 %v1008_v43, %v3725_v12 }
 0x108   : > { %v4073_v29 = vpop.eup %3169  ;;  %v1615_v22 = vpop.permute.xlu1 %1614  ;;  %v1152_v7 = vmul.f32 %v1023_v46, %v3740_v27  ;;  %v1042_v51 = vsub.f32 1.0, %v1041_v4  ;;  %v1098_v57 = vsel %vm1095_vm7, %v1097_v3, %v1093_v58  ;;  %v1158_v30 = vmul.f32 %v1113_v63, %v3858_v23 }
 0x109   : > { %1618 = vrot.lane.b32.xlu2 %v3610_v48, %s5169_s12  ;;  %1620 = vrot.lane.b32.xlu1 %v3599_v45, %s5171_s13  ;;  %v4080_v56 = vpop.eup %3171  ;;  %v1131_v21 = vmul.f32 %v4073_v29, %v4010_v13  ;;  %v1028_v39 = vmul.f32 %v4017_v14, %v1027_v15  ;;  %v1157_v33 = vmul.f32 %v1098_v57, %v3833_v44  ;;  %vm1031_vm8 = vweird.f32 %v4017_v14  ;;  %s3410_s12 = smov 32  }
 0x10a   : > { %1602 = vrot.lane.b32.xlu0 %v3610_v48, %s5176_s16  ;;  %v1116_v8 = vmul.f32 %v4080_v56, %v4006_v9  ;;  %v1043_v12 = vmul.f32 %v4044_v37, %v1042_v51  ;;  %v1183_v27 = vpack.c.bf16 %v1152_v7, %v1151_v6  ;;  %v1051_v11 = vand.u32 2147483648, %v3984_v38 }
 0x10b   : > { %v1132_v40 = vsub.f32 1.0, %v1131_v21  ;;  %v1186_v5 = vpack.c.bf16 %v1158_v30, %v1157_v33  ;;  %v1029_v32 = vadd.f32 %v4017_v14, %v1028_v39  ;;  %vm1046_vm9 = vweird.f32 %v4044_v37 }
 0x10c   : > { %v1117_v55 = vsub.f32 1.0, %v1116_v8  ;;  %v1044_v47 = vadd.f32 %v4044_v37, %v1043_v12  ;;  %vm1030_vm10 = vweird.f32 %v3965_v24  ;;  %v1034_v52 = vand.u32 2147483647, %v3965_v24 }
 0x10d   : > { %v1133_v36 = vmul.f32 %v4073_v29, %v1132_v40  ;;  %vm1045_vm11 = vweird.f32 %v3984_v38  ;;  %vm1136_vm12 = vweird.f32 %v4073_v29  ;;  %vm4120_vm13 = vmor %vm1030_vm10, %vm1031_vm8  ;;  %v1049_v18 = vand.u32 2147483647, %v3984_v38 }
 0x10e   : > { %2918 = vmatmul.msk.bf16.gmra.mxu1 %vm575_vm0, %v1183_v27  ;;  %v1118_v44 = vmul.f32 %v4080_v56, %v1117_v55  ;;  %v1141_v10 = vand.u32 2147483648, %v4010_v13  ;;  %vm4131_vm14 = vmor %vm1045_vm11, %vm1046_vm9  ;;  %vm1121_vm15 = vweird.f32 %v4080_v56  ;;  %vm1135_vm1 = vweird.f32 %v4010_v13 }
 0x10f   : > { %v1134_v19 = vadd.f32 %v4073_v29, %v1133_v36  ;;  %v1139_v38 = vand.u32 2147483647, %v4010_v13  ;;  %v1048_v31 = vsel %vm4131_vm14, %v4044_v37, %v1044_v47  ;;  %v1126_v0 = vand.u32 2147483648, %v4006_v9  ;;  %vm4145_vm2 = vmor %vm1135_vm1, %vm1136_vm12 }
 0x110   : > { %v1597_v23 = vpop.permute.xlu1 %1596  ;;  %vm1035_vm3 = vcmp.eq.f32.partialorder %v1034_v52, 8.507059e+37  ;;  %vm1120_vm4 = vweird.f32 %v4006_v9  ;;  %v1124_v28 = vand.u32 2147483647, %v4006_v9  ;;  %vm1050_vm5 = vcmp.eq.f32.partialorder %v1049_v18, 8.507059e+37 }
 0x111   : > { %1600 = vrot.lane.b32.xlu2 %v3599_v45, %s5176_s16  ;;  %1629 = vperm.xlu1 %3101, %v3610_v48   ;;  %v1138_v13 = vsel %vm4145_vm2, %v4073_v29, %v1134_v19  ;;  %vm1122_vm6 = vmor %vm1120_vm4, %vm1121_vm15  ;;  %v1142_v37 = vor.u32 1.1754944e-38, %v1141_v10  ;;  %vm1140_vm7 = vcmp.eq.f32.partialorder %v1139_v38, 8.507059e+37  ;;  %v1127_v42 = vor.u32 1.1754944e-38, %v1126_v0 }
 0x112   : > { %1625 = vperm.xlu0 %3100, %v3599_v45   ;;  %v1036_v45 = vand.u32 2147483648, %v3965_v24  ;;  %2921 = vmatmul.msk.bf16.gmra.mxu3 %vm575_vm0, %v1186_v5  ;;  %v1033_v24 = vsel %vm4120_vm13, %v4017_v14, %v1029_v32  ;;  %v1052_v14 = vor.u32 1.1754944e-38, %v1051_v11  ;;  %vm1125_vm8 = vcmp.eq.f32.partialorder %v1124_v28, 8.507059e+37  ;;  %v3001_v32 = vld [vmem:[%s5158_s7 + $0x18] sm:$0xff] }
 0x113   : > { %1755 = vmatpush.bf16.msrb.mxu0 %v3001_v32  ;;  %3009 = vmatpush.bf16.msra.mxu2 %v3001_v32 }
 0x114   : > { %v1037_v16 = vor.u32 1.1754944e-38, %v1036_v45  ;;  %v1053_v25 = vsel %vm1050_vm5, %v1052_v14, %v1048_v31 }
 0x115   : > { %v1154_v9 = vmul.f32 %v1053_v25, %v3872_v49 }
 0x116   : > { %v1038_v60 = vsel %vm1035_vm3, %v1037_v16, %v1033_v24  ;;  %v3000_v24 = vld [vmem:[%s5158_s7 + $0x10] sm:$0xff] }
 0x117   : > { %v1153_v43 = vmul.f32 %v1038_v60, %v3849_v41  ;;  %v4164_v41 = vperm.slane %v3625_v54, 3  ;;  %1756 = vmatpush.bf16.msrb.mxu0 %v3000_v24  ;;  %3010 = vmatpush.bf16.msra.mxu2 %v3000_v24 }
 0x118   : > { %v1617_v17 = vpop.permute.xlu1 %1616 }
 0x119   : > { %1622 = vrot.lane.b32.xlu2 %v3610_v48, %s5171_s13  ;;  %1633 = vperm.xlu1 %3101, %v1597_v23   ;;  %v1119_v48 = vadd.f32 %v4080_v56, %v1118_v44  ;;  %v1184_v61 = vpack.c.bf16 %v1154_v9, %v1153_v43  ;;  %s3416_s13 = smov 3  }
 0x11a   : > { %1669 = vperm.xlu0 %3100, %v1615_v22   ;;  %v1143_v22 = vsel %vm1140_vm7, %v1142_v37, %v1138_v13 }
 0x11b   : > { %v1123_v35 = vsel %vm1122_vm6, %v4080_v56, %v1119_v48  ;;  %v1160_v29 = vmul.f32 %v1143_v22, %v3938_v50  ;;  %v596_v48 = vperm.slane %v4200_v20, 5 }
 0x11c   : > { %v1128_v4 = vsel %vm1125_vm8, %v1127_v42, %v1123_v35 }
 0x11d   : > { %v1159_v46 = vmul.f32 %v1128_v4, %v3923_v59 }
 0x11e   : > { %2919 = vmatmul.msk.bf16.gmra.mxu1 %vm575_vm0, %v1184_v61 }
 0x11f   : > { %v1187_v56 = vpack.c.bf16 %v1160_v29, %v1159_v46 }
 0x121   : > { %1665 = vperm.xlu2 %3099, %v1613_v62  }
 0x122   : > { %1673 = vperm.xlu0 %3100, %v1617_v17   ;;  %2922 = vmatmul.msk.bf16.gmra.mxu3 %vm575_vm0, %v1187_v56 }
 0x153   : > { %v4161_v58 = vpop.permute.xlu2 %1649 }
 0x15b   : > { %v1599_v21 = vpop.permute.xlu2 %1598  ;;  %v1234_v49 = vpop.f32.mrf.mxu1 }
 0x15c   : > { %1637 = vperm.xlu2 %3099, %v1599_v21   ;;  %v4167_v63 = vadd.f32 %v1234_v49, %v4164_v41 }
 0x15e   : > { %v2923_v59 = vmul.f32 -1.442695, %v4167_v63 }
 0x160   : > { %3173 = vpow2.f32 %v2923_v59 }
 0x163   : > { %v1619_v3 = vpop.permute.xlu2 %1618  ;;  %v1236_v50 = vpop.f32.mrf.mxu1 }
 0x164   : > { %1677 = vperm.xlu1 %3101, %v1619_v3   ;;  %v4171_v8 = vadd.f32 %v1236_v50, %v4164_v41 }
 0x166   : > { %v3174_v7 = vpop.eup %3173  ;;  %v2924_v54 = vmul.f32 -1.442695, %v4171_v8 }
 0x167   : > { %v1322_v51 = vadd.f32 1.0, %v3174_v7 }
 0x168   : > { %3175 = vpow2.f32 %v2924_v54 }
 0x169   : > { %3177 = vrcp.f32 %v1322_v51  ;;  %v1347_v19 = vand.u32 2147483647, %v1322_v51  ;;  %v1349_v26 = vand.u32 2147483648, %v1322_v51  ;;  %vm1343_vm10 = vweird.f32 %v1322_v51 }
 0x16b   : > { %v1601_v15 = vpop.permute.xlu2 %1600  ;;  %v4173_v6 = vpop.permute.xlu0 %1653  ;;  %vm1348_vm12 = vcmp.eq.f32.partialorder %v1347_v19, 8.507059e+37  ;;  %v1350_v28 = vor.u32 1.1754944e-38, %v1349_v26 }
 0x16c   : > { %1641 = vperm.xlu2 %3099, %v1601_v15   ;;  %v1239_v57 = vpop.f32.mrf.mxu1 }
 0x16d   : > { %v4185_v44 = vadd.f32 %v1239_v57, %v4164_v41 }
 0x16e   : > { %v3176_v33 = vpop.eup %3175 }
 0x16f   : > { %v3178_v55 = vpop.eup %3177  ;;  %v1323_v12 = vadd.f32 1.0, %v3176_v33  ;;  %v2925_v38 = vmul.f32 -1.442695, %v4185_v44 }
 0x170   : > { %v1339_v27 = vmul.f32 %v3178_v55, %v1322_v51  ;;  %vm1344_vm9 = vweird.f32 %v3178_v55 }
 0x171   : > { %3179 = vrcp.f32 %v1323_v12  ;;  %vm4193_vm11 = vmor %vm1343_vm10, %vm1344_vm9  ;;  %v1364_v34 = vand.u32 2147483648, %v1323_v12  ;;  %v1362_v37 = vand.u32 2147483647, %v1323_v12  ;;  %vm1358_vm14 = vweird.f32 %v1323_v12 }
 0x172   : > { %v1340_v36 = vsub.f32 1.0, %v1339_v27  ;;  %3181 = vpow2.f32 %v2925_v38 }
 0x173   : > { %v4176_v30 = vpop.permute.xlu1 %1661  ;;  %v1623_v40 = vpop.permute.xlu2 %1622  ;;  %v1365_v35 = vor.u32 1.1754944e-38, %v1364_v34  ;;  %vm1363_vm1 = vcmp.eq.f32.partialorder %v1362_v37, 8.507059e+37 }
 0x174   : > { %v4178_v39 = vpop.permute.xlu0 %1657  ;;  %1685 = vperm.xlu2 %3099, %v1623_v40   ;;  %v1241_v5 = vpop.f32.mrf.mxu1  ;;  %v1341_v45 = vmul.f32 %v3178_v55, %v1340_v36 }
 0x175   : > { %v4188_v18 = vadd.f32 %v1241_v5, %v4164_v41  ;;  %v4247_v5 = vld [vmem:[%s5159_s8 + $0x8] sm:$0x3] }
 0x176   : > { %v1342_v47 = vadd.f32 %v3178_v55, %v1341_v45 }
 0x177   : > { %v3180_v52 = vpop.eup %3179  ;;  %v2926_v13 = vmul.f32 -1.442695, %v4188_v18 }
 0x178   : > { %v1354_v10 = vmul.f32 %v3180_v52, %v1323_v12  ;;  %v1346_v14 = vsel %vm4193_vm11, %v3178_v55, %v1342_v47  ;;  %vm1359_vm13 = vweird.f32 %v3180_v52  ;;  %v3182_v46 = vpop.eup %3181 }
 0x179   : > { %v1351_v62 = vsel %vm1348_vm12, %v1350_v28, %v1346_v14  ;;  %vm1360_vm15 = vmor %vm1358_vm14, %vm1359_vm13  ;;  %3183 = vpow2.f32 %v2926_v13  ;;  %v4219_v49 = vadd.f32 1.0, %v3182_v46 }
 0x17a   : > { %v1355_v31 = vsub.f32 1.0, %v1354_v10  ;;  %v1578_v22 = vmul.f32 %v1351_v62, %v4167_v63 }
 0x17b   : > { %v1621_v23 = vpop.permute.xlu1 %1620  ;;  %3185 = vrcp.f32 %v4219_v49  ;;  %vm1373_vm2 = vweird.f32 %v4219_v49  ;;  %v1377_v62 = vand.u32 2147483647, %v4219_v49 }
 0x17c   : > { %v1603_v11 = vpop.permute.xlu0 %1602  ;;  %1681 = vperm.xlu1 %3101, %v1621_v23   ;;  %3103 = vset.pattern.permute.xlu2 %v3396_v2  ;;  %v1244_v0 = vpop.f32.mrf.mxu1  ;;  %v1356_v60 = vmul.f32 %v3180_v52, %v1355_v31 }
 0x17d   : > { %1645 = vperm.xlu0 %3100, %v1603_v11   ;;  %v4222_v3 = vadd.f32 %v1244_v0, %v4164_v41  ;;  %v2465_v11 = vperm.slane %v4247_v5, 1  ;;  %vm1378_vm7 = vcmp.eq.f32.partialorder %v1377_v62, 8.507059e+37 }
 0x17e   : > { %v1357_v25 = vadd.f32 %v3180_v52, %v1356_v60 }
 0x17f   : > { %v2927_v50 = vmul.f32 -1.442695, %v4222_v3 }
 0x180   : > { %v1361_v42 = vsel %vm1360_vm15, %v3180_v52, %v1357_v25  ;;  %v1379_v25 = vand.u32 2147483648, %v4219_v49 }
 0x181   : > { %v1366_v9 = vsel %vm1363_vm1, %v1365_v35, %v1361_v42 }
 0x182   : > { %v1579_v4 = vmul.f32 %v1366_v9, %v4171_v8 }
 0x183   : > { %v1630_v43 = vpop.permute.xlu1 %1629 }
 0x184   : > { %598 = vrot.lane.b32.xlu1 %v596_v48, %s3410_s12  ;;  %v1626_v17 = vpop.permute.xlu0 %1625  ;;  %v4213_v61 = vpop.f32.mrf.mxu1  ;;  %v4215_v56 = vmul.f32 %v1630_v43, %v1579_v4 }
 0x185   : > { %3102 = vset.pattern.permute.xlu0 %v3396_v2  ;;  %v4211_v29 = vmul.f32 %v1626_v17, %v1578_v22  ;;  %v3184_v2 = vpop.eup %3183  ;;  %v1259_v63 = vpop.f32.mrf.mxu3  ;;  %v4292_v43 = vadd.f32 %v4213_v61, %v4164_v41  ;;  %v1380_v61 = vor.u32 1.1754944e-38, %v1379_v25 }
 0x186   : > { %v4225_v59 = vadd.f32 1.0, %v3184_v2  ;;  %v4234_v54 = vpop.eup %3185  ;;  %v4252_v32 = vadd.f32 %v1259_v63, %v4164_v41 }
 0x187   : > { %v1704_v21 = vpack.c.bf16 %v4215_v56, %v4211_v29  ;;  %v1369_v33 = vmul.f32 %v4234_v54, %v4219_v49  ;;  %vm1374_vm3 = vweird.f32 %v4234_v54 }
 0x188   : > { %3187 = vrcp.f32 %v4225_v59  ;;  %v2933_v10 = vmul.f32 -1.442695, %v4252_v32  ;;  %v1392_v35 = vand.u32 2147483647, %v4225_v59  ;;  %vm4296_vm5 = vmor %vm1373_vm2, %vm1374_vm3  ;;  %v1394_v46 = vand.u32 2147483648, %v4225_v59 }
 0x189   : > { %2947 = vmatmul.msk.bf16.vlgmr.msrb.gmra.mxu0 %vm575_vm0, %v1704_v21  ;;  %3189 = vpow2.f32 %v2927_v50  ;;  %v1370_v19 = vsub.f32 1.0, %v1369_v33  ;;  %vm1388_vm6 = vweird.f32 %v4225_v59 }
 0x18a   : > { %vm4310_vm9 = vcmp.eq.f32.partialorder %v1392_v35, 8.507059e+37 }
 0x18b   : > { %v1371_v48 = vmul.f32 %v4234_v54, %v1370_v19  ;;  %v1634_v50 = vpop.permute.xlu1 %1633 }
 0x18c   : > { %v1249_v15 = vpop.f32.mrf.mxu1  ;;  %2467 = vrot.lane.b32.xlu1 %v2465_v11, %s3410_s12  ;;  %v1395_v11 = vor.u32 1.1754944e-38, %v1394_v46  ;;  %s3412_s12 = smov 96  }
 0x18d   : > { %v4230_v8 = vadd.f32 %v1249_v15, %v4164_v41  ;;  %v1261_v51 = vpop.f32.mrf.mxu3  ;;  %v1372_v37 = vadd.f32 %v4234_v54, %v1371_v48 }
 0x18e   : > { %v4236_v57 = vpop.eup %3187  ;;  %v4260_v52 = vadd.f32 %v1261_v51, %v4164_v41  ;;  %v4316_v51 = vpop.permute.xlu2 %1665 }
 0x18f   : > { %v2929_v7 = vmul.f32 -1.442695, %v4230_v8  ;;  %v3190_v12 = vpop.eup %3189  ;;  %v1384_v23 = vmul.f32 %v4236_v57, %v4225_v59  ;;  %vm1389_vm4 = vweird.f32 %v4236_v57  ;;  %v1376_v21 = vsel %vm4296_vm5, %v4234_v54, %v1372_v37 }
 0x190   : > { %v4257_v47 = vadd.f32 1.0, %v3190_v12  ;;  %v2934_v16 = vmul.f32 -1.442695, %v4260_v52  ;;  %vm4306_vm8 = vmor %vm1388_vm6, %vm1389_vm4 }
 0x191   : > { %3191 = vpow2.f32 %v2929_v7  ;;  %v1385_v26 = vsub.f32 1.0, %v1384_v23  ;;  %v1381_v23 = vsel %vm1378_vm7, %v1380_v61, %v1376_v21 }
 0x192   : > { %vm1403_vm4 = vweird.f32 %v4257_v47 }
 0x193   : > { %v1386_v0 = vmul.f32 %v4236_v57, %v1385_v26 }
 0x194   : > { %v1251_v40 = vpop.f32.mrf.mxu1 }
 0x195   : > { %v4241_v55 = vadd.f32 %v1251_v40, %v4164_v41  ;;  %v1264_v38 = vpop.f32.mrf.mxu3  ;;  %v1387_v22 = vadd.f32 %v4236_v57, %v1386_v0 }
 0x197   : > { %v3192_v27 = vpop.eup %3191  ;;  %v2930_v36 = vmul.f32 -1.442695, %v4241_v55  ;;  %v1391_v33 = vsel %vm4306_vm8, %v4236_v57, %v1387_v22 }
 0x198   : > { %v4254_v45 = vadd.f32 1.0, %v3192_v27  ;;  %v4327_v27 = vmul.f32 -1.442695, %v4292_v43 }
 0x199   : > { %3193 = vpow2.f32 %v2930_v36 }
 0x19a   : > { %3195 = vrcp.f32 %v4254_v45  ;;  %v1439_v36 = vand.u32 2147483648, %v4254_v45  ;;  %vm1433_vm11 = vweird.f32 %v4254_v45  ;;  %v1437_v26 = vand.u32 2147483647, %v4254_v45 }
 0x19b   : > { %3197 = vrcp.f32 %v4257_v47 }
 0x19c   : > { %v1254_v24 = vpop.f32.mrf.mxu1  ;;  %3199 = vpow2.f32 %v2933_v10  ;;  %v1440_v37 = vor.u32 1.1754944e-38, %v1439_v36  ;;  %vm1438_vm13 = vcmp.eq.f32.partialorder %v1437_v26, 8.507059e+37 }
 0x19d   : > { %v4269_v31 = vadd.f32 %v1254_v24, %v4164_v41  ;;  %3201 = vpow2.f32 %v2934_v16  ;;  %v1266_v59 = vpop.f32.mrf.mxu3 }
 0x19f   : > { %v3194_v14 = vpop.eup %3193  ;;  %v2931_v13 = vmul.f32 -1.442695, %v4269_v31 }
 0x1a0   : > { %v4272_v34 = vpop.eup %3195  ;;  %v4275_v28 = vadd.f32 1.0, %v3194_v14  ;;  %v1396_v14 = vsel %vm4310_vm9, %v1395_v11, %v1391_v33 }
 0x1a1   : > { %v1429_v60 = vmul.f32 %v4272_v34, %v4254_v45  ;;  %v4286_v17 = vpop.eup %3197  ;;  %vm1434_vm10 = vweird.f32 %v4272_v34  ;;  %v1581_v61 = vmul.f32 %v1396_v14, %v4188_v18 }
 0x1a2   : > { %3203 = vrcp.f32 %v4275_v28  ;;  %v3200_v63 = vpop.eup %3199  ;;  %v1399_v15 = vmul.f32 %v4286_v17, %v4257_v47  ;;  %vm4338_vm12 = vmor %vm1433_vm11, %vm1434_vm10  ;;  %v1454_v25 = vand.u32 2147483648, %v4275_v28  ;;  %vm1448_vm15 = vweird.f32 %v4275_v28 }
 0x1a3   : > { %v1430_v42 = vsub.f32 1.0, %v1429_v60  ;;  %3205 = vpow2.f32 %v2931_v13  ;;  %v3202_v7 = vpop.eup %3201  ;;  %v4334_v16 = vadd.f32 1.0, %v3200_v63  ;;  %v4350_v60 = vadd.f32 %v1264_v38, %v4164_v41  ;;  %v3003_v63 = vld [vmem:[%s5158_s7 + $0x28] sm:$0xff] }
 0x1a4   : > { %v1256_v4 = vpop.f32.mrf.mxu1  ;;  %v1400_v0 = vsub.f32 1.0, %v1399_v15  ;;  %v4352_v62 = vadd.f32 1.0, %v3202_v7  ;;  %v1409_v38 = vand.u32 2147483648, %v4257_v47  ;;  %vm1404_vm2 = vweird.f32 %v4286_v17  ;;  %2574 = vmatpush.bf16.msrb.mxu3 %v3003_v63 }
 0x1a5   : > { %v1431_v2 = vmul.f32 %v4272_v34, %v1430_v42  ;;  %v4321_v40 = vadd.f32 %v1256_v4, %v4164_v41  ;;  %v1452_v42 = vand.u32 2147483647, %v4275_v28  ;;  %v2935_v46 = vmul.f32 -1.442695, %v4350_v60  ;;  %v1269_v7 = vpop.f32.mrf.mxu3  ;;  %vm4395_vm5 = vmor %vm1403_vm4, %vm1404_vm2 }
 0x1a6   : > { %v1401_v9 = vmul.f32 %v4286_v17, %v1400_v0  ;;  %vm1508_vm2 = vweird.f32 %v4352_v62  ;;  %vm1493_vm4 = vweird.f32 %v4334_v16 }
 0x1a7   : > { %v1432_v54 = vadd.f32 %v4272_v34, %v1431_v2  ;;  %v2932_v24 = vmul.f32 -1.442695, %v4321_v40  ;;  %v4363_v2 = vadd.f32 %v1266_v59, %v4164_v41  ;;  %vm1453_vm3 = vcmp.eq.f32.partialorder %v1452_v42, 8.507059e+37 }
 0x1a8   : > { %v3204_v12 = vpop.eup %3203  ;;  %v1402_v18 = vadd.f32 %v4286_v17, %v1401_v9  ;;  %v4419_v42 = vadd.f32 %v1269_v7, %v4164_v41 }
 0x1a9   : > { %v3206_v19 = vpop.eup %3205  ;;  %v1444_v10 = vmul.f32 %v3204_v12, %v4275_v28  ;;  %v1436_v45 = vsel %vm4338_vm12, %v4272_v34, %v1432_v54  ;;  %3207 = vpow2.f32 %v2932_v24  ;;  %vm1449_vm14 = vweird.f32 %v3204_v12 }
 0x1aa   : > { %v4342_v48 = vadd.f32 1.0, %v3206_v19  ;;  %v1441_v22 = vsel %vm1438_vm13, %v1440_v37, %v1436_v45  ;;  %v1580_v34 = vmul.f32 %v1381_v23, %v4185_v44  ;;  %vm1450_vm1 = vmor %vm1448_vm15, %vm1449_vm14  ;;  %v1455_v44 = vor.u32 1.1754944e-38, %v1454_v25 }
 0x1ab   : > { %v1445_v13 = vsub.f32 1.0, %v1444_v10  ;;  %v1584_v28 = vmul.f32 %v1441_v22, %v4230_v8  ;;  %v1407_v19 = vand.u32 2147483647, %v4257_v47  ;;  %v1410_v45 = vor.u32 1.1754944e-38, %v1409_v38 }
 0x1ac   : > { %3209 = vrcp.f32 %v4342_v48  ;;  %v1690_v11 = vmul.f32 %v1634_v50, %v1580_v34  ;;  %vm1463_vm8 = vweird.f32 %v4342_v48  ;;  %v1467_v22 = vand.u32 2147483647, %v4342_v48 }
 0x1ad   : > { %v1446_v35 = vmul.f32 %v3204_v12, %v1445_v13  ;;  %3211 = vrcp.f32 %v4352_v62  ;;  %v4388_v26 = vmul.f32 %v4161_v58, %v1584_v28  ;;  %v1406_v58 = vsel %vm4395_vm5, %v4286_v17, %v1402_v18  ;;  %v1271_v9 = vpop.f32.mrf.mxu3 }
 0x1ae   : > { %3213 = vrcp.f32 %v4334_v16  ;;  %vm1408_vm6 = vcmp.eq.f32.partialorder %v1407_v19, 8.507059e+37  ;;  %v4440_v7 = vadd.f32 %v1271_v9, %v4164_v41  ;;  %vm1468_vm10 = vcmp.eq.f32.partialorder %v1467_v22, 8.507059e+37 }
 0x1af   : > { %v1447_v4 = vadd.f32 %v3204_v12, %v1446_v35  ;;  %v3208_v49 = vpop.eup %3207  ;;  %3215 = vpow2.f32 %v2935_v46  ;;  %v1411_v17 = vsel %vm1408_vm6, %v1410_v45, %v1406_v58  ;;  %v1469_v35 = vand.u32 2147483648, %v4342_v48 }
 0x1b0   : > { %v4375_v33 = vadd.f32 1.0, %v3208_v49  ;;  %v2212_v46 = vadd.f32 %v1690_v11, %v4211_v29  ;;  %v1582_v63 = vmul.f32 %v1411_v17, %v4222_v3  ;;  %v2937_v29 = vmul.f32 -1.442695, %v4419_v42 }
 0x1b1   : > { %v1451_v15 = vsel %vm1450_vm1, %v3204_v12, %v1447_v4  ;;  %v2936_v12 = vmul.f32 -1.442695, %v4363_v2  ;;  %v1470_v50 = vor.u32 1.1754944e-38, %v1469_v35  ;;  %v2938_v24 = vmul.f32 -1.442695, %v4440_v7 }
 0x1b2   : > { %v4373_v54 = vpop.eup %3209  ;;  %v1456_v59 = vsel %vm1453_vm3, %v1455_v44, %v1451_v15  ;;  %3217 = vrcp.f32 %v4375_v33  ;;  %v1484_v15 = vand.u32 2147483648, %v4375_v33  ;;  %v1482_v3 = vand.u32 2147483647, %v4375_v33 }
 0x1b3   : > { %v1585_v23 = vmul.f32 %v1456_v59, %v4241_v55  ;;  %v1459_v8 = vmul.f32 %v4373_v54, %v4342_v48  ;;  %v4399_v57 = vpop.eup %3211  ;;  %3219 = vpow2.f32 %v4327_v27  ;;  %vm1464_vm7 = vweird.f32 %v4373_v54 }
 0x1b4   : > { %v4406_v47 = vpop.eup %3213  ;;  %3221 = vpow2.f32 %v2936_v12  ;;  %v1504_v27 = vmul.f32 %v4399_v57, %v4352_v62  ;;  %vm4427_vm9 = vmor %vm1463_vm8, %vm1464_vm7  ;;  %vm1478_vm12 = vweird.f32 %v4375_v33  ;;  %vm1483_vm14 = vcmp.eq.f32.partialorder %v1482_v3, 8.507059e+37 }
 0x1b5   : > { %v4391_v10 = vmul.f32 %v4173_v6, %v1585_v23  ;;  %v1460_v55 = vsub.f32 1.0, %v1459_v8  ;;  %v3216_v13 = vpop.eup %3215  ;;  %v1489_v4 = vmul.f32 %v4406_v47, %v4334_v16  ;;  %vm1509_vm15 = vweird.f32 %v4399_v57 }
 0x1b6   : > { %v1638_v21 = vpop.permute.xlu2 %1637  ;;  %v4432_v49 = vadd.f32 1.0, %v3216_v13  ;;  %v1512_v17 = vand.u32 2147483647, %v4352_v62  ;;  %vm1494_vm1 = vweird.f32 %v4406_v47  ;;  %vm4481_vm3 = vmor %vm1508_vm2, %vm1509_vm15 }
 0x1b7   : > { %v4377_v36 = vmul.f32 %v1638_v21, %v1581_v61  ;;  %v1461_v6 = vmul.f32 %v4373_v54, %v1460_v55  ;;  %v1707_v0 = vpack.c.bf16 %v4391_v10, %v4388_v26  ;;  %v1505_v61 = vsub.f32 1.0, %v1504_v27  ;;  %vm1495_vm5 = vmor %vm1493_vm4, %vm1494_vm1 }
 0x1b8   : > { %v3218_v25 = vpop.eup %3217  ;;  %3223 = vrcp.f32 %v4432_v49  ;;  %v1485_v55 = vor.u32 1.1754944e-38, %v1484_v15  ;;  %vm1513_vm6 = vcmp.eq.f32.partialorder %v1512_v17, 8.507059e+37  ;;  %v1527_v17 = vand.u32 2147483647, %v4432_v49 }
 0x1b9   : > { %v1705_v14 = vpack.c.bf16 %v4377_v36, %v1690_v11  ;;  %v1462_v37 = vadd.f32 %v4373_v54, %v1461_v6  ;;  %2950 = vmatmul.msk.bf16.vlgmr.msra.gmra.mxu2 %vm575_vm0, %v1707_v0  ;;  %v1474_v34 = vmul.f32 %v3218_v25, %v4375_v33  ;;  %v3220_v38 = vpop.eup %3219  ;;  %vm1479_vm11 = vweird.f32 %v3218_v25 }
 0x1ba   : > { %v3222_v44 = vpop.eup %3221  ;;  %v4443_v23 = vadd.f32 1.0, %v3220_v38  ;;  %v1490_v11 = vsub.f32 1.0, %v1489_v4  ;;  %v1506_v41 = vmul.f32 %v4399_v57, %v1505_v61  ;;  %vm1480_vm13 = vmor %vm1478_vm12, %vm1479_vm11  ;;  %3225 = vpow2.f32 %v2937_v29  ;;  %v3002_v4 = vld [vmem:[%s5158_s7 + $0x20] sm:$0xff] }
 0x1bb   : > { %2948 = vmatmul.msk.bf16.gmra.mxu0 %vm575_vm0, %v1705_v14  ;;  %v1466_v48 = vsel %vm4427_vm9, %v4373_v54, %v1462_v37  ;;  %v1475_v28 = vsub.f32 1.0, %v1474_v34  ;;  %v4445_v12 = vadd.f32 1.0, %v3222_v44  ;;  %v1497_v38 = vand.u32 2147483647, %v4334_v16  ;;  %2575 = vmatpush.bf16.msrb.mxu3 %v3002_v4 }
 0x1bc   : > { %v1471_v8 = vsel %vm1468_vm10, %v1470_v50, %v1466_v48  ;;  %v1491_v33 = vmul.f32 %v4406_v47, %v1490_v11  ;;  %v1507_v27 = vadd.f32 %v4399_v57, %v1506_v41  ;;  %vm1523_vm10 = vweird.f32 %v4432_v49 }
 0x1bd   : > { %v1476_v59 = vmul.f32 %v3218_v25, %v1475_v28  ;;  %v1586_v58 = vmul.f32 %v1471_v8, %v4269_v31  ;;  %3227 = vrcp.f32 %v4445_v12  ;;  %vm1498_vm7 = vcmp.eq.f32.partialorder %v1497_v38, 8.507059e+37 }
 0x1be   : > { %3229 = vrcp.f32 %v4443_v23  ;;  %v4461_v13 = vpop.eup %3223  ;;  %vm1538_vm12 = vweird.f32 %v4445_v12  ;;  %vm1528_vm1 = vcmp.eq.f32.partialorder %v1527_v17, 8.507059e+37  ;;  %v1424_v4 = vand.u32 2147483648, %v4443_v23 }
 0x1bf   : > { %v1477_v19 = vadd.f32 %v3218_v25, %v1476_v59  ;;  %3231 = vpow2.f32 %v2938_v24  ;;  %v4466_v31 = vmul.f32 %v4178_v39, %v1586_v58  ;;  %v1499_v39 = vand.u32 2147483648, %v4334_v16 }
 0x1c0   : > { %v3226_v35 = vpop.eup %3225  ;;  %v1519_v44 = vmul.f32 %v4461_v13, %v4432_v49  ;;  %vm1524_vm8 = vweird.f32 %v4461_v13 }
 0x1c1   : > { %v1481_v6 = vsel %vm1480_vm13, %v3218_v25, %v1477_v19  ;;  %v1514_v25 = vand.u32 2147483648, %v4352_v62  ;;  %v1511_v62 = vsel %vm4481_vm3, %v4399_v57, %v1507_v27  ;;  %v4499_v16 = vadd.f32 1.0, %v3226_v35  ;;  %vm4534_vm11 = vmor %vm1523_vm10, %vm1524_vm8 }
 0x1c2   : > { %v1486_v0 = vsel %vm1483_vm14, %v1485_v55, %v1481_v6  ;;  %v1500_v61 = vor.u32 1.1754944e-38, %v1499_v39  ;;  %v1520_v29 = vsub.f32 1.0, %v1519_v44  ;;  %vm1418_vm14 = vweird.f32 %v4443_v23  ;;  %v3322_v44 = vld [vmem:[%s3595_s29] sm:$0xff] }
 0x1c3   : > { %v1587_v45 = vmul.f32 %v1486_v0, %v4321_v40  ;;  %v1492_v40 = vadd.f32 %v4406_v47, %v1491_v33  ;;  %v4478_v34 = vpop.eup %3227  ;;  %v1515_v21 = vor.u32 1.1754944e-38, %v1514_v25  ;;  %3233 = vrcp.f32 %v4499_v16 }
 0x1c4   : > { %v4485_v9 = vpop.eup %3229  ;;  %v1534_v57 = vmul.f32 %v4478_v34, %v4445_v12  ;;  %v1521_v19 = vmul.f32 %v4461_v13, %v1520_v29  ;;  %vm1539_vm9 = vweird.f32 %v4478_v34  ;;  %v1544_v33 = vand.u32 2147483648, %v4445_v12 }
 0x1c5   : > { %v4469_v37 = vmul.f32 %v4176_v30, %v1587_v45  ;;  %v1516_v48 = vsel %vm1513_vm6, %v1515_v21, %v1511_v62  ;;  %v1414_v15 = vmul.f32 %v4485_v9, %v4443_v23  ;;  %v1542_v25 = vand.u32 2147483647, %v4445_v12  ;;  %vm4544_vm13 = vmor %vm1538_vm12, %vm1539_vm9 }
 0x1c6   : > { %v1642_v18 = vpop.permute.xlu2 %1641  ;;  %v1535_v59 = vsub.f32 1.0, %v1534_v57  ;;  %v1522_v6 = vadd.f32 %v4461_v13, %v1521_v19  ;;  %vm1419_vm15 = vweird.f32 %v4485_v9  ;;  %v1422_v12 = vand.u32 2147483647, %v4443_v23 }
 0x1c7   : > { %v4447_v54 = vmul.f32 %v1642_v18, %v1582_v63  ;;  %v1708_v22 = vpack.c.bf16 %v4469_v37, %v4466_v31  ;;  %v1496_v63 = vsel %vm1495_vm5, %v4406_v47, %v1492_v40  ;;  %v1589_v47 = vmul.f32 %v1516_v48, %v4260_v52  ;;  %v1670_v18 = vpop.permute.xlu0 %1669  ;;  %vm1420_vm4 = vmor %vm1418_vm14, %vm1419_vm15 }
 0x1c8   : > { %v1501_v50 = vsel %vm1498_vm7, %v1500_v61, %v1496_v63  ;;  %v1415_v8 = vsub.f32 1.0, %v1414_v15  ;;  %v1536_v41 = vmul.f32 %v4478_v34, %v1535_v59  ;;  %v1545_v30 = vor.u32 1.1754944e-38, %v1544_v33 }
 0x1c9   : > { %v4454_v14 = vadd.f32 %v2212_v46, %v4447_v54  ;;  %2951 = vmatmul.msk.bf16.gmra.mxu2 %vm575_vm0, %v1708_v22  ;;  %v3232_v46 = vpop.eup %3231  ;;  %v1588_v3 = vmul.f32 %v1501_v50, %v4252_v32  ;;  %v4511_v11 = vmul.f32 %v1670_v18, %v1589_v47  ;;  %v1526_v22 = vsel %vm4534_vm11, %v4461_v13, %v1522_v6 }
 0x1ca   : > { %v4503_v28 = vadd.f32 1.0, %v3232_v46  ;;  %v4515_v55 = vpop.eup %3233  ;;  %v1416_v24 = vmul.f32 %v4485_v9, %v1415_v8  ;;  %v1537_v0 = vadd.f32 %v4478_v34, %v1536_v41  ;;  %vm1543_vm2 = vcmp.eq.f32.partialorder %v1542_v25, 8.507059e+37 }
 0x1cb   : > { %v4518_v52 = vmul.f32 %v4316_v51, %v1588_v3  ;;  %v1529_v51 = vand.u32 2147483648, %v4432_v49  ;;  %v1549_v45 = vmul.f32 %v4515_v55, %v4499_v16  ;;  %vm2450_vm3 = vcmask 64512  }
 0x1cc   : > { %3235 = vrcp.f32 %v4503_v28  ;;  %v1541_v49 = vsel %vm4544_vm13, %v4478_v34, %v1537_v0  ;;  %v1417_v62 = vadd.f32 %v4485_v9, %v1416_v24  ;;  %v2451_v34 = vsel %vm2450_vm3, %v3322_v44, 0.0 }
 0x1cd   : > { %v1709_v58 = vpack.c.bf16 %v4511_v11, %v4518_v52  ;;  %v1530_v39 = vor.u32 1.1754944e-38, %v1529_v51  ;;  %v1550_v38 = vsub.f32 1.0, %v1549_v45  ;;  %v1546_v63 = vsel %vm1543_vm2, %v1545_v30, %v1541_v49  ;;  %2452 = vadd.xlane.f32.xlu0 %v2451_v34 }
 0x1ce   : > { %v1421_v48 = vsel %vm1420_vm4, %v4485_v9, %v1417_v62  ;;  %v1591_v15 = vmul.f32 %v1546_v63, %v4363_v2  ;;  %v1425_v47 = vor.u32 1.1754944e-38, %v1424_v4  ;;  %vm1423_vm5 = vcmp.eq.f32.partialorder %v1422_v12, 8.507059e+37 }
 0x1cf   : > { %v1531_v13 = vsel %vm1528_vm1, %v1530_v39, %v1526_v22  ;;  %v1674_v57 = vpop.permute.xlu0 %1673  ;;  %v1551_v61 = vmul.f32 %v4515_v55, %v1550_v38  ;;  %vm1554_vm6 = vweird.f32 %v4515_v55  ;;  %vm1553_vm7 = vweird.f32 %v4499_v16  ;;  %v1686_v22 = vpop.permute.xlu2 %1685 }
 0x1d0   : > { %v1590_v50 = vmul.f32 %v1531_v13, %v4350_v60  ;;  %v1426_v3 = vsel %vm1423_vm5, %v1425_v47, %v1421_v48  ;;  %v1557_v8 = vand.u32 2147483647, %v4499_v16  ;;  %v1559_v9 = vand.u32 2147483648, %v4499_v16  ;;  %vm4583_vm9 = vmor %vm1553_vm7, %vm1554_vm6 }
 0x1d1   : > { %v1552_v18 = vadd.f32 %v4515_v55, %v1551_v61  ;;  %v2280_v60 = vadd.f32 %v4454_v14, %v4388_v26  ;;  %v1583_v41 = vmul.f32 %v1426_v3, %v4292_v43  ;;  %v2213_v24 = vadd.f32 %v4377_v36, %v4215_v56 }
 0x1d2   : > { %v4522_v32 = vpop.eup %3235  ;;  %v1700_v23 = vmul.f32 %v1674_v57, %v1590_v50  ;;  %vm1568_vm10 = vweird.f32 %v4503_v28  ;;  %v1572_v26 = vand.u32 2147483647, %v4503_v28  ;;  %vm1558_vm12 = vcmp.eq.f32.partialorder %v1557_v8, 8.507059e+37 }
 0x1d3   : > { %v1564_v35 = vmul.f32 %v4522_v32, %v4503_v28  ;;  %vm1569_vm8 = vweird.f32 %v4522_v32  ;;  %v1556_v14 = vsel %vm4583_vm9, %v4515_v55, %v1552_v18  ;;  %v1560_v56 = vor.u32 1.1754944e-38, %v1559_v9 }
 0x1d4   : > { %vm1570_vm11 = vmor %vm1568_vm10, %vm1569_vm8  ;;  %v2314_v36 = vadd.f32 %v2280_v60, %v4466_v31  ;;  %vm1573_vm13 = vcmp.eq.f32.partialorder %v1572_v26, 8.507059e+37  ;;  %v4614_v63 = vperm.slane %v4200_v20, 4  ;;  %v2592_v50 = vperm.slane %v4200_v20, 6 }
 0x1d5   : > { %v1565_v46 = vsub.f32 1.0, %v1564_v35  ;;  %v1561_v17 = vsel %vm1558_vm12, %v1560_v56, %v1556_v14 }
 0x1d6   : > { %v1678_v21 = vpop.permute.xlu1 %1677  ;;  %v1592_v25 = vmul.f32 %v1561_v17, %v4419_v42  ;;  %v2348_v35 = vadd.f32 %v2314_v36, %v4518_v52  ;;  %2594 = vrot.lane.b32.xlu2 %v2592_v50, %s5175_s25 }
 0x1d7   : > { %v1566_v29 = vmul.f32 %v4522_v32, %v1565_v46  ;;  %v1701_v59 = vmul.f32 %v1678_v21, %v1591_v15 }
 0x1d8   : > { %v2382_v30 = vadd.f32 %v2348_v35, %v1700_v23 }
 0x1d9   : > { %2952 = vmatmul.msk.bf16.gmra.mxu2 %vm575_vm0, %v1709_v58  ;;  %v1567_v2 = vadd.f32 %v4522_v32, %v1566_v29  ;;  %v1574_v58 = vand.u32 2147483648, %v4503_v28  ;;  %v1710_v6 = vpack.c.bf16 %v1701_v59, %v1700_v23 }
 0x1db   : > { %v1571_v51 = vsel %vm1570_vm11, %v4522_v32, %v1567_v2  ;;  %v1575_v27 = vor.u32 1.1754944e-38, %v1574_v58 }
 0x1dd   : > { %v1576_v55 = vsel %vm1573_vm13, %v1575_v27, %v1571_v51 }
 0x1de   : > { %v1593_v49 = vmul.f32 %v1576_v55, %v4440_v7 }
 0x1e0   : > { %v1703_v42 = vmul.f32 %v1686_v22, %v1593_v49 }
 0x1e9   : > { %2953 = vmatmul.msk.bf16.gmra.mxu2 %vm575_vm0, %v1710_v6 }
 0x1ee   : > { %v1682_v19 = vpop.permute.xlu1 %1681 }
 0x1ef   : > { %v1646_v16 = vpop.permute.xlu0 %1645 }
 0x1f0   : > { %v1693_v43 = vmul.f32 %v1646_v16, %v1583_v41 }
 0x1f2   : > { %v1706_v33 = vpack.c.bf16 %v1693_v43, %v4447_v54  ;;  %v2247_v45 = vadd.f32 %v2213_v24, %v1693_v43 }
 0x1f4   : > { %v2281_v28 = vadd.f32 %v2247_v45, %v4391_v10  ;;  %2949 = vmatmul.msk.bf16.gmra.mxu0 %vm575_vm0, %v1706_v33  ;;  %v1702_v10 = vmul.f32 %v1682_v19, %v1592_v25 }
 0x1f6   : > { %v2315_v40 = vadd.f32 %v2281_v28, %v4469_v37  ;;  %v599_v31 = vpop.permute.xlu1 %598  ;;  %v2416_v38 = vadd.f32 %v2382_v30, %v1702_v10  ;;  %v1711_v4 = vpack.c.bf16 %v1703_v42, %v1702_v10 }
 0x1f7   : > { %v4602_v32 = vadd.f32 %v599_v31, %v3620_v53  ;;  %v4605_v54 = vadd.f32 %v599_v31, %v3644_v1 }
 0x1f8   : > { %v2349_v12 = vadd.f32 %v2315_v40, %v4511_v11 }
 0x1f9   : > { %v2877_v39 = vmul.f32 -1.442695, %v4602_v32  ;;  %v2878_v37 = vmul.f32 -1.442695, %v4605_v54  ;;  %2954 = vmatmul.msk.bf16.gmra.mxu2 %vm575_vm0, %v1711_v4 }
 0x1fa   : > { %v2383_v52 = vadd.f32 %v2349_v12, %v1701_v59 }
 0x1fb   : > { %3237 = vpow2.f32 %v2877_v39 }
 0x1fc   : > { %v2417_v62 = vadd.f32 %v2383_v52, %v1703_v42  ;;  %3239 = vpow2.f32 %v2878_v37 }
 0x1fe   : > { %v2552_v13 = vpack.c.bf16 %v2417_v62, %v2416_v38  ;;  %v2468_v16 = vpop.permute.xlu1 %2467 }
 0x200   : > { %2979 = vmatmul.msk.bf16.vlgmr.msrb.gmra.mxu3 %vm575_vm0, %v2552_v13 }
 0x201   : > { %v3238_v7 = vpop.eup %3237 }
 0x202   : > { %v3240_v46 = vpop.eup %3239  ;;  %v609_v11 = vadd.f32 1.0, %v3238_v7 }
 0x203   : > { %v610_v21 = vadd.f32 1.0, %v3240_v46  ;;  %v4629_v46 = vperm.slane %v4247_v5, 0 }
 0x204   : > { %3241 = vrcp.f32 %v609_v11  ;;  %v622_v18 = vand.u32 2147483648, %v609_v11  ;;  %v620_v60 = vand.u32 2147483647, %v609_v11  ;;  %vm616_vm15 = vweird.f32 %v609_v11 }
 0x205   : > { %3243 = vrcp.f32 %v610_v21  ;;  %v637_v2 = vand.u32 2147483648, %v610_v21  ;;  %v635_v41 = vand.u32 2147483647, %v610_v21  ;;  %vm631_vm5 = vweird.f32 %v610_v21 }
 0x206   : > { %v1758_v44 = vpop.f32.mrf.mxu0  ;;  %v623_v24 = vor.u32 1.1754944e-38, %v622_v18  ;;  %vm621_vm4 = vcmp.eq.f32.partialorder %v620_v60, 8.507059e+37 }
 0x207   : > { %v4617_v34 = vadd.f32 %v1758_v44, %v4614_v63  ;;  %v638_v14 = vor.u32 1.1754944e-38, %v637_v2  ;;  %vm636_vm7 = vcmp.eq.f32.partialorder %v635_v41, 8.507059e+37 }
 0x209   : > { %v2955_v48 = vmul.f32 -1.442695, %v4617_v34 }
 0x20a   : > { %v3242_v57 = vpop.eup %3241 }
 0x20b   : > { %v3244_v61 = vpop.eup %3243  ;;  %v612_v15 = vmul.f32 %v3242_v57, %v609_v11  ;;  %3245 = vpow2.f32 %v2955_v48  ;;  %vm617_vm14 = vweird.f32 %v3242_v57 }
 0x20c   : > { %v627_v29 = vmul.f32 %v3244_v61, %v610_v21  ;;  %vm632_vm1 = vweird.f32 %v3244_v61  ;;  %vm618_vm2 = vmor %vm616_vm15, %vm617_vm14 }
 0x20d   : > { %v613_v3 = vsub.f32 1.0, %v612_v15  ;;  %vm633_vm6 = vmor %vm631_vm5, %vm632_vm1 }
 0x20e   : > { %v1760_v47 = vpop.f32.mrf.mxu0  ;;  %v628_v23 = vsub.f32 1.0, %v627_v29 }
 0x20f   : > { %v4622_v59 = vadd.f32 %v1760_v47, %v4614_v63  ;;  %v614_v9 = vmul.f32 %v3242_v57, %v613_v3 }
 0x210   : > { %v629_v20 = vmul.f32 %v3244_v61, %v628_v23 }
 0x211   : > { %v2956_v8 = vmul.f32 -1.442695, %v4622_v59  ;;  %v615_v19 = vadd.f32 %v3242_v57, %v614_v9  ;;  %v3246_v0 = vpop.eup %3245 }
 0x212   : > { %v630_v6 = vadd.f32 %v3244_v61, %v629_v20  ;;  %v1846_v33 = vadd.f32 1.0, %v3246_v0 }
 0x213   : > { %3247 = vpow2.f32 %v2956_v8  ;;  %v619_v58 = vsel %vm618_vm2, %v3242_v57, %v615_v19 }
 0x214   : > { %v624_v26 = vsel %vm621_vm4, %v623_v24, %v619_v58  ;;  %v634_v43 = vsel %vm633_vm6, %v3244_v61, %v630_v6  ;;  %3249 = vrcp.f32 %v1846_v33  ;;  %v1873_v12 = vand.u32 2147483648, %v1846_v33 }
 0x215   : > { %v641_v56 = vmul.f32 %v624_v26, %v4602_v32  ;;  %v639_v36 = vsel %vm636_vm7, %v638_v14, %v634_v43  ;;  %vm1867_vm10 = vweird.f32 %v1846_v33  ;;  %v1871_v39 = vand.u32 2147483647, %v1846_v33 }
 0x216   : > { %v642_v45 = vmul.f32 %v639_v36, %v4605_v54  ;;  %v1874_v37 = vor.u32 1.1754944e-38, %v1873_v12  ;;  %v3323_v36 = vld [vmem:[%s3595_s29 + $0x8] sm:$0xff]  ;;  %s3415_s29 = smov 4  }
 0x217   : > { %v2470_v27 = vmul.f32 %v2468_v16, %v641_v56  ;;  %vm1872_vm14 = vcmp.eq.f32.partialorder %v1871_v39, 8.507059e+37 }
 0x218   : > { %v2471_v28 = vmul.f32 %v2468_v16, %v642_v45 }
 0x219   : > { %v3248_v51 = vpop.eup %3247  ;;  %2474 = vrot.lane.b32.xlu0 %v2470_v27, %s3412_s12 }
 0x21a   : > { %v1847_v17 = vadd.f32 1.0, %v3248_v51  ;;  %2476 = vrot.lane.b32.xlu2 %v2471_v28, %s3412_s12  ;;  %v3250_v55 = vpop.eup %3249  ;;  %v2454_v51 = vsel %vm2450_vm3, %v3323_v36, 0.0  ;;  %s3414_s12 = smov 2  }
 0x21b   : > { %v1863_v35 = vmul.f32 %v3250_v55, %v1846_v33  ;;  %vm1868_vm8 = vweird.f32 %v3250_v55  ;;  %2455 = vadd.xlane.f32.xlu1 %v2454_v51 }
 0x21c   : > { %3251 = vrcp.f32 %v1847_v17  ;;  %v1888_v42 = vand.u32 2147483648, %v1847_v17  ;;  %vm1869_vm11 = vmor %vm1867_vm10, %vm1868_vm8  ;;  %vm1882_vm12 = vweird.f32 %v1847_v17  ;;  %v1886_v30 = vand.u32 2147483647, %v1847_v17 }
 0x21d   : > { %v1864_v31 = vsub.f32 1.0, %v1863_v35 }
 0x21e   : > { %v1889_v62 = vor.u32 1.1754944e-38, %v1888_v42  ;;  %vm1887_vm15 = vcmp.eq.f32.partialorder %v1886_v30, 8.507059e+37 }
 0x21f   : > { %v1865_v32 = vmul.f32 %v3250_v55, %v1864_v31 }
 0x221   : > { %v1866_v10 = vadd.f32 %v3250_v55, %v1865_v32 }
 0x222   : > { %v3252_v25 = vpop.eup %3251 }
 0x223   : > { %v1878_v40 = vmul.f32 %v3252_v25, %v1847_v17  ;;  %vm1883_vm9 = vweird.f32 %v3252_v25  ;;  %v1870_v52 = vsel %vm1869_vm11, %v3250_v55, %v1866_v10 }
 0x224   : > { %vm1884_vm13 = vmor %vm1882_vm12, %vm1883_vm9  ;;  %v1875_v4 = vsel %vm1872_vm14, %v1874_v37, %v1870_v52 }
 0x225   : > { %v1879_v22 = vsub.f32 1.0, %v1878_v40  ;;  %v2102_v11 = vmul.f32 %v1875_v4, %v4617_v34 }
 0x227   : > { %v1880_v49 = vmul.f32 %v3252_v25, %v1879_v22  ;;  %v2119_v48 = vmul.f32 %v4629_v46, %v2102_v11 }
 0x229   : > { %v1881_v54 = vadd.f32 %v3252_v25, %v1880_v49  ;;  %v2135_v47 = vsel %vm575_vm0, %v2119_v48, 0.0 }
 0x22b   : > { %v1885_v38 = vsel %vm1884_vm13, %v3252_v25, %v1881_v54 }
 0x22c   : > { %v1890_v13 = vsel %vm1887_vm15, %v1889_v62, %v1885_v38 }
 0x22d   : > { %v2103_v57 = vmul.f32 %v1890_v13, %v4622_v59 }
 0x22f   : > { %v2120_v50 = vmul.f32 %v4629_v46, %v2103_v57 }
 0x231   : > { %v2138_v5 = vsel %vm575_vm0, %v2120_v50, 0.0 }
 0x238   : > { %v1763_v7 = vpop.f32.mrf.mxu0 }
 0x239   : > { %v1764_v44 = vadd.f32 %v1763_v7, %v4614_v63 }
 0x23b   : > { %v2957_v61 = vmul.f32 -1.442695, %v1764_v44 }
 0x23c   : > { %v4632_v21 = vpop.f32.mrf.mxu2 }
 0x23d   : > { %3253 = vpow2.f32 %v2957_v61  ;;  %v4650_v12 = vadd.f32 %v4632_v21, %v4614_v63 }
 0x23f   : > { %v2961_v30 = vmul.f32 -1.442695, %v4650_v12 }
 0x240   : > { %v1765_v29 = vpop.f32.mrf.mxu0 }
 0x241   : > { %v1766_v3 = vadd.f32 %v1765_v29, %v4614_v63 }
 0x243   : > { %2136 = vadd.xlane.f32.xlu0 %v2135_v47  ;;  %v3254_v34 = vpop.eup %3253  ;;  %2139 = vadd.xlane.f32.xlu2 %v2138_v5  ;;  %v2958_v23 = vmul.f32 -1.442695, %v1766_v3 }
 0x244   : > { %v1775_v15 = vpop.f32.mrf.mxu2  ;;  %v1848_v18 = vadd.f32 1.0, %v3254_v34 }
 0x245   : > { %v4657_v42 = vadd.f32 %v1775_v15, %v4614_v63 }
 0x246   : > { %3255 = vrcp.f32 %v1848_v18  ;;  %v1903_v2 = vand.u32 2147483648, %v1848_v18  ;;  %v1901_v24 = vand.u32 2147483647, %v1848_v18  ;;  %vm1897_vm2 = vweird.f32 %v1848_v18 }
 0x247   : > { %3257 = vpow2.f32 %v2958_v23  ;;  %v2962_v38 = vmul.f32 -1.442695, %v4657_v42 }
 0x248   : > { %v1904_v0 = vor.u32 1.1754944e-38, %v1903_v2  ;;  %vm1902_vm5 = vcmp.eq.f32.partialorder %v1901_v24, 8.507059e+37 }
 0x24c   : > { %v1778_v59 = vpop.f32.mrf.mxu2  ;;  %v3256_v8 = vpop.eup %3255 }
 0x24d   : > { %v1893_v9 = vmul.f32 %v3256_v8, %v1848_v18  ;;  %v3258_v60 = vpop.eup %3257  ;;  %vm1898_vm1 = vweird.f32 %v3256_v8  ;;  %v4653_v54 = vadd.f32 %v1778_v59, %v4614_v63 }
 0x24e   : > { %v1849_v19 = vadd.f32 1.0, %v3258_v60  ;;  %vm1899_vm4 = vmor %vm1897_vm2, %vm1898_vm1 }
 0x24f   : > { %v1894_v20 = vsub.f32 1.0, %v1893_v9  ;;  %v2963_v52 = vmul.f32 -1.442695, %v4653_v54 }
 0x250   : > { %3259 = vrcp.f32 %v1849_v19  ;;  %v1918_v17 = vand.u32 2147483648, %v1849_v19  ;;  %v1916_v55 = vand.u32 2147483647, %v1849_v19  ;;  %vm1912_vm7 = vweird.f32 %v1849_v19 }
 0x251   : > { %v1895_v41 = vmul.f32 %v3256_v8, %v1894_v20  ;;  %3261 = vpow2.f32 %v2961_v30 }
 0x252   : > { %v1919_v40 = vor.u32 1.1754944e-38, %v1918_v17  ;;  %vm1917_vm9 = vcmp.eq.f32.partialorder %v1916_v55, 8.507059e+37  ;;  %3263 = vpow2.f32 %v2963_v52 }
 0x253   : > { %v1896_v58 = vadd.f32 %v3256_v8, %v1895_v41  ;;  %3265 = vpow2.f32 %v2962_v38 }
 0x254   : > { %v4641_v6 = vpop.f32.mrf.mxu2 }
 0x255   : > { %v1900_v16 = vsel %vm1899_vm4, %v3256_v8, %v1896_v58  ;;  %v4684_v18 = vadd.f32 %v4641_v6, %v4614_v63 }
 0x256   : > { %v1905_v26 = vsel %vm1902_vm5, %v1904_v0, %v1900_v16  ;;  %v3260_v43 = vpop.eup %3259 }
 0x257   : > { %v2104_v14 = vmul.f32 %v1905_v26, %v1764_v44  ;;  %v1908_v56 = vmul.f32 %v3260_v43, %v1849_v19  ;;  %vm1913_vm6 = vweird.f32 %v3260_v43  ;;  %v3262_v7 = vpop.eup %3261  ;;  %v2964_v2 = vmul.f32 -1.442695, %v4684_v18 }
 0x258   : > { %vm1914_vm8 = vmor %vm1912_vm7, %vm1913_vm6  ;;  %v3264_v11 = vpop.eup %3263  ;;  %v4669_v61 = vadd.f32 1.0, %v3262_v7 }
 0x259   : > { %v1909_v33 = vsub.f32 1.0, %v1908_v56  ;;  %v2121_v27 = vmul.f32 %v4629_v46, %v2104_v14  ;;  %v3266_v57 = vpop.eup %3265  ;;  %v4674_v50 = vadd.f32 1.0, %v3264_v11 }
 0x25a   : > { %v4677_v47 = vadd.f32 1.0, %v3266_v57  ;;  %v1963_v30 = vand.u32 2147483648, %v4669_v61  ;;  %vm1957_vm13 = vweird.f32 %v4669_v61 }
 0x25b   : > { %v1910_v28 = vmul.f32 %v3260_v43, %v1909_v33  ;;  %v2141_v25 = vsel %vm575_vm0, %v2121_v27, 0.0  ;;  %vm1987_vm4 = vweird.f32 %v4674_v50 }
 0x25c   : > { %v1783_v45 = vpop.f32.mrf.mxu2  ;;  %2142 = vadd.xlane.f32.xlu0 %v2141_v25  ;;  %vm1972_vm1 = vweird.f32 %v4677_v47 }
 0x25d   : > { %v1911_v35 = vadd.f32 %v3260_v43, %v1910_v28  ;;  %v4672_v48 = vadd.f32 %v1783_v45, %v4614_v63 }
 0x25f   : > { %v1915_v31 = vsel %vm1914_vm8, %v3260_v43, %v1911_v35  ;;  %v2965_v29 = vmul.f32 -1.442695, %v4672_v48 }
 0x260   : > { %v1920_v22 = vsel %vm1917_vm9, %v1919_v40, %v1915_v31 }
 0x261   : > { %v2105_v32 = vmul.f32 %v1920_v22, %v1766_v3 }
 0x263   : > { %v2122_v10 = vmul.f32 %v4629_v46, %v2105_v32 }
 0x264   : > { %v1785_v49 = vpop.f32.mrf.mxu2 }
 0x265   : > { %v2144_v39 = vsel %vm575_vm0, %v2122_v10, 0.0  ;;  %v4666_v21 = vadd.f32 %v1785_v49, %v4614_v63 }
 0x266   : > { %2145 = vadd.xlane.f32.xlu1 %v2144_v39  ;;  %v1961_v39 = vand.u32 2147483647, %v4669_v61 }
 0x267   : > { %v2966_v15 = vmul.f32 -1.442695, %v4666_v21 }
 0x26c   : > { %v1788_v37 = vpop.f32.mrf.mxu2 }
 0x26d   : > { %v4712_v56 = vadd.f32 %v1788_v37, %v4614_v63 }
 0x26f   : > { %v2967_v55 = vmul.f32 -1.442695, %v4712_v56 }
 0x271   : > { %v1768_v62 = vpop.f32.mrf.mxu0 }
 0x272   : > { %v4663_v13 = vadd.f32 %v1768_v62, %v4614_v63 }
 0x274   : > { %v1790_v4 = vpop.f32.mrf.mxu2  ;;  %v2959_v44 = vmul.f32 -1.442695, %v4663_v13 }
 0x275   : > { %v4694_v9 = vadd.f32 %v1790_v4, %v4614_v63 }
 0x276   : > { %3267 = vpow2.f32 %v2959_v44 }
 0x277   : > { %3269 = vrcp.f32 %v4669_v61  ;;  %v2968_v0 = vmul.f32 -1.442695, %v4694_v9 }
 0x278   : > { %3271 = vrcp.f32 %v4674_v50 }
 0x279   : > { %v1770_v34 = vpop.f32.mrf.mxu0  ;;  %3273 = vpow2.f32 %v2966_v15 }
 0x27a   : > { %v4687_v23 = vadd.f32 %v1770_v34, %v4614_v63  ;;  %3275 = vrcp.f32 %v4677_v47 }
 0x27b   : > { %3277 = vpow2.f32 %v2965_v29 }
 0x27c   : > { %v1793_v5 = vpop.f32.mrf.mxu2  ;;  %v3268_v3 = vpop.eup %3267  ;;  %v2960_v60 = vmul.f32 -1.442695, %v4687_v23 }
 0x27d   : > { %v1850_v59 = vadd.f32 1.0, %v3268_v3  ;;  %v4691_v8 = vadd.f32 %v1793_v5, %v4614_v63  ;;  %v4697_v20 = vpop.eup %3269  ;;  %v1976_v3 = vand.u32 2147483647, %v4677_v47 }
 0x27e   : > { %v4700_v19 = vpop.eup %3271  ;;  %v1953_v51 = vmul.f32 %v4697_v20, %v4669_v61  ;;  %vm1958_vm15 = vweird.f32 %v4697_v20 }
 0x27f   : > { %3279 = vrcp.f32 %v1850_v59  ;;  %v2969_v41 = vmul.f32 -1.442695, %v4691_v8  ;;  %v3274_v58 = vpop.eup %3273  ;;  %v1983_v14 = vmul.f32 %v4700_v19, %v4674_v50  ;;  %v1933_v25 = vand.u32 2147483648, %v1850_v59  ;;  %vm4789_vm7 = vmor %vm1957_vm13, %vm1958_vm15 }
 0x280   : > { %v4704_v6 = vpop.eup %3275  ;;  %3281 = vpow2.f32 %v2960_v60  ;;  %v4709_v43 = vadd.f32 1.0, %v3274_v58  ;;  %v1931_v22 = vand.u32 2147483647, %v1850_v59  ;;  %v1954_v10 = vsub.f32 1.0, %v1953_v51 }
 0x281   : > { %v3278_v16 = vpop.eup %3277  ;;  %3283 = vpow2.f32 %v2964_v2  ;;  %v1968_v45 = vmul.f32 %v4704_v6, %v4677_v47  ;;  %v1984_v28 = vsub.f32 1.0, %v1983_v14  ;;  %vm1927_vm11 = vweird.f32 %v1850_v59 }
 0x282   : > { %3285 = vpow2.f32 %v2969_v41  ;;  %v4716_v33 = vadd.f32 1.0, %v3278_v16  ;;  %v1934_v7 = vor.u32 1.1754944e-38, %v1933_v25  ;;  %vm1932_vm14 = vcmp.eq.f32.partialorder %v1931_v22, 8.507059e+37 }
 0x283   : > { %v2577_v24 = vpop.f32.mrf.mxu3  ;;  %3287 = vpow2.f32 %v2968_v0  ;;  %v1969_v62 = vsub.f32 1.0, %v1968_v45  ;;  %v1985_v11 = vmul.f32 %v4700_v19, %v1984_v28  ;;  %v1955_v29 = vmul.f32 %v4697_v20, %v1954_v10 }
 0x284   : > { %2584 = vrot.lane.b32.xlu1 %v2577_v24, %s5175_s25  ;;  %3289 = vrcp.f32 %v4709_v43  ;;  %v1795_v37 = vpop.f32.mrf.mxu2  ;;  %v1978_v24 = vand.u32 2147483648, %v4677_v47  ;;  %vm1988_vm2 = vweird.f32 %v4700_v19  ;;  %v1991_v51 = vand.u32 2147483647, %v4674_v50 }
 0x285   : > { %v3280_v26 = vpop.eup %3279  ;;  %3291 = vrcp.f32 %v4716_v33  ;;  %v4741_v34 = vadd.f32 %v1795_v37, %v4614_v63  ;;  %v1970_v41 = vmul.f32 %v4704_v6, %v1969_v62  ;;  %v1986_v58 = vadd.f32 %v4700_v19, %v1985_v11  ;;  %vm4771_vm6 = vmor %vm1987_vm4, %vm1988_vm2 }
 0x286   : > { %v1923_v36 = vmul.f32 %v3280_v26, %v1850_v59  ;;  %v3282_v17 = vpop.eup %3281  ;;  %vm1928_vm10 = vweird.f32 %v3280_v26  ;;  %v1993_v45 = vand.u32 2147483648, %v4674_v50  ;;  %vm1973_vm5 = vweird.f32 %v4704_v6 }
 0x287   : > { %v3284_v40 = vpop.eup %3283  ;;  %v4722_v32 = vadd.f32 1.0, %v3282_v17  ;;  %vm1929_vm12 = vmor %vm1927_vm11, %vm1928_vm10  ;;  %v1971_v17 = vadd.f32 %v4704_v6, %v1970_v41  ;;  %v1990_v50 = vsel %vm4771_vm6, %v4700_v19, %v1986_v58  ;;  %v1979_v62 = vor.u32 1.1754944e-38, %v1978_v24 }
 0x288   : > { %v1924_v27 = vsub.f32 1.0, %v1923_v36  ;;  %v3286_v49 = vpop.eup %3285  ;;  %v4729_v4 = vadd.f32 1.0, %v3284_v40  ;;  %v2970_v36 = vmul.f32 -1.442695, %v4741_v34  ;;  %vm4803_vm9 = vmor %vm1972_vm1, %vm1973_vm5  ;;  %vm1992_vm10 = vcmp.eq.f32.partialorder %v1991_v51, 8.507059e+37 }
 0x289   : > { %3293 = vrcp.f32 %v4722_v32  ;;  %v3288_v38 = vpop.eup %3287  ;;  %v4734_v57 = vadd.f32 1.0, %v3286_v49  ;;  %v1975_v11 = vsel %vm4803_vm9, %v4704_v6, %v1971_v17  ;;  %vm1942_vm11 = vweird.f32 %v4722_v32 }
 0x28a   : > { %v1925_v31 = vmul.f32 %v3280_v26, %v1924_v27  ;;  %3295 = vpow2.f32 %v2967_v55  ;;  %v4736_v15 = vpop.eup %3289  ;;  %v4745_v59 = vadd.f32 1.0, %v3288_v38  ;;  %vm1977_vm15 = vcmp.eq.f32.partialorder %v1976_v3, 8.507059e+37 }
 0x28b   : > { %v2579_v35 = vpop.f32.mrf.mxu3  ;;  %v4748_v2 = vpop.eup %3291  ;;  %3297 = vrcp.f32 %v4729_v4  ;;  %v2028_v0 = vmul.f32 %v4736_v15, %v4709_v43  ;;  %vm2033_vm1 = vweird.f32 %v4736_v15  ;;  %vm2032_vm2 = vweird.f32 %v4709_v43 }
 0x28c   : > { %2586 = vrot.lane.b32.xlu0 %v2579_v35, %s5175_s25  ;;  %v1926_v52 = vadd.f32 %v3280_v26, %v1925_v31  ;;  %3299 = vrcp.f32 %v4734_v57  ;;  %v2013_v55 = vmul.f32 %v4748_v2, %v4716_v33  ;;  %v1948_v31 = vand.u32 2147483648, %v4722_v32  ;;  %vm4842_vm5 = vmor %vm2032_vm2, %vm2033_vm1  ;;  %s3419_s25 = smov 6  }
 0x28d   : > { %3301 = vrcp.f32 %v4745_v59  ;;  %v2029_v35 = vsub.f32 1.0, %v2028_v0  ;;  %vm2018_vm4 = vweird.f32 %v4748_v2  ;;  %vm2017_vm6 = vweird.f32 %v4716_v33 }
 0x28e   : > { %v1930_v44 = vsel %vm1929_vm12, %v3280_v26, %v1926_v52  ;;  %v1956_v26 = vadd.f32 %v4697_v20, %v1955_v29  ;;  %v1946_v52 = vand.u32 2147483647, %v4722_v32  ;;  %3303 = vpow2.f32 %v2970_v36 }
 0x28f   : > { %v1935_v5 = vsel %vm1932_vm14, %v1934_v7, %v1930_v44  ;;  %v3294_v63 = vpop.eup %3293  ;;  %v1994_v7 = vor.u32 1.1754944e-38, %v1993_v45  ;;  %v2014_v44 = vsub.f32 1.0, %v2013_v55  ;;  %v1949_v41 = vor.u32 1.1754944e-38, %v1948_v31 }
 0x290   : > { %v2106_v60 = vmul.f32 %v1935_v5, %v4663_v13  ;;  %v3296_v16 = vpop.eup %3295  ;;  %v1938_v14 = vmul.f32 %v3294_v63, %v4722_v32  ;;  %vm1943_vm8 = vweird.f32 %v3294_v63  ;;  %v1960_v37 = vsel %vm4789_vm7, %v4697_v20, %v1956_v26  ;;  %vm4857_vm7 = vmor %vm2017_vm6, %vm2018_vm4 }
 0x291   : > { %v4780_v40 = vadd.f32 1.0, %v3296_v16  ;;  %v4783_v22 = vpop.eup %3297  ;;  %v1995_v5 = vsel %vm1992_vm10, %v1994_v7, %v1990_v50  ;;  %vm1944_vm12 = vmor %vm1942_vm11, %vm1943_vm8  ;;  %vm1947_vm13 = vcmp.eq.f32.partialorder %v1946_v52, 8.507059e+37  ;;  %vm1962_vm14 = vcmp.eq.f32.partialorder %v1961_v39, 8.507059e+37 }
 0x292   : > { %v2123_v13 = vmul.f32 %v4629_v46, %v2106_v60  ;;  %v1939_v25 = vsub.f32 1.0, %v1938_v14  ;;  %v4794_v19 = vpop.eup %3299  ;;  %v1998_v47 = vmul.f32 %v4783_v22, %v4729_v4  ;;  %v2030_v60 = vmul.f32 %v4736_v15, %v2029_v35 }
 0x293   : > { %v4811_v20 = vpop.eup %3301  ;;  %3305 = vrcp.f32 %v4780_v40  ;;  %v2073_v6 = vmul.f32 %v4794_v19, %v4734_v57  ;;  %v1964_v32 = vor.u32 1.1754944e-38, %v1963_v30  ;;  %v2015_v16 = vmul.f32 %v4748_v2, %v2014_v44 }
 0x294   : > { %v2147_v27 = vsel %vm575_vm0, %v2123_v13, 0.0  ;;  %v1940_v10 = vmul.f32 %v3294_v63, %v1939_v25  ;;  %v3304_v0 = vpop.eup %3303  ;;  %v1980_v13 = vsel %vm1977_vm15, %v1979_v62, %v1975_v11  ;;  %v2058_v26 = vmul.f32 %v4811_v20, %v4745_v59 }
 0x295   : > { %2148 = vadd.xlane.f32.xlu2 %v2147_v27  ;;  %v1965_v36 = vsel %vm1962_vm14, %v1964_v32, %v1960_v37  ;;  %v2031_v51 = vadd.f32 %v4736_v15, %v2030_v60  ;;  %v1999_v61 = vsub.f32 1.0, %v1998_v47  ;;  %v2038_v39 = vand.u32 2147483648, %v4709_v43 }
 0x296   : > { %v1941_v29 = vadd.f32 %v3294_v63, %v1940_v10  ;;  %v2074_v30 = vsub.f32 1.0, %v2073_v6  ;;  %v2109_v45 = vmul.f32 %v1980_v13, %v4657_v42  ;;  %v2036_v27 = vand.u32 2147483647, %v4709_v43 }
 0x297   : > { %v2059_v55 = vsub.f32 1.0, %v2058_v26  ;;  %v2021_v42 = vand.u32 2147483647, %v4716_v33  ;;  %v2023_v43 = vand.u32 2147483648, %v4716_v33  ;;  %v2035_v50 = vsel %vm4842_vm5, %v4736_v15, %v2031_v51 }
 0x298   : > { %v1945_v24 = vsel %vm1944_vm12, %v3294_v63, %v1941_v29  ;;  %v2110_v63 = vmul.f32 %v1995_v5, %v4653_v54  ;;  %v2016_v54 = vadd.f32 %v4748_v2, %v2015_v16  ;;  %v2000_v35 = vmul.f32 %v4783_v22, %v1999_v61 }
 0x299   : > { %v1950_v58 = vsel %vm1947_vm13, %v1949_v41, %v1945_v24  ;;  %v4838_v17 = vpop.eup %3305  ;;  %v2039_v31 = vor.u32 1.1754944e-38, %v2038_v39  ;;  %v2075_v49 = vmul.f32 %v4794_v19, %v2074_v30  ;;  %v2108_v52 = vmul.f32 %v1965_v36, %v4650_v12 }
 0x29a   : > { %v2107_v14 = vmul.f32 %v1950_v58, %v4687_v23  ;;  %v4836_v23 = vadd.f32 1.0, %v3304_v0  ;;  %v2127_v10 = vmul.f32 %v4629_v46, %v2110_v63  ;;  %vm2037_vm8 = vcmp.eq.f32.partialorder %v2036_v27, 8.507059e+37 }
 0x29b   : > { %v2043_v33 = vmul.f32 %v4838_v17, %v4780_v40  ;;  %v2008_v15 = vand.u32 2147483648, %v4729_v4  ;;  %v2020_v38 = vsel %vm4857_vm7, %v4748_v2, %v2016_v54  ;;  %v2040_v62 = vsel %vm2037_vm8, %v2039_v31, %v2035_v50 }
 0x29c   : > { %v2124_v3 = vmul.f32 %v4629_v46, %v2107_v14  ;;  %3307 = vrcp.f32 %v4836_v23  ;;  %v2060_v7 = vmul.f32 %v4811_v20, %v2059_v55  ;;  %vm2003_vm9 = vweird.f32 %v4783_v22 }
 0x29d   : > { %vm2022_vm10 = vcmp.eq.f32.partialorder %v2021_v42, 8.507059e+37  ;;  %v2024_v12 = vor.u32 1.1754944e-38, %v2023_v43  ;;  %v2126_v11 = vmul.f32 %v4629_v46, %v2109_v45  ;;  %v2001_v44 = vadd.f32 %v4783_v22, %v2000_v35 }
 0x29e   : > { %v2150_v25 = vsel %vm575_vm0, %v2124_v3, 0.0  ;;  %v2076_v29 = vadd.f32 %v4794_v19, %v2075_v49  ;;  %vm2078_vm11 = vweird.f32 %v4794_v19  ;;  %v2159_v5 = vsel %vm575_vm0, %v2127_v10, 0.0 }
 0x29f   : > { %2151 = vadd.xlane.f32.xlu2 %v2150_v25  ;;  %v2025_v47 = vsel %vm2022_vm10, %v2024_v12, %v2020_v38  ;;  %v2113_v2 = vmul.f32 %v2040_v62, %v4666_v21  ;;  %v2044_v60 = vsub.f32 1.0, %v2043_v33  ;;  %v2083_v41 = vand.u32 2147483648, %v4734_v57 }
 0x2a0   : > { %v2061_v6 = vadd.f32 %v4811_v20, %v2060_v7  ;;  %vm2063_vm12 = vweird.f32 %v4811_v20  ;;  %vm2077_vm13 = vweird.f32 %v4734_v57  ;;  %v2081_v24 = vand.u32 2147483647, %v4734_v57 }
 0x2a1   : > { %vm2002_vm14 = vweird.f32 %v4729_v4  ;;  %v2006_v58 = vand.u32 2147483647, %v4729_v4  ;;  %v2068_v0 = vand.u32 2147483648, %v4745_v59  ;;  %vm4886_vm15 = vmor %vm2077_vm13, %vm2078_vm11  ;;  %v2156_v13 = vsel %vm575_vm0, %v2126_v11, 0.0 }
 0x2a2   : > { %v4881_v32 = vpop.eup %3307  ;;  %vm4893_vm1 = vmor %vm2002_vm14, %vm2003_vm9  ;;  %v2112_v57 = vmul.f32 %v2025_v47, %v4672_v48  ;;  %vm2062_vm2 = vweird.f32 %v4745_v59  ;;  %v2066_v4 = vand.u32 2147483647, %v4745_v59  ;;  %v2080_v26 = vsel %vm4886_vm15, %v4794_v19, %v2076_v29 }
 0x2a3   : > { %v2005_v14 = vsel %vm4893_vm1, %v4783_v22, %v2001_v44  ;;  %v2009_v36 = vor.u32 1.1754944e-38, %v2008_v15  ;;  %v2045_v63 = vmul.f32 %v4838_v17, %v2044_v60  ;;  %vm4909_vm4 = vmor %vm2062_vm2, %vm2063_vm12  ;;  %v2084_v48 = vor.u32 1.1754944e-38, %v2083_v41 }
 0x2a4   : > { %v2065_v59 = vsel %vm4909_vm4, %v4811_v20, %v2061_v6  ;;  %vm2082_vm5 = vcmp.eq.f32.partialorder %v2081_v24, 8.507059e+37  ;;  %v2088_v19 = vmul.f32 %v4881_v32, %v4836_v23  ;;  %v2130_v22 = vmul.f32 %v4629_v46, %v2113_v2  ;;  %v4961_v6 = vld [vmem:[%s5160_s9] ss:$0 sm:$0xff] }
 0x2a5   : > { %vm2007_vm6 = vcmp.eq.f32.partialorder %v2006_v58, 8.507059e+37  ;;  %v2069_v61 = vor.u32 1.1754944e-38, %v2068_v0  ;;  %v2085_v39 = vsel %vm2082_vm5, %v2084_v48, %v2080_v26  ;;  %v2125_v30 = vmul.f32 %v4629_v46, %v2108_v52  ;;  %v4935_v52 = vpop.xlane.xlu0 %2452  ;;  %v2595_v0 = vpop.permute.xlu2 %2594 }
 0x2a6   : > { %v2010_v3 = vsel %vm2007_vm6, %v2009_v36, %v2005_v14  ;;  %vm2067_vm7 = vcmp.eq.f32.partialorder %v2066_v4, 8.507059e+37  ;;  %v2129_v45 = vmul.f32 %v4629_v46, %v2112_v57  ;;  %vm2048_vm8 = vweird.f32 %v4838_v17 }
 0x2a7   : > { %2160 = vadd.xlane.f32.xlu2 %v2159_v5  ;;  %v2070_v27 = vsel %vm2067_vm7, %v2069_v61, %v2065_v59  ;;  %v2046_v20 = vadd.f32 %v4838_v17, %v2045_v63  ;;  %v2116_v54 = vmul.f32 %v2085_v39, %v4691_v8  ;;  %v2089_v28 = vsub.f32 1.0, %v2088_v19 }
 0x2a8   : > { %v2168_v55 = vsel %vm575_vm0, %v2130_v22, 0.0  ;;  %v2111_v25 = vmul.f32 %v2010_v3, %v4684_v18  ;;  %v2053_v42 = vand.u32 2147483648, %v4780_v40  ;;  %v2153_v43 = vsel %vm575_vm0, %v2125_v30, 0.0 }
 0x2a9   : > { %vm2047_vm9 = vweird.f32 %v4780_v40  ;;  %v2051_v50 = vand.u32 2147483647, %v4780_v40  ;;  %v2115_v35 = vmul.f32 %v2070_v27, %v4694_v9  ;;  %v2165_v31 = vsel %vm575_vm0, %v2129_v45, 0.0 }
 0x2aa   : > { %vm2049_vm10 = vmor %vm2047_vm9, %vm2048_vm8  ;;  %v2090_v18 = vmul.f32 %v4881_v32, %v2089_v28  ;;  %v2133_v49 = vmul.f32 %v4629_v46, %v2116_v54  ;;  %v2054_v10 = vor.u32 1.1754944e-38, %v2053_v42  ;;  %v2128_v37 = vmul.f32 %v4629_v46, %v2111_v25 }
 0x2ab   : > { %v2050_v8 = vsel %vm2049_vm10, %v4838_v17, %v2046_v20  ;;  %vm2052_vm11 = vcmp.eq.f32.partialorder %v2051_v50, 8.507059e+37  ;;  %v2132_v40 = vmul.f32 %v4629_v46, %v2115_v35  ;;  %vm2093_vm12 = vweird.f32 %v4881_v32 }
 0x2ac   : > { %v2055_v9 = vsel %vm2052_vm11, %v2054_v10, %v2050_v8  ;;  %v2091_v33 = vadd.f32 %v4881_v32, %v2090_v18  ;;  %v2177_v15 = vsel %vm575_vm0, %v2133_v49, 0.0  ;;  %v2098_v17 = vand.u32 2147483648, %v4836_v23 }
 0x2ad   : > { %v2162_v38 = vsel %vm575_vm0, %v2128_v37, 0.0  ;;  %v2114_v62 = vmul.f32 %v2055_v9, %v4712_v56  ;;  %vm2092_vm13 = vweird.f32 %v4836_v23  ;;  %v2096_v7 = vand.u32 2147483647, %v4836_v23  ;;  %v4950_v47 = vpop.permute.xlu0 %2474  ;;  %v4970_v57 = vpop.permute.xlu2 %2476 }
 0x2ae   : > { %2157 = vadd.xlane.f32.xlu1 %v2156_v13  ;;  %v2174_v12 = vsel %vm575_vm0, %v2132_v40, 0.0  ;;  %vm2094_vm14 = vmor %vm2092_vm13, %vm2093_vm12  ;;  %v2099_v44 = vor.u32 1.1754944e-38, %v2098_v17  ;;  %vm2508_vm10 = vcmask 7168  }
 0x2af   : > { %2169 = vadd.xlane.f32.xlu2 %v2168_v55  ;;  %v2095_v11 = vsel %vm2094_vm14, %v4881_v32, %v2091_v33  ;;  %vm2097_vm15 = vcmp.eq.f32.partialorder %v2096_v7, 8.507059e+37  ;;  %v2131_v29 = vmul.f32 %v4629_v46, %v2114_v62  ;;  %v4963_v32 = vpop.xlane.xlu1 %2455 }
 0x2b0   : > { %v2100_v5 = vsel %vm2097_vm15, %v2099_v44, %v2095_v11 }
 0x2b1   : > { %v2117_v56 = vmul.f32 %v2100_v5, %v4741_v34  ;;  %v2171_v2 = vsel %vm575_vm0, %v2131_v29, 0.0 }
 0x2b3   : > { %v2134_v23 = vmul.f32 %v4629_v46, %v2117_v56 }
 0x2b5   : > { %v2180_v41 = vsel %vm575_vm0, %v2134_v23, 0.0 }
 0x2b6   : > { %2166 = vadd.xlane.f32.xlu1 %v2165_v31  ;;  %2154 = vadd.xlane.f32.xlu0 %v2153_v43  ;;  %v4955_v60 = vpop.xlane.xlu0 %2136  ;;  %v4973_v63 = vpop.xlane.xlu2 %2139 }
 0x2b7   : > { %2178 = vadd.xlane.f32.xlu2 %v2177_v15 }
 0x2be   : > { %2175 = vadd.xlane.f32.xlu1 %v2174_v12  ;;  %2163 = vadd.xlane.f32.xlu0 %v2162_v38 }
 0x2c6   : > { %2172 = vadd.xlane.f32.xlu0 %v2171_v2 }
 0x2ce   : > { %2181 = vadd.xlane.f32.xlu0 %v2180_v41 }
 0x2cf   : > { %v2143_v24 = vpop.xlane.xlu0 %2142 }
 0x2d0   : > { %v2188_v34 = vadd.f32 %v4961_v6, %v2143_v24 }
 0x2d2   : > { %2216 = vrot.lane.b32.xlu2 %v2188_v34, %s5173_s24 }
 0x2d9   : > { %v2146_v58 = vpop.xlane.xlu1 %2145 }
 0x2da   : > { %v2189_v46 = vadd.f32 %v4961_v6, %v2146_v58 }
 0x2e2   : > { %2218 = vrot.lane.b32.xlu0 %v2189_v46, %s5173_s24  ;;  %s3418_s24 = smov 7  }
 0x2f6   : > { %v2585_v21 = vpop.permute.xlu1 %2584 }
 0x2f7   : > { %v2590_v13 = vadd.f32 %v2585_v21, %v3620_v53 }
 0x2f9   : > { %v2597_v16 = vadd.f32 %v2595_v0, %v2590_v13 }
 0x2fb   : > { %v2980_v4 = vmul.f32 -1.442695, %v2597_v16 }
 0x2fd   : > { %3309 = vpow2.f32 %v2980_v4  ;;  %v4996_v4 = vld [vmem:[%s3550_s30] sm:$0xff] }
 0x2fe   : > { %v2587_v26 = vpop.permute.xlu0 %2586 }
 0x2ff   : > { %v2591_v14 = vadd.f32 %v2587_v26, %v3644_v1 }
 0x301   : > { %v2598_v36 = vadd.f32 %v2595_v0, %v2591_v14  ;;  %v5000_v14 = vld [vmem:[%s3558_s14] sm:$0xff] }
 0x303   : > { %v3310_v51 = vpop.eup %3309  ;;  %v2981_v48 = vmul.f32 -1.442695, %v2598_v36 }
 0x304   : > { %v2605_v59 = vadd.f32 1.0, %v3310_v51 }
 0x305   : > { %3311 = vpow2.f32 %v2981_v48  ;;  %v5006_v48 = vld [vmem:[%s3550_s30 + $0x8] sm:$0xff]  ;;  %s5260_s30 = smov 125  }
 0x306   : > { %3313 = vrcp.f32 %v2605_v59  ;;  %vm2612_vm4 = vweird.f32 %v2605_v59  ;;  %v2618_v50 = vand.u32 2147483648, %v2605_v59  ;;  %v2616_v35 = vand.u32 2147483647, %v2605_v59 }
 0x308   : > { %v2149_v19 = vpop.xlane.xlu2 %2148  ;;  %v2619_v10 = vor.u32 1.1754944e-38, %v2618_v50  ;;  %vm2617_vm9 = vcmp.eq.f32.partialorder %v2616_v35, 8.507059e+37 }
 0x309   : > { %v2190_v53 = vadd.f32 %v4961_v6, %v2149_v19  ;;  %v5010_v19 = vld [vmem:[%s3558_s14 + $0x8] sm:$0xff]  ;;  %s5261_s14 = smov 124  }
 0x30b   : > { %v3312_v22 = vpop.eup %3311  ;;  %2250 = vrot.lane.b32.xlu1 %v2190_v53, %s3414_s12 }
 0x30c   : > { %v3314_v61 = vpop.eup %3313  ;;  %v2606_v39 = vadd.f32 1.0, %v3312_v22 }
 0x30d   : > { %v2608_v30 = vmul.f32 %v3314_v61, %v2605_v59  ;;  %vm2613_vm1 = vweird.f32 %v3314_v61 }
 0x30e   : > { %3315 = vrcp.f32 %v2606_v39  ;;  %v2633_v28 = vand.u32 2147483648, %v2606_v39  ;;  %v2631_v43 = vand.u32 2147483647, %v2606_v39  ;;  %vm2614_vm5 = vmor %vm2612_vm4, %vm2613_vm1  ;;  %vm2627_vm6 = vweird.f32 %v2606_v39 }
 0x30f   : > { %v2609_v3 = vsub.f32 1.0, %v2608_v30 }
 0x310   : > { %v2634_v8 = vor.u32 1.1754944e-38, %v2633_v28  ;;  %vm2632_vm8 = vcmp.eq.f32.partialorder %v2631_v43, 8.507059e+37 }
 0x311   : > { %v2610_v45 = vmul.f32 %v3314_v61, %v2609_v3 }
 0x312   : > { %v2152_v54 = vpop.xlane.xlu2 %2151 }
 0x313   : > { %v2191_v55 = vadd.f32 %v4961_v6, %v2152_v54  ;;  %v2611_v25 = vadd.f32 %v3314_v61, %v2610_v45 }
 0x314   : > { %v3316_v1 = vpop.eup %3315 }
 0x315   : > { %v2623_v27 = vmul.f32 %v3316_v1, %v2606_v39  ;;  %vm2628_vm2 = vweird.f32 %v3316_v1  ;;  %2252 = vrot.lane.b32.xlu0 %v2191_v55, %s3414_s12  ;;  %v2615_v18 = vsel %vm2614_vm5, %v3314_v61, %v2611_v25  ;;  %s3417_s12 = smov 5  }
 0x316   : > { %vm2629_vm7 = vmor %vm2627_vm6, %vm2628_vm2  ;;  %v2620_v9 = vsel %vm2617_vm9, %v2619_v10, %v2615_v18 }
 0x317   : > { %v2624_v20 = vsub.f32 1.0, %v2623_v27  ;;  %v4982_v62 = vmul.f32 %v2620_v9, %v2597_v16 }
 0x319   : > { %v2625_v42 = vmul.f32 %v3316_v1, %v2624_v20 }
 0x31a   : > { %v2161_v40 = vpop.xlane.xlu2 %2160 }
 0x31b   : > { %v2626_v31 = vadd.f32 %v3316_v1, %v2625_v42  ;;  %v2194_v33 = vadd.f32 %v4961_v6, %v2161_v40 }
 0x31d   : > { %v2630_v49 = vsel %vm2629_vm7, %v3316_v1, %v2626_v31  ;;  %2318 = vrot.lane.b32.xlu0 %v2194_v33, %s3415_s29 }
 0x31e   : > { %v2635_v37 = vsel %vm2632_vm8, %v2634_v8, %v2630_v49  ;;  %v2186_v49 = vadd.f32 %v4961_v6, %v4955_v60 }
 0x31f   : > { %v4978_v15 = vmul.f32 %v2635_v37, %v2598_v36 }
 0x320   : > { %v2204_v40 = vmul.f32 %v4996_v4, %v2186_v49 }
 0x321   : > { %v2158_v17 = vpop.xlane.xlu1 %2157  ;;  %v2639_v7 = vpack.c.bf16 %v4978_v15, %v4982_v62 }
 0x322   : > { %v2193_v38 = vadd.f32 %v4961_v6, %v2158_v17  ;;  %v2170_v12 = vpop.xlane.xlu2 %2169 }
 0x323   : > { %v2197_v11 = vadd.f32 %v4961_v6, %v2170_v12 }
 0x324   : > { %2286 = vrot.lane.b32.xlu1 %v2193_v38, %s3416_s13 }
 0x325   : > { %2354 = vrot.lane.b32.xlu0 %v2197_v11, %s3417_s12 }
 0x329   : > { %v2167_v44 = vpop.xlane.xlu1 %2166  ;;  %v2155_v29 = vpop.xlane.xlu0 %2154 }
 0x32a   : > { %v2196_v5 = vadd.f32 %v4961_v6, %v2167_v44  ;;  %v2192_v56 = vadd.f32 %v4961_v6, %v2155_v29  ;;  %v2179_v2 = vpop.xlane.xlu2 %2178 }
 0x32b   : > { %v2200_v23 = vadd.f32 %v4961_v6, %v2179_v2 }
 0x32c   : > { %2352 = vrot.lane.b32.xlu1 %v2196_v5, %s3417_s12  ;;  %2284 = vrot.lane.b32.xlu2 %v2192_v56, %s3416_s13  ;;  %s5265_s13 = smov 64  }
 0x32d   : > { %2420 = vrot.lane.b32.xlu0 %v2200_v23, %s3418_s24  ;;  %v2187_v23 = vadd.f32 %v4961_v6, %v4973_v63 }
 0x331   : > { %v2164_v41 = vpop.xlane.xlu0 %2163  ;;  %v2176_v46 = vpop.xlane.xlu1 %2175 }
 0x332   : > { %v2195_v24 = vadd.f32 %v4961_v6, %v2164_v41  ;;  %v2199_v21 = vadd.f32 %v4961_v6, %v2176_v46  ;;  %v2217_v16 = vpop.permute.xlu2 %2216 }
 0x333   : > { %v2222_v26 = vmul.f32 %v4996_v4, %v2217_v16  ;;  %v2234_v36 = vmul.f32 %v5000_v14, %v2217_v16  ;;  %v2480_v16 = vsel %vm575_vm0, %v4950_v47, 0.0  ;;  %v3005_v47 = vld [vmem:[%s5158_s7 + $0x38] sm:$0xff] }
 0x334   : > { %2320 = vrot.lane.b32.xlu2 %v2195_v24, %s3415_s29  ;;  %2665 = vmatpush.bf16.msra.mxu0 %v3005_v47 }
 0x339   : > { %v2173_v34 = vpop.xlane.xlu0 %2172 }
 0x33a   : > { %v2198_v58 = vadd.f32 %v4961_v6, %v2173_v34  ;;  %v2205_v34 = vmul.f32 %v5006_v48, %v2187_v23 }
 0x33c   : > { %2386 = vrot.lane.b32.xlu2 %v2198_v58, %s3419_s25 }
 0x341   : > { %v2182_v0 = vpop.xlane.xlu0 %2181 }
 0x342   : > { %v2201_v13 = vadd.f32 %v4961_v6, %v2182_v0 }
 0x344   : > { %2388 = vrot.lane.b32.xlu2 %v2199_v21, %s3419_s25  ;;  %2422 = vrot.lane.b32.xlu1 %v2201_v13, %s3418_s24  ;;  %s5263_s25 = smov 121   ;;  %s5264_s24 = smov 122   ;;  %v2483_v21 = vsel %vm575_vm0, %v4970_v57, 0.0 }
 0x34c   : > { %2226 = vrot.lane.b32.xlu2 %v2222_v26, %s3406_s22  ;;  %2238 = vrot.lane.b32.xlu1 %v2234_v36, %s3406_s22 }
 0x354   : > { %v2219_v51 = vpop.permute.xlu0 %2218 }
 0x355   : > { %v2223_v59 = vmul.f32 %v5006_v48, %v2219_v51  ;;  %v2235_v22 = vmul.f32 %v5010_v19, %v2219_v51 }
 0x357   : > { %2240 = vrot.lane.b32.xlu1 %v2235_v22, %s3406_s22  ;;  %2228 = vrot.lane.b32.xlu0 %v2223_v59, %s3406_s22  ;;  %s5262_s22 = smov 123  }
 0x37d   : > { %v2251_v53 = vpop.permute.xlu1 %2250 }
 0x37e   : > { %v2256_v61 = vmul.f32 %v4996_v4, %v2251_v53  ;;  %v2268_v39 = vmul.f32 %v5000_v14, %v2251_v53 }
 0x380   : > { %2260 = vrot.lane.b32.xlu2 %v2256_v61, %s5176_s16  ;;  %2272 = vrot.lane.b32.xlu1 %v2268_v39, %s5176_s16 }
 0x386   : > { %v2285_v30 = vpop.permute.xlu2 %2284 }
 0x387   : > { %v2253_v3 = vpop.permute.xlu0 %2252  ;;  %v2302_v54 = vmul.f32 %v5000_v14, %v2285_v30  ;;  %v2290_v50 = vmul.f32 %v4996_v4, %v2285_v30 }
 0x388   : > { %v2257_v1 = vmul.f32 %v5006_v48, %v2253_v3  ;;  %v2269_v45 = vmul.f32 %v5010_v19, %v2253_v3  ;;  %v2208_v3 = vmul.f32 %v5000_v14, %v2186_v49 }
 0x38a   : > { %2274 = vrot.lane.b32.xlu1 %v2269_v45, %s5176_s16  ;;  %2262 = vrot.lane.b32.xlu0 %v2257_v1, %s5176_s16 }
 0x38e   : > { %v2321_v27 = vpop.permute.xlu2 %2320 }
 0x38f   : > { %v2319_v20 = vpop.permute.xlu0 %2318  ;;  %v2337_v33 = vmul.f32 %v5010_v19, %v2321_v27  ;;  %v2325_v2 = vmul.f32 %v5006_v48, %v2321_v27 }
 0x390   : > { %v2336_v28 = vmul.f32 %v5000_v14, %v2319_v20  ;;  %v2324_v60 = vmul.f32 %v4996_v4, %v2319_v20 }
 0x392   : > { %2306 = vrot.lane.b32.xlu1 %v2302_v54, %s5260_s30  ;;  %2340 = vrot.lane.b32.xlu0 %v2336_v28, %s5261_s14  ;;  %v3004_v28 = vld [vmem:[%s5158_s7 + $0x30] sm:$0xff] }
 0x393   : > { %2666 = vmatpush.bf16.msra.mxu0 %v3004_v28 }
 0x396   : > { %v2287_v55 = vpop.permute.xlu1 %2286  ;;  %v2387_v25 = vpop.permute.xlu2 %2386 }
 0x397   : > { %v2303_v42 = vmul.f32 %v5010_v19, %v2287_v55  ;;  %v2355_v43 = vpop.permute.xlu0 %2354  ;;  %v2291_v8 = vmul.f32 %v5006_v48, %v2287_v55  ;;  %v2404_v17 = vmul.f32 %v5000_v14, %v2387_v25  ;;  %v2392_v41 = vmul.f32 %v4996_v4, %v2387_v25 }
 0x398   : > { %v2371_v12 = vmul.f32 %v5010_v19, %v2355_v43  ;;  %v2359_v11 = vmul.f32 %v5006_v48, %v2355_v43  ;;  %v2457_v25 = vadd.f32 1e-06, %v4935_v52  ;;  %v2458_v52 = vadd.f32 1e-06, %v4963_v32 }
 0x399   : > { %2308 = vrot.lane.b32.xlu2 %v2303_v42, %s5260_s30 }
 0x39a   : > { %2294 = vrot.lane.b32.xlu1 %v2290_v50, %s5260_s30  ;;  %3317 = vrcp.f32 %v2457_v25 }
 0x39b   : > { %3319 = vrcp.f32 %v2458_v52 }
 0x39e   : > { %v2353_v35 = vpop.permute.xlu1 %2352  ;;  %v2389_v31 = vpop.permute.xlu2 %2388 }
 0x39f   : > { %v2370_v18 = vmul.f32 %v5000_v14, %v2353_v35  ;;  %v2421_v10 = vpop.permute.xlu0 %2420  ;;  %v2405_v29 = vmul.f32 %v5010_v19, %v2389_v31  ;;  %v2358_v24 = vmul.f32 %v4996_v4, %v2353_v35  ;;  %v2393_v15 = vmul.f32 %v5006_v48, %v2389_v31 }
 0x3a0   : > { %v2438_v37 = vmul.f32 %v5000_v14, %v2421_v10  ;;  %v2426_v56 = vmul.f32 %v4996_v4, %v2421_v10  ;;  %v2209_v31 = vmul.f32 %v5010_v19, %v2187_v23 }
 0x3a1   : > { %2296 = vrot.lane.b32.xlu2 %v2291_v8, %s5260_s30  ;;  %2374 = vrot.lane.b32.xlu0 %v2370_v18, %s5262_s22 }
 0x3a2   : > { %2442 = vrot.lane.b32.xlu1 %v2438_v37, %s5263_s25  ;;  %v3318_v37 = vpop.eup %3317 }
 0x3a6   : > { %v2227_v9 = vpop.permute.xlu2 %2226 }
 0x3a7   : > { %v2232_v38 = vadd.f32 %v2227_v9, %v2204_v40 }
 0x3a9   : > { %2342 = vrot.lane.b32.xlu2 %v2337_v33, %s5261_s14  ;;  %2408 = vrot.lane.b32.xlu0 %v2404_v17, %s5264_s24 }
 0x3aa   : > { %2328 = vrot.lane.b32.xlu1 %v2324_v60, %s5261_s14 }
 0x3b1   : > { %2376 = vrot.lane.b32.xlu2 %v2371_v12, %s5262_s22 }
 0x3b2   : > { %2364 = vrot.lane.b32.xlu1 %v2359_v11, %s5262_s22 }
 0x3b6   : > { %v2423_v44 = vpop.permute.xlu1 %2422 }
 0x3b7   : > { %v2439_v5 = vmul.f32 %v5010_v19, %v2423_v44  ;;  %v2427_v62 = vmul.f32 %v5006_v48, %v2423_v44 }
 0x3b9   : > { %2444 = vrot.lane.b32.xlu0 %v2439_v5, %s5263_s25  ;;  %2410 = vrot.lane.b32.xlu2 %v2405_v29, %s5264_s24 }
 0x3ba   : > { %2430 = vrot.lane.b32.xlu1 %v2426_v56, %s5263_s25  ;;  %v3320_v56 = vpop.eup %3319 }
 0x3be   : > { %v2239_v0 = vpop.permute.xlu1 %2238 }
 0x3bf   : > { %v2244_v57 = vadd.f32 %v2239_v0, %v2208_v3 }
 0x3c1   : > { %2642 = vrot.lane.b32.xlu0 %v2639_v7, %s5265_s13  ;;  %2330 = vrot.lane.b32.xlu2 %v2325_v2, %s5261_s14  ;;  %s3006_s13 = sshll.u32 %s3503_s21, 4  ;;  %s3351_s21 = scalar_lea.hbm %s5162_s11, 32 }
 0x3c9   : > { %2362 = vrot.lane.b32.xlu0 %v2358_v24, %s5262_s22  ;;  %2396 = vrot.lane.b32.xlu2 %v2392_v41, %s5264_s24  ;;  %v2229_v58 = vpop.permute.xlu0 %2228  ;;  %v2241_v13 = vpop.permute.xlu1 %2240 }
 0x3ca   : > { %v2233_v46 = vadd.f32 %v2229_v58, %v2205_v34  ;;  %v2245_v49 = vadd.f32 %v2241_v13, %v2209_v31 }
 0x3d1   : > { %2398 = vrot.lane.b32.xlu0 %v2393_v15, %s5264_s24  ;;  %s466_s24 = sand.u32 1, %s3385_s18  }
 0x3d2   : > { %s2853_s30 = sshll.u32 %s466_s24, 4 }
 0x3d3   : > { %s468_s14 = scalar_lea.vmem [#allocation2], %s2853_s30 }
 0x3d9   : > { %2432 = vrot.lane.b32.xlu0 %v2427_v62, %s5263_s25  ;;  %s5266_s25 = smov 1  }
 0x3da   : > { %v2261_v63 = vpop.permute.xlu2 %2260 }
 0x3db   : > { %v2266_v7 = vadd.f32 %v2261_v63, %v2232_v38 }
 0x3e4   : > { %2484 = vadd.xlane.f32.xlu1 %v2483_v21 }
 0x3f2   : > { %2481 = vadd.xlane.f32.xlu2 %v2480_v16  ;;  %v2273_v26 = vpop.permute.xlu1 %2272 }
 0x3f3   : > { %v2309_v4 = vpop.permute.xlu2 %2308  ;;  %v2278_v45 = vadd.f32 %v2273_v26, %v2244_v57 }
 0x3fb   : > { %v2297_v36 = vpop.permute.xlu2 %2296 }
 0x3fc   : > { %v2275_v51 = vpop.permute.xlu1 %2274  ;;  %v2263_v59 = vpop.permute.xlu0 %2262 }
 0x3fd   : > { %v2267_v48 = vadd.f32 %v2263_v59, %v2233_v46  ;;  %v2279_v40 = vadd.f32 %v2275_v51, %v2245_v49 }
 0x3ff   : > { %v2301_v53 = vadd.f32 %v2297_v36, %v2267_v48  ;;  %v2313_v38 = vadd.f32 %v2309_v4, %v2279_v40 }
 0x403   : > { %v2343_v22 = vpop.permute.xlu2 %2342 }
 0x404   : > { %v2307_v61 = vpop.permute.xlu1 %2306  ;;  %v2341_v39 = vpop.permute.xlu0 %2340  ;;  %v2347_v60 = vadd.f32 %v2343_v22, %v2313_v38  ;;  %v3328_v22 = vld [vmem:[%s5159_s8] sm:$0xff] }
 0x405   : > { %v2312_v55 = vadd.f32 %v2307_v61, %v2278_v45 }
 0x407   : > { %v2346_v14 = vadd.f32 %v2341_v39, %v2312_v55  ;;  %v3329_v39 = vld [vmem:[%s3566_s4] sm:$0xff] }
 0x40b   : > { %v2377_v30 = vpop.permute.xlu2 %2376 }
 0x40c   : > { %v2295_v1 = vpop.permute.xlu1 %2294  ;;  %v2381_v12 = vadd.f32 %v2377_v30, %v2347_v60 }
 0x40d   : > { %v2300_v27 = vadd.f32 %v2295_v1, %v2266_v7  ;;  %v3330_v1 = vld [vmem:[%s3566_s4 + $0x8] sm:$0xff]  ;;  %s2699_s4 = sshll.u32 %s468_s14, 4  ;;  %s2700_s4 = int_to_ptr.vmem [resolvable:$true] %s2699_s4 }
 0x413   : > { %v2411_v20 = vpop.permute.xlu2 %2410  ;;  %v2375_v54 = vpop.permute.xlu0 %2374 }
 0x414   : > { %v2443_v42 = vpop.permute.xlu1 %2442  ;;  %v2380_v43 = vadd.f32 %v2375_v54, %v2346_v14  ;;  %v2415_v44 = vadd.f32 %v2411_v20, %v2381_v12 }
 0x41b   : > { %v2331_v50 = vpop.permute.xlu2 %2330  ;;  %v2409_v35 = vpop.permute.xlu0 %2408 }
 0x41c   : > { %v2335_v8 = vadd.f32 %v2331_v50, %v2301_v53  ;;  %v2414_v18 = vadd.f32 %v2409_v35, %v2380_v43  ;;  %v2329_v33 = vpop.permute.xlu1 %2328  ;;  %v2640_v53 = vperm.slane %v3328_v22, 7 }
 0x41d   : > { %v2334_v17 = vadd.f32 %v2329_v33, %v2300_v27 }
 0x41e   : > { %v2448_v10 = vadd.f32 %v2443_v42, %v2414_v18 }
 0x420   : > { %v2463_v9 = vmul.f32 %v3318_v37, %v2448_v10 }
 0x422   : > { %2502 = vrot.lane.b32.xlu0 %v2463_v9, %s5266_s25 }
 0x423   : > { %v2397_v34 = vpop.permute.xlu2 %2396 }
 0x424   : > { %v2365_v11 = vpop.permute.xlu1 %2364 }
 0x425   : > { %v2369_v19 = vadd.f32 %v2365_v11, %v2335_v8 }
 0x42b   : > { %v2445_v29 = vpop.permute.xlu0 %2444 }
 0x42c   : > { %v2449_v5 = vadd.f32 %v2445_v29, %v2415_v44  ;;  %v2431_v58 = vpop.permute.xlu1 %2430 }
 0x42e   : > { %v2464_v2 = vmul.f32 %v3320_v56, %v2449_v5 }
 0x430   : > { %2504 = vrot.lane.b32.xlu0 %v2464_v2, %s5266_s25  ;;  %s473_s25 = scalar_lea.vmem %s5267_s0, %s3540_s15 }
 0x431   : > { %v513_v27 = vld [vmem:[%s473_s25] sm:$0xff]  ;;  %v514_v25 = vld [vmem:[%s473_s25 + $0x8] sm:$0xff]  ;;  %s2683_s25 = scalar_lea.sflag [#allocation3], %s466_s24 }
 0x433   : > { %v2643_v23 = vpop.permute.xlu0 %2642 }
 0x434   : > { %2990 = vmatmul.msk.bf16.vlgmr.msra.gmra.mxu0 %vm575_vm0, %v2643_v23 }
 0x43b   : > { %v2363_v41 = vpop.permute.xlu0 %2362 }
 0x43c   : > { %v2368_v24 = vadd.f32 %v2363_v41, %v2334_v17 }
 0x43e   : > { %v2402_v32 = vadd.f32 %v2397_v34, %v2368_v24 }
 0x440   : > { %v2436_v46 = vadd.f32 %v2431_v58, %v2402_v32 }
 0x442   : > { %v2461_v62 = vmul.f32 %v3318_v37, %v2436_v46 }
 0x443   : > { %v2399_v15 = vpop.permute.xlu0 %2398 }
 0x444   : > { %v2403_v63 = vadd.f32 %v2399_v15, %v2369_v19 }
 0x44b   : > { %v2433_v7 = vpop.permute.xlu0 %2432 }
 0x44c   : > { %v2437_v0 = vadd.f32 %v2433_v7, %v2403_v63 }
 0x44e   : > { %v2462_v21 = vmul.f32 %v3320_v56, %v2437_v0 }
 0x457   : > { %v2485_v13 = vpop.xlane.xlu1 %2484 }
 0x458   : > { %v2487_v16 = vadd.f32 %v4961_v6, %v2485_v13 }
 0x45a   : > { %2495 = vperm.xlu2 %3103, %v2487_v16  }
 0x465   : > { %v2482_v4 = vpop.xlane.xlu2 %2481 }
 0x466   : > { %v2486_v26 = vadd.f32 %v4961_v6, %v2482_v4 }
 0x468   : > { %2490 = vperm.xlu0 %3102, %v2486_v26  }
 0x494   : > { %v2503_v36 = vpop.permute.xlu0 %2502 }
 0x495   : > { %v2509_v51 = vsel %vm2508_vm10, %v2461_v62, %v2503_v36 }
 0x496   : > { %2513 = vrot.lane.b32.xlu0 %v2509_v51, %s3415_s29 }
 0x4a2   : > { %v2505_v59 = vpop.permute.xlu0 %2504 }
 0x4a3   : > { %v2510_v48 = vsel %vm2508_vm10, %v2462_v21, %v2505_v59 }
 0x4a4   : > { %2515 = vrot.lane.b32.xlu1 %v2510_v48, %s3415_s29  ;;  %s2698_s29 = scalar_lea.hbm %s5162_s11, %s3006_s13 }
 0x4a5   : > { %s2701_s22 = sshll.u32 %s2698_s29, 4  ;;  %s2702_s22 = int_to_ptr.hbm [resolvable:$true] %s2701_s22 }
 0x4a6   : > { %s3345_s0 = sshra.s32 %s2702_s22, 4  ;;  %s3346_s0 = int_to_ptr.hbm [resolvable:$true] %s3345_s0 }
 0x4a7   : > { %s3347_s1 = scalar_lea.hbm %s3346_s0, 16  ;;  %p3352_p0 = scmp.lt.s32.totalorder %s3346_s0, %s5162_s11 }
 0x4a8   : > { %p3348_p11 = scmp.ne.s32.totalorder %s3346_s0, %s3347_s1  ;;  %p3353_p1 = scmp.lt.s32.totalorder %s3351_s21, %s3347_s1 }
 0x4aa   : > { %p3349_p12 = pnand %p3348_p11, %p3520_p5  ;;  %p3354_p2 = por %p3353_p1, %p3352_p0 }
 0x4ac   : > { %p3350_p13 = pneg %p3349_p12 }
 0x4ae   : > { %p3355_p3 = pnand %p3354_p2, %p3350_p13 }
 0x4b1   : > { %v2668_v6 = vpop.f32.mrf.mxu0 }
 0x4b2   : > { %v2669_v61 = vadd.f32 %v2668_v6, %v2640_v53 }
 0x4b4   : > { %v2673_v30 = vadd.f32 %v3329_v39, %v2669_v61  ;;  %v2496_v55 = vpop.permute.xlu2 %2495 }
 0x4b5   : > { %v2499_v14 = vmul.f32 %v2496_v55, %v514_v25 }
 0x4b6   : > { %2675 = vst.msk [vmem:[%s468_s14] sm:$0xff] %vm575_vm0, %v2673_v30 }
 0x4b9   : > { %v2670_v3 = vpop.f32.mrf.mxu0 }
 0x4ba   : > { %v2671_v57 = vadd.f32 %v2670_v3, %v2640_v53 }
 0x4bc   : > { %v2674_v47 = vadd.f32 %v3330_v1, %v2671_v57 }
 0x4be   : > { %2676 = vst.msk [vmem:[%s468_s14 + $0x8] sm:$0xff] %vm575_vm0, %v2674_v47 }
 0x4da   : > { %v2491_v45 = vpop.permute.xlu0 %2490 }
 0x4db   : > { %v2498_v20 = vmul.f32 %v2491_v45, %v513_v27 }
 0x508   : > { %v2514_v54 = vpop.permute.xlu0 %2513 }
 0x509   : > { %v2519_v28 = vadd.f32 %v2514_v54, %v2498_v20 }
 0x50b   : > { %2523 = vrot.lane.b32.xlu0 %v2519_v28, %s5176_s16 }
 0x516   : > { %v2516_v42 = vpop.permute.xlu1 %2515 }
 0x517   : > { %v2520_v43 = vadd.f32 %v2516_v42, %v2499_v14 }
 0x519   : > { %2525 = vrot.lane.b32.xlu0 %v2520_v43, %s5176_s16 }
 0x57d   : > { %v2524_v50 = vpop.permute.xlu0 %2523 }
 0x57e   : > { %v2529_v35 = vadd.f32 %v2524_v50, %v513_v27 }
 0x580   : > { %2533 = vrot.lane.b32.xlu2 %v2529_v35, %s5176_s16 }
 0x581   : > { %3358 = shalt.err (!%p3355_p3)
}
 0x582   : > { %s3420_s24 = smov 128   ;;  %s3421_s13 = smov 8   ;;  %vm2541_vm0 = vcmask 15360   ;;  %vm2544_vm11 = vcmask 31744   ;;  %vm2547_vm12 = vcmask 48128  }
 0x583   : > { %3011 = dma.vmem_to_hbm [thread:$0]  (%p3520_p5), %s2700_s4, 256, %s2702_s22, %s2683_s25, %s3420_s24, %s3420_s24, %s3421_s13  }
 0x584   : > { %s5268_s12 = smov 126   ;;  %s509_s2 = scalar_lea.vmem %s5161_s10, %s3540_s15 }
 0x58b   : > { %v2526_v31 = vpop.permute.xlu0 %2525 }
 0x58c   : > { %v2530_v8 = vadd.f32 %v2526_v31, %v514_v25 }
 0x58e   : > { %2535 = vrot.lane.b32.xlu0 %v2530_v8, %s5268_s12 }
 0x5da   : > { %v2534_v18 = vpop.permute.xlu2 %2533 }
 0x5db   : > { %v2539_v49 = vadd.f32 %v2534_v18, %v513_v27 }
 0x5dd   : > { %v2542_v10 = vsel %vm2541_vm0, %v2539_v49, %v2529_v35 }
 0x5de   : > { %v2545_v37 = vsel %vm2544_vm11, %v2542_v10, %v2519_v28 }
 0x5df   : > { %v2548_v40 = vsel %vm2547_vm12, %v2545_v37, 0.0 }
 0x5e0   : > { %2550 = vst.msk [vmem:[%s509_s2] sm:$0xff] %vm2450_vm3, %v2548_v40 }
 0x600   : > { %v2536_v9 = vpop.permute.xlu0 %2535 }
 0x601   : > { %v2540_v33 = vadd.f32 %v2536_v9, %v514_v25 }
 0x603   : > { %v2543_v17 = vsel %vm2541_vm0, %v2540_v33, %v2530_v8 }
 0x604   : > { %v2546_v52 = vsel %vm2544_vm11, %v2543_v17, %v2520_v43 }
 0x605   : > { %v2549_v38 = vsel %vm2547_vm12, %v2546_v52, 0.0 }
 0x606   : > { %2551 = vst.msk [vmem:[%s509_s2 + $0x8] sm:$0xff] %vm2450_vm3, %v2549_v38 }
 0x607 PF: > { %p3017_p4 = scmp.ge.s32.totalorder %s3393_s20, 2  ;;  %s2724_s3 = sand.u32 1, %s3381_s17  }
 0x608   : > { %s2725_s27 = scalar_lea.sflag [#allocation3], %s2724_s3 }
 0x609   : > { %p3014_p5 = pnand %p3017_p4, %p3524_p6 }
 0x60b   : > { %p3015_p7 = pneg %p3014_p5 }
 0x60d   : > { %3376 = dma.done.wait (%p3015_p7), %s2725_s27, 256  }
 0x60e   : > { %3378 = vsyncadd (%p3015_p7), %s2725_s27, 4294967040  ;;  %p22_p8 = scmp.ge.s32.totalorder %s3507_s23, 4   ;;  %s5269_s17 = smov %s3385_s18 }
 0x60f   : > { %s5270_s18 = smov %s3389_s19  ;;  %s5271_s19 = smov %s3518_s26 }
 0x610   : > { %s5272_s20 = smov %s3507_s23  ;;  %24 = sbr.rel (!%p22_p8) target bundleno = 9 (0x9), region = 125 }
 0x615   :  { %2731 = vsyncpa [#allocation3], 1 }
 0x616   :  { %2733 = vsyncpa [#allocation3 + $0x1], 1 }

</bundles_post_ra>
